<compile_context>
chip_gen: v6e
topology: v6e:2x2x1
jax: 0.10.0
libtpu: 0.0.40
codegen_flags: <defaults>
</compile_context>

<pallas_src>
import functools

import jax
import jax.numpy as jnp
from jax.experimental import pallas as pl
from jax.experimental.pallas import tpu as pltpu


def _round_up(x, m):
    return (x + m - 1) // m * m


# Small graphs: keep A resident in VMEM across both layers in a single fused kernel.
_FAST_PATH_MAX_NODES = 1536            # bf16 A <= ~4.5 MiB, total kernel footprint ~15 MiB
_FAST_VMEM_LIMIT = 32 * 1024 * 1024    # safe on v5e/v6e (128 MiB) and v7x (64 MiB)

# Tiled path budgets.
_TILED_VMEM_LIMIT = 32 * 1024 * 1024   # v5e default scoped VMEM is 16 MiB -> request explicitly
_RESIDENT_XW_MAX_BYTES = 4 * 1024 * 1024


# ---------------- fast path: fused 2-layer GCN + proj head, A resident ----------------
def _fused_small_kernel(a_ref, x_ref, w1_ref, b1_ref, w2_ref, b2_ref, o_ref):
    bf = jnp.bfloat16
    # layer 1: relu(A @ (X @ W1) + b1)
    xw1 = jnp.dot(x_ref[...], w1_ref[...], preferred_element_type=jnp.float32)
    h1 = jnp.maximum(
        jnp.dot(a_ref[...], xw1.astype(bf), preferred_element_type=jnp.float32)
        + b1_ref[...],
        0.0,
    )
    # layer 2 + folded projection head: A @ (H1 @ W2') + b'
    h1w2 = jnp.dot(h1.astype(bf), w2_ref[...], preferred_element_type=jnp.float32)
    out = (
        jnp.dot(a_ref[...], h1w2.astype(bf), preferred_element_type=jnp.float32)
        + b2_ref[...]
    )
    o_ref[...] = out.astype(o_ref.dtype)


def _fused_small(a, x, w1, b1, w2, b2):
    n = a.shape[0]
    in_p = x.shape[1]
    hid = w1.shape[1]
    out = w2.shape[1]
    return pl.pallas_call(
        _fused_small_kernel,
        out_shape=jax.ShapeDtypeStruct((n, out), jnp.float32),
        grid=(1,),
        in_specs=[
            pl.BlockSpec((n, n), lambda i: (0, 0)),      # A, bf16, VMEM resident
            pl.BlockSpec((n, in_p), lambda i: (0, 0)),   # X, bf16
            pl.BlockSpec((in_p, hid), lambda i: (0, 0)), # W1, bf16
            pl.BlockSpec((1, hid), lambda i: (0, 0)),    # b1, f32
            pl.BlockSpec((hid, out), lambda i: (0, 0)),  # W2' = W2 @ Wp, bf16
            pl.BlockSpec((1, out), lambda i: (0, 0)),    # b'  = b2 @ Wp + bp, f32
        ],
        out_specs=pl.BlockSpec((n, out), lambda i: (0, 0)),
        compiler_params=pltpu.CompilerParams(
            dimension_semantics=("arbitrary",),
            vmem_limit_bytes=_FAST_VMEM_LIMIT,
        ),
    )(a, x, w1, b1, w2, b2)


# --------------------- tiled path kernels (large N) ---------------------
def _xw_kernel(x_ref, w_ref, o_ref):
    o_ref[...] = jnp.dot(
        x_ref[...], w_ref[...], preferred_element_type=jnp.float32
    ).astype(o_ref.dtype)


def _feature_matmul(x, w, *, tm):
    """bf16 (N, K) @ (K, F) -> bf16 (N, F), f32 MXU accumulation."""
    n, kdim = x.shape
    f = w.shape[1]
    return pl.pallas_call(
        _xw_kernel,
        out_shape=jax.ShapeDtypeStruct((n, f), jnp.bfloat16),
        grid=(n // tm,),
        in_specs=[
            pl.BlockSpec((tm, kdim), lambda i: (i, 0)),
            pl.BlockSpec((kdim, f), lambda i: (0, 0)),
        ],
        out_specs=pl.BlockSpec((tm, f), lambda i: (i, 0)),
        compiler_params=pltpu.CompilerParams(dimension_semantics=("parallel",)),
    )(x, w)


def _layer1_agg_kernel(a_ref, xw_ref, b1_ref, w2_ref, o_ref, acc_ref, *, tk, xw_resident):
    """acc = A @ XW1 (bf16 MXU, f32 acc); finalize: write (relu(acc + b1) @ W2') as bf16."""
    k = pl.program_id(1)

    @pl.when(k == 0)
    def _():
        acc_ref[...] = jnp.zeros_like(acc_ref)

    if xw_resident:
        xw = xw_ref[pl.ds(pl.multiple_of(k * tk, tk), tk), :]
    else:
        xw = xw_ref[...]
    acc_ref[...] += jnp.dot(a_ref[...], xw, preferred_element_type=jnp.float32)

    @pl.when(k == pl.num_programs(1) - 1)
    def _():
        h1 = jnp.maximum(acc_ref[...] + b1_ref[...], 0.0)
        # fused second feature matmul: H1 @ W2' (tiny MXU work hidden in finalize)
        o_ref[...] = jnp.dot(
            h1.astype(jnp.bfloat16), w2_ref[...], preferred_element_type=jnp.float32
        ).astype(o_ref.dtype)


def _layer2_agg_kernel(a_ref, xw_ref, b_ref, o_ref, acc_ref, *, tk, xw_resident):
    """acc = A @ H1W2 (bf16 MXU, f32 acc); finalize: write acc + b' as f32."""
    k = pl.program_id(1)

    @pl.when(k == 0)
    def _():
        acc_ref[...] = jnp.zeros_like(acc_ref)

    if xw_resident:
        xw = xw_ref[pl.ds(pl.multiple_of(k * tk, tk), tk), :]
    else:
        xw = xw_ref[...]
    acc_ref[...] += jnp.dot(a_ref[...], xw, preferred_element_type=jnp.float32)

    @pl.when(k == pl.num_programs(1) - 1)
    def _():
        o_ref[...] = (acc_ref[...] + b_ref[...]).astype(o_ref.dtype)


def _xw_spec(n, f, tk, xw_resident):
    if xw_resident:
        # constant block index -> fetched once, VMEM resident across the whole grid
        return pl.BlockSpec((n, f), lambda i, k: (0, 0))
    return pl.BlockSpec((tk, f), lambda i, k: (k, 0))


def _aggregate_layer1(a, xw, b1, w2, *, tm, tk):
    n = a.shape[0]
    hid = xw.shape[1]
    out = w2.shape[1]
    xw_resident = n * hid * xw.dtype.itemsize <= _RESIDENT_XW_MAX_BYTES
    kernel = functools.partial(_layer1_agg_kernel, tk=tk, xw_resident=xw_resident)
    return pl.pallas_call(
        kernel,
        out_shape=jax.ShapeDtypeStruct((n, out), jnp.bfloat16),
        grid=(n // tm, n // tk),                              # reduction axis last
        in_specs=[
            pl.BlockSpec((tm, tk), lambda i, k: (i, k)),      # A tiles, bf16 stream
            _xw_spec(n, hid, tk, xw_resident),                # XW1, bf16 (resident if fits)
            pl.BlockSpec((1, hid), lambda i, k: (0, 0)),      # b1, f32 resident
            pl.BlockSpec((hid, out), lambda i, k: (0, 0)),    # W2', bf16 resident
        ],
        out_specs=pl.BlockSpec((tm, out), lambda i, k: (i, 0)),
        scratch_shapes=[pltpu.VMEM((tm, hid), jnp.float32)],
        compiler_params=pltpu.CompilerParams(
            dimension_semantics=("parallel", "arbitrary"),
            vmem_limit_bytes=_TILED_VMEM_LIMIT,
        ),
    )(a, xw, b1, w2)


def _aggregate_layer2(a, xw, b, *, tm, tk):
    n = a.shape[0]
    f = xw.shape[1]
    xw_resident = n * f * xw.dtype.itemsize <= _RESIDENT_XW_MAX_BYTES
    kernel = functools.partial(_layer2_agg_kernel, tk=tk, xw_resident=xw_resident)
    return pl.pallas_call(
        kernel,
        out_shape=jax.ShapeDtypeStruct((n, f), jnp.float32),
        grid=(n // tm, n // tk),
        in_specs=[
            pl.BlockSpec((tm, tk), lambda i, k: (i, k)),      # A tiles, bf16 stream
            _xw_spec(n, f, tk, xw_resident),                  # H1W2, bf16
            pl.BlockSpec((1, f), lambda i, k: (0, 0)),        # b', f32 resident
        ],
        out_specs=pl.BlockSpec((tm, f), lambda i, k: (i, 0)),
        scratch_shapes=[pltpu.VMEM((tm, f), jnp.float32)],
        compiler_params=pltpu.CompilerParams(
            dimension_semantics=("parallel", "arbitrary"),
            vmem_limit_bytes=_TILED_VMEM_LIMIT,
        ),
    )(a, xw, b, )


def _choose_tiles(n):
    # Larger aggregation tiles (review: 256-wide ~63% of HBM roofline, 512-wide ~85%),
    # while keeping n_p // tm >= 4 so the "parallel" row axis shards across 2 TCs on v7x.
    if n >= 4096:
        return 512, 2048
    if n >= 2048:
        return 512, 1024
    return 256, 512


# ------------------------------ GCL forward wrapper ------------------------------
def gcl_forward(a_norm, x, w1, b1, w2, b2, wp, bp, *, force_tiled=False):
    n, in_dim = x.shape
    hid_dim = w1.shape[1]
    out_dim = wp.shape[1]

    # Fold the projection head into conv2 (f32 reassociation):
    #   out = (A @ (H1 @ W2) + b2) @ Wp + bp = A @ (H1 @ (W2 @ Wp)) + (b2 @ Wp + bp)
    w2p = jnp.dot(w2, wp)
    b2p = jnp.dot(b2.reshape(1, -1), wp) + bp.reshape(1, -1)

    LANE = 128
    in_p = _round_up(in_dim, LANE)
    hid_p = _round_up(hid_dim, LANE)
    out_p = _round_up(out_dim, LANE)
    bf = jnp.bfloat16

    def pad2(m, rows, cols, dtype):
        m = m.astype(dtype)
        # zero-padding invariant: padded rows/cols of A must stay zero so padded-row
        # garbage in the intermediates never contaminates real rows.
        return jnp.pad(m, ((0, rows - m.shape[0]), (0, cols - m.shape[1])))

    if (not force_tiled) and n <= _FAST_PATH_MAX_NODES:
        # ---- fast path: everything VMEM resident, one fused pallas_call ----
        n_p = _round_up(n, 128)
        a_p = pad2(a_norm, n_p, n_p, bf)
        x_p = pad2(x, n_p, in_p, bf)
        w1_p = pad2(w1, in_p, hid_p, bf)
        b1_p = pad2(b1.reshape(1, -1), 1, hid_p, jnp.float32)
        w2p_p = pad2(w2p, hid_p, out_p, bf)
        b2p_p = pad2(b2p, 1, out_p, jnp.float32)
        out_full = _fused_small(a_p, x_p, w1_p, b1_p, w2p_p, b2p_p)
    else:
        # ---- tiled path: stream A, resident XW when it fits ----
        tm, tk = _choose_tiles(n)
        n_p = _round_up(n, max(tm, tk))
        a_p = pad2(a_norm, n_p, n_p, bf)
        x_p = pad2(x, n_p, in_p, bf)
        w1_p = pad2(w1, in_p, hid_p, bf)
        b1_p = pad2(b1.reshape(1, -1), 1, hid_p, jnp.float32)
        w2p_p = pad2(w2p, hid_p, out_p, bf)
        b2p_p = pad2(b2p, 1, out_p, jnp.float32)

        tmx = min(512, n_p)
        # layer 1 feature transform, then aggregation with fused (H1 @ W2') finalize
        xw1 = _feature_matmul(x_p, w1_p, tm=tmx)                       # bf16 (n_p, hid_p)
        h1w2 = _aggregate_layer1(a_p, xw1, b1_p, w2p_p, tm=tm, tk=tk)  # bf16 (n_p, out_p)
        # dropout(p=0.5) on h1 is identity in eval mode.
        # layer 2 (+ folded projection head already inside W2'/b')
        out_full = _aggregate_layer2(a_p, h1w2, b2p_p, tm=tm, tk=tk)   # f32 (n_p, out_p)

    return out_full[:n, :out_dim]


# ------------------------------ graph preprocessing ------------------------------
def build_gcn_norm_adjacency(edge_index, edge_weight, num_nodes):
    """Dense D^-1/2 (A + I) D^-1/2 matching torch_geometric gcn_norm defaults.

    Mirrors add_remaining_self_loops: self loops (weight 1.0) are only added to
    nodes that do not already have one.
    """
    src = edge_index[0]
    tgt = edge_index[1]
    if edge_weight is None:
        edge_weight = jnp.ones(src.shape[0], dtype=jnp.float32)
    # A_hat[target, source] = weight  (messages flow source -> target)
    a = jnp.zeros((num_nodes, num_nodes), dtype=jnp.float32)
    a = a.at[tgt, src].add(edge_weight)
    has_self = (
        jnp.zeros((num_nodes,), jnp.float32)
        .at[src]
        .max((src == tgt).astype(jnp.float32))
        > 0
    )
    a = a + jnp.diag(jnp.where(has_self, 0.0, 1.0))
    deg = a.sum(axis=1)  # degree at target nodes (incl. self loop)
    d_inv_sqrt = jnp.where(deg > 0, 1.0 / jnp.sqrt(deg), 0.0)
    return d_inv_sqrt[:, None] * a * d_inv_sqrt[None, :]


def init_params(key, in_dim, hid_dim, out_dim):
    """Deterministic synthetic parameter init (Glorot-style scaling)."""
    k1, k2, k3 = jax.random.split(key, 3)
    glorot = lambda k, fi, fo: jax.random.normal(k, (fi, fo), jnp.float32) * jnp.sqrt(
        2.0 / (fi + fo)
    )
    w1 = glorot(k1, in_dim, hid_dim)
    b1 = jnp.zeros((1, hid_dim), jnp.float32)
    w2 = glorot(k2, hid_dim, out_dim)
    b2 = jnp.zeros((1, out_dim), jnp.float32)
    wp = glorot(k3, out_dim, out_dim)
    bp = jnp.zeros((1, out_dim), jnp.float32)
    return w1, b1, w2, b2, wp, bp


# ------------------------------ references ------------------------------
def reference_forward(a_norm, x, w1, b1, w2, b2, wp, bp):
    """Pure-f32 reference (original module semantics)."""
    h1 = jnp.maximum(a_norm @ (x @ w1) + b1, 0.0)
    h2 = a_norm @ (h1 @ w2) + b2
    return h2 @ wp + bp


def reference_forward_bf16_matched(a_norm, x, w1, b1, w2, b2, wp, bp):
    """Reference matching the kernel's numerics: bf16 MXU operands, f32 accumulation."""
    bf = jnp.bfloat16
    w2p = jnp.dot(w2, wp)
    b2p = jnp.dot(b2.reshape(1, -1), wp) + bp.reshape(1, -1)
    xw1 = jnp.dot(x.astype(bf), w1.astype(bf), preferred_element_type=jnp.float32)
    h1 = jnp.maximum(
        jnp.dot(a_norm.astype(bf), xw1.astype(bf), preferred_element_type=jnp.float32)
        + b1.reshape(1, -1),
        0.0,
    )
    h1w2 = jnp.dot(h1.astype(bf), w2p.astype(bf), preferred_element_type=jnp.float32)
    return (
        jnp.dot(a_norm.astype(bf), h1w2.astype(bf), preferred_element_type=jnp.float32)
        + b2p
    )


if __name__ == "__main__":
    key = jax.random.PRNGKey(0)
    k_x, k_p, k_e = jax.random.split(key, 3)

    # small graph, big enough that the tiled grid (row tiles x reduction tiles) and the
    # padded lane-dense layout are actually exercised when the tiled path is forced.
    num_nodes, in_dim, hid_dim, out_dim = 600, 16, 32, 8

    # node features
    x = jax.random.normal(k_x, (num_nodes, in_dim), jnp.float32)

    # deterministic undirected ring graph (both directions)
    src = jnp.arange(num_nodes, dtype=jnp.int32)
    dst = (src + 1) % num_nodes
    edge_index = jnp.stack(
        [jnp.concatenate([src, dst]), jnp.concatenate([dst, src])], axis=0
    )
    edge_weight = (
        jnp.abs(jax.random.normal(k_e, (edge_index.shape[1],), jnp.float32)) + 0.5
    )
    # NOTE: edge_weight dropout in GCL.forward is identity in eval mode.

    a_norm = build_gcn_norm_adjacency(edge_index, edge_weight, num_nodes)
    w1, b1, w2, b2, wp, bp = init_params(k_p, in_dim, hid_dim, out_dim)

    ref_f32 = reference_forward(a_norm, x, w1, b1, w2, b2, wp, bp)
    ref_bf16 = reference_forward_bf16_matched(a_norm, x, w1, b1, w2, b2, wp, bp)

    # exercise BOTH code paths: the resident-A fused fast path and the tiled path.
    for force_tiled in (False, True):
        out = gcl_forward(a_norm, x, w1, b1, w2, b2, wp, bp, force_tiled=force_tiled)
        out = jax.block_until_ready(out)
        assert out.shape == (num_nodes, out_dim)
        # tight functional check against the numerics-matched bf16 reference
        assert jnp.allclose(out, ref_bf16, atol=1e-2, rtol=1e-2), (
            force_tiled,
            float(jnp.max(jnp.abs(out - ref_bf16))),
        )
        # loose fidelity check against the pure-f32 module semantics (bf16 MXU operands
        # necessarily drift slightly from the f32 reference).
        assert jnp.allclose(out, ref_f32, atol=1e-1, rtol=1e-1), (
            force_tiled,
            float(jnp.max(jnp.abs(out - ref_f32))),
        )

    print("KERNEL_OK")
</pallas_src>

<mosaic_0001>
module attributes {stable_mosaic.version = 11 : i64} {
  func.func @_fused_small_kernel(%arg0: i32, %arg1: memref<640x640xbf16, #tpu.memory_space<vmem>>, %arg2: memref<640x128xbf16, #tpu.memory_space<vmem>>, %arg3: memref<128x128xbf16, #tpu.memory_space<vmem>>, %arg4: memref<1x128xf32, #tpu.memory_space<vmem>>, %arg5: memref<128x128xbf16, #tpu.memory_space<vmem>>, %arg6: memref<1x128xf32, #tpu.memory_space<vmem>>, %arg7: memref<640x128xf32, #tpu.memory_space<vmem>>) attributes {dimension_semantics = [#tpu.dimension_semantics<arbitrary>], iteration_bounds = array<i64: 1>, scalar_prefetch = 0 : i64, scratch_operands = 0 : i64, tpu.core_type = #tpu.core_type<tc>, window_params = [{pipeline_mode = #tpu.pipeline_mode<synchronous>, transform_indices = @transform_0, window_bounds = array<i64: 640, 640>}, {pipeline_mode = #tpu.pipeline_mode<synchronous>, transform_indices = @transform_1, window_bounds = array<i64: 640, 128>}, {pipeline_mode = #tpu.pipeline_mode<synchronous>, transform_indices = @transform_2, window_bounds = array<i64: 128, 128>}, {pipeline_mode = #tpu.pipeline_mode<synchronous>, transform_indices = @transform_3, window_bounds = array<i64: 1, 128>}, {pipeline_mode = #tpu.pipeline_mode<synchronous>, transform_indices = @transform_4, window_bounds = array<i64: 128, 128>}, {pipeline_mode = #tpu.pipeline_mode<synchronous>, transform_indices = @transform_5, window_bounds = array<i64: 1, 128>}, {pipeline_mode = #tpu.pipeline_mode<synchronous>, transform_indices = @transform_6, window_bounds = array<i64: 640, 128>}]} {
    %c0 = arith.constant 0 : index
    %c0_0 = arith.constant 0 : index
    %0 = vector.load %arg2[%c0, %c0_0] : memref<640x128xbf16, #tpu.memory_space<vmem>>, vector<640x128xbf16>
    %c0_1 = arith.constant 0 : index
    %c0_2 = arith.constant 0 : index
    %1 = vector.load %arg3[%c0_1, %c0_2] : memref<128x128xbf16, #tpu.memory_space<vmem>>, vector<128x128xbf16>
    %cst = arith.constant dense<0.000000e+00> : vector<640x128xf32>
    %2 = tpu.matmul %0, %1, %cst {dimension_numbers = #tpu.dot_dimension_numbers<[1], [0], [0], [1], [0, 0, 1, 1], [], []>} : vector<640x128xbf16>, vector<128x128xbf16>, vector<640x128xf32> -> vector<640x128xf32>
    %c0_3 = arith.constant 0 : index
    %c0_4 = arith.constant 0 : index
    %3 = vector.load %arg1[%c0_3, %c0_4] : memref<640x640xbf16, #tpu.memory_space<vmem>>, vector<640x640xbf16>
    %4 = arith.truncf %2 : vector<640x128xf32> to vector<640x128xbf16>
    %cst_5 = arith.constant dense<0.000000e+00> : vector<640x128xf32>
    %5 = tpu.matmul %3, %4, %cst_5 {dimension_numbers = #tpu.dot_dimension_numbers<[1], [0], [0], [1], [0, 0, 1, 1], [], []>} : vector<640x640xbf16>, vector<640x128xbf16>, vector<640x128xf32> -> vector<640x128xf32>
    %c0_6 = arith.constant 0 : index
    %c0_7 = arith.constant 0 : index
    %6 = vector.load %arg4[%c0_6, %c0_7] : memref<1x128xf32, #tpu.memory_space<vmem>>, vector<1x128xf32>
    %7 = vector.broadcast %6 : vector<1x128xf32> to vector<640x128xf32>
    %8 = arith.addf %5, %7 : vector<640x128xf32>
    %cst_8 = arith.constant 0.000000e+00 : f32
    %9 = vector.broadcast %cst_8 : f32 to vector<640x128xf32>
    %10 = arith.maximumf %8, %9 : vector<640x128xf32>
    %11 = arith.truncf %10 : vector<640x128xf32> to vector<640x128xbf16>
    %c0_9 = arith.constant 0 : index
    %c0_10 = arith.constant 0 : index
    %12 = vector.load %arg5[%c0_9, %c0_10] : memref<128x128xbf16, #tpu.memory_space<vmem>>, vector<128x128xbf16>
    %cst_11 = arith.constant dense<0.000000e+00> : vector<640x128xf32>
    %13 = tpu.matmul %11, %12, %cst_11 {dimension_numbers = #tpu.dot_dimension_numbers<[1], [0], [0], [1], [0, 0, 1, 1], [], []>} : vector<640x128xbf16>, vector<128x128xbf16>, vector<640x128xf32> -> vector<640x128xf32>
    %c0_12 = arith.constant 0 : index
    %c0_13 = arith.constant 0 : index
    %14 = vector.load %arg1[%c0_12, %c0_13] : memref<640x640xbf16, #tpu.memory_space<vmem>>, vector<640x640xbf16>
    %15 = arith.truncf %13 : vector<640x128xf32> to vector<640x128xbf16>
    %cst_14 = arith.constant dense<0.000000e+00> : vector<640x128xf32>
    %16 = tpu.matmul %14, %15, %cst_14 {dimension_numbers = #tpu.dot_dimension_numbers<[1], [0], [0], [1], [0, 0, 1, 1], [], []>} : vector<640x640xbf16>, vector<640x128xbf16>, vector<640x128xf32> -> vector<640x128xf32>
    %c0_15 = arith.constant 0 : index
    %c0_16 = arith.constant 0 : index
    %17 = vector.load %arg6[%c0_15, %c0_16] : memref<1x128xf32, #tpu.memory_space<vmem>>, vector<1x128xf32>
    %18 = vector.broadcast %17 : vector<1x128xf32> to vector<640x128xf32>
    %19 = arith.addf %16, %18 : vector<640x128xf32>
    %c0_17 = arith.constant 0 : index
    %c0_18 = arith.constant 0 : index
    %20 = vector.load %arg7[%c0_17, %c0_18] : memref<640x128xf32, #tpu.memory_space<vmem>>, vector<640x128xf32>
    tpu.vector_store %arg7[%c0_17, %c0_18], %19 {strides = array<i32>} : memref<640x128xf32, #tpu.memory_space<vmem>>, vector<640x128xf32>,
    return
  }
  func.func @transform_0(%arg0: i32) -> (i32, i32) {
    %c0_i32 = arith.constant 0 : i32
    %c0_i32_0 = arith.constant 0 : i32
    %c0_i32_1 = arith.constant 0 : i32
    return %c0_i32, %c0_i32_0 : i32, i32
  }
  func.func @transform_1(%arg0: i32) -> (i32, i32) {
    %c0_i32 = arith.constant 0 : i32
    %c0_i32_0 = arith.constant 0 : i32
    %c0_i32_1 = arith.constant 0 : i32
    return %c0_i32, %c0_i32_0 : i32, i32
  }
  func.func @transform_2(%arg0: i32) -> (i32, i32) {
    %c0_i32 = arith.constant 0 : i32
    %c0_i32_0 = arith.constant 0 : i32
    %c0_i32_1 = arith.constant 0 : i32
    return %c0_i32, %c0_i32_0 : i32, i32
  }
  func.func @transform_3(%arg0: i32) -> (i32, i32) {
    %c0_i32 = arith.constant 0 : i32
    %c0_i32_0 = arith.constant 0 : i32
    %c0_i32_1 = arith.constant 0 : i32
    return %c0_i32, %c0_i32_0 : i32, i32
  }
  func.func @transform_4(%arg0: i32) -> (i32, i32) {
    %c0_i32 = arith.constant 0 : i32
    %c0_i32_0 = arith.constant 0 : i32
    %c0_i32_1 = arith.constant 0 : i32
    return %c0_i32, %c0_i32_0 : i32, i32
  }
  func.func @transform_5(%arg0: i32) -> (i32, i32) {
    %c0_i32 = arith.constant 0 : i32
    %c0_i32_0 = arith.constant 0 : i32
    %c0_i32_1 = arith.constant 0 : i32
    return %c0_i32, %c0_i32_0 : i32, i32
  }
  func.func @transform_6(%arg0: i32) -> (i32, i32) {
    %c0_i32 = arith.constant 0 : i32
    %c0_i32_0 = arith.constant 0 : i32
    %c0_i32_1 = arith.constant 0 : i32
    return %c0_i32, %c0_i32_0 : i32, i32
  }
}

</mosaic_0001>

<bundles_post_ra>
// kernel: tpu_custom_call.1
= control target key start
LH: loop header
LB: loop body
LE: loop exit
PB: predicated region body
PF: predicated region fallthrough
CT: control target
= control target key end

     0   :  { %11 = vsyncpa [#allocation3], 0  ;;  %s7860_s0 = inlined_call_operand.hbm [shape: bf16[640,640], index: 0, kind: input, shape index: {}]   ;;  %s7861_s1 = inlined_call_operand.hbm [shape: bf16[640,128], index: 1, kind: input, shape index: {}]   ;;  %s7862_s2 = inlined_call_operand.hbm [shape: bf16[128,128], index: 2, kind: input, shape index: {}]   ;;  %s7863_s3 = inlined_call_operand.vmem [shape: f32[1,128], index: 3, kind: input, shape index: {}]   ;;  %s7864_s4 = inlined_call_operand.hbm [shape: bf16[128,128], index: 4, kind: input, shape index: {}]   ;;  %s7865_s5 = inlined_call_operand.vmem [shape: f32[1,128], index: 5, kind: input, shape index: {}]   ;;  %s7866_s6 = inlined_call_operand.hbm [shape: f32[640,128], index: 6, kind: output, shape index: {}]  }
   0x1   :  { %12 = vsyncpa [#allocation6], 0 }
   0x2   :  { %13 = vsyncpa [#allocation9], 0 }
   0x3   :  { %14 = vsyncpa [#allocation4], 0  ;;  %s6453_s21 = smov [#allocation5]  }
   0x4   :  { %s32_s22 = sshll.u32 %s6453_s21, 4  ;;  %s33_s22 = int_to_ptr.vmem [resolvable:$true] %s32_s22 }
   0x5   :  { %s6353_s23 = scalar_lea.vmem %s33_s22, 5120  ;;  %p6358_p1 = scmp.lt.s32.totalorder %s33_s22, %s33_s22 }
   0x6   :  { %p6354_p0 = scmp.ne.s32.totalorder %s33_s22, %s6353_s23  ;;  %p6359_p2 = scmp.lt.s32.totalorder %s6353_s23, %s6353_s23 }
   0x8   :  { %p6360_p3 = por %p6359_p2, %p6358_p1 }
   0xa   :  { %p6361_p4 = pnand %p6360_p3, %p6354_p0 }
   0xc   :  { %6364 = shalt.err (!%p6361_p4)
}
   0xd   :  { %s6454_s24 = smov 64   ;;  %s6455_s25 = smov 4  }
   0xe   :  { %38 = dma.hbm_to_vmem [thread:$0]  %s7861_s1, 5120, %s33_s22, [#allocation6], %s6454_s24, %s6454_s24, %s6455_s25  }
   0xf   :  { %s6456_s28 = smov [#allocation2]  }
  0x10   :  { %s20_s29 = sshll.u32 %s6456_s28, 4  ;;  %s21_s29 = int_to_ptr.vmem [resolvable:$true] %s20_s29 }
  0x11   :  { %s6373_s30 = scalar_lea.vmem %s21_s29, 25600  ;;  %p6378_p6 = scmp.lt.s32.totalorder %s21_s29, %s21_s29 }
  0x12   :  { %p6374_p5 = scmp.ne.s32.totalorder %s21_s29, %s6373_s30  ;;  %p6379_p7 = scmp.lt.s32.totalorder %s6373_s30, %s6373_s30 }
  0x14   :  { %p6380_p8 = por %p6379_p7, %p6378_p6 }
  0x16   :  { %p6381_p9 = pnand %p6380_p8, %p6374_p5 }
  0x18   :  { %6384 = shalt.err (!%p6381_p9)
}
  0x19   :  { %s6457_s7 = smov 320   ;;  %s6458_s8 = smov 20  }
  0x1a   :  { %26 = dma.hbm_to_vmem [thread:$0]  %s7860_s0, 25600, %s21_s29, [#allocation3], %s6457_s7, %s6457_s7, %s6458_s8  }
  0x1b   :  { %s6459_s11 = smov [#allocation7]   ;;  %s6460_s13 = smov [#allocation8]  }
  0x1c   :  { %s44_s12 = sshll.u32 %s6459_s11, 4  ;;  %s58_s1 = sshll.u32 %s6460_s13, 4  ;;  %s45_s12 = int_to_ptr.vmem [resolvable:$true] %s44_s12  ;;  %s59_s1 = int_to_ptr.vmem [resolvable:$true] %s58_s1 }
  0x1d   :  { %s6393_s14 = scalar_lea.vmem %s45_s12, 1024  ;;  %p6398_p11 = scmp.lt.s32.totalorder %s45_s12, %s45_s12 }
  0x1e   :  { %p6394_p10 = scmp.ne.s32.totalorder %s45_s12, %s6393_s14  ;;  %p6399_p12 = scmp.lt.s32.totalorder %s6393_s14, %s6393_s14 }
  0x20   :  { %p6400_p13 = por %p6399_p12, %p6398_p11 }
  0x22   :  { %p6401_p0 = pnand %p6400_p13, %p6394_p10 }
  0x24   :  { %6404 = shalt.err (!%p6401_p0)
}
  0x25   :  { %50 = dma.hbm_to_vmem [thread:$0]  %s7862_s2, 1024, %s45_s12, [#allocation6], %s6454_s24, %s6454_s24, %s6455_s25  }
  0x26   :  { %s6413_s0 = scalar_lea.vmem %s59_s1, 1024  ;;  %p6418_p2 = scmp.lt.s32.totalorder %s59_s1, %s59_s1 }
  0x27   :  { %p6414_p1 = scmp.ne.s32.totalorder %s59_s1, %s6413_s0  ;;  %p6419_p3 = scmp.lt.s32.totalorder %s6413_s0, %s6413_s0 }
  0x29   :  { %p6420_p4 = por %p6419_p3, %p6418_p2 }
  0x2b   :  { %p6421_p5 = pnand %p6420_p4, %p6414_p1 }
  0x2d   :  { %6424 = shalt.err (!%p6421_p5)
}
  0x2e   :  { %64 = dma.hbm_to_vmem [thread:$0]  %s7864_s4, 1024, %s59_s1, [#allocation9], %s6454_s24, %s6454_s24, %s6455_s25  }
  0x2f   :  { %6445 = dma.done.wait [#allocation3], 25600  }
  0x30   :  { %6446 = vsyncadd [#allocation3], 4294941696 }
  0x31   :  { %6447 = dma.done.wait [#allocation6], 6144  }
  0x32   :  { %6448 = vsyncadd [#allocation6], 4294961152 }
  0x33   :  { %6449 = dma.done.wait [#allocation9], 1024  }
  0x34   :  { %6450 = vsyncadd [#allocation9], 4294966272  ;;  %v5807_v0 = vld [vmem:[#allocation7 + $0x38] sm:$0xff]   ;;  %v5808_v1 = vld [vmem:[#allocation7 + $0x30] sm:$0xff]   ;;  %v7867_v35 = vmov 0  }
  0x35   :  { %5395 = vmatprep.subr.bf16.mxu0 %v5807_v0  ;;  %v5809_v2 = vld [vmem:[#allocation7 + $0x28] sm:$0xff]   ;;  %v5810_v3 = vld [vmem:[#allocation7 + $0x20] sm:$0xff]   ;;  %v5811_v5 = vld [vmem:[#allocation7 + $0x18] sm:$0xff]   ;;  %2144 = vmatprep.subr.bf16.mxu1 %v7867_v35 }
  0x36   :  { %5396 = vmatpush3.bf16.msra.mxu0 %v5807_v0  ;;  %v5815_v4 = vld [vmem:[#allocation5] sm:$0xff]   ;;  %v5812_v6 = vld [vmem:[#allocation7 + $0x10] sm:$0xff]   ;;  %v5813_v7 = vld [vmem:[#allocation7 + $0x8] sm:$0xff]  }
  0x37   :  { %5397 = vmatprep.subr.bf16.mxu0 %v5808_v1  ;;  %5411 = vmatprep.mubr.bf16.mxu0 %v5815_v4  ;;  %v5814_v8 = vld [vmem:[#allocation7] sm:$0xff]   ;;  %v5816_v9 = vld [vmem:[#allocation5 + $0x8] sm:$0xff]   ;;  %v5817_v10 = vld [vmem:[#allocation5 + $0x10] sm:$0xff]  }
  0x38   :  { %v5818_v11 = vld [vmem:[#allocation5 + $0x18] sm:$0xff]   ;;  %v5819_v12 = vld [vmem:[#allocation5 + $0x20] sm:$0xff]   ;;  %v5820_v13 = vld [vmem:[#allocation5 + $0x28] sm:$0xff]  }
  0x39   :  { %v5821_v14 = vld [vmem:[#allocation5 + $0x30] sm:$0xff]   ;;  %v5822_v15 = vld [vmem:[#allocation5 + $0x38] sm:$0xff]   ;;  %v5823_v16 = vld [vmem:[#allocation5 + $0x40] sm:$0xff]  }
  0x3a   :  { %5398 = vmatpush3.bf16.msra.mxu0 %v5808_v1  ;;  %v5824_v17 = vld [vmem:[#allocation5 + $0x48] sm:$0xff]   ;;  %v5825_v18 = vld [vmem:[#allocation5 + $0x50] sm:$0xff]   ;;  %v5826_v19 = vld [vmem:[#allocation5 + $0x58] sm:$0xff]  }
  0x3b   :  { %5399 = vmatprep.subr.bf16.mxu0 %v5809_v2  ;;  %v5827_v20 = vld [vmem:[#allocation5 + $0x60] sm:$0xff]   ;;  %v5828_v21 = vld [vmem:[#allocation5 + $0x68] sm:$0xff]   ;;  %v5829_v22 = vld [vmem:[#allocation5 + $0x70] sm:$0xff]  }
  0x3c   :  { %v5830_v23 = vld [vmem:[#allocation5 + $0x78] sm:$0xff]   ;;  %v5831_v24 = vld [vmem:[#allocation5 + $0x80] sm:$0xff]   ;;  %v5832_v25 = vld [vmem:[#allocation5 + $0x88] sm:$0xff]  }
  0x3d   :  { %v5833_v26 = vld [vmem:[#allocation5 + $0x90] sm:$0xff]   ;;  %v5834_v27 = vld [vmem:[#allocation5 + $0x98] sm:$0xff]   ;;  %v5835_v28 = vld [vmem:[#allocation5 + $0xa0] sm:$0xff]  }
  0x3e   :  { %5400 = vmatpush3.bf16.msra.mxu0 %v5809_v2  ;;  %v5836_v29 = vld [vmem:[#allocation5 + $0xa8] sm:$0xff]   ;;  %v5837_v30 = vld [vmem:[#allocation5 + $0xb0] sm:$0xff]   ;;  %v5838_v31 = vld [vmem:[#allocation5 + $0xb8] sm:$0xff]  }
  0x3f   :  { %5401 = vmatprep.subr.bf16.mxu0 %v5810_v3  ;;  %v5839_v32 = vld [vmem:[#allocation5 + $0xc0] sm:$0xff]   ;;  %v5840_v33 = vld [vmem:[#allocation5 + $0xc8] sm:$0xff]   ;;  %v5841_v34 = vld [vmem:[#allocation5 + $0xd0] sm:$0xff]  }
  0x40   :  { %v5842_v36 = vld [vmem:[#allocation5 + $0xd8] sm:$0xff]   ;;  %v5843_v37 = vld [vmem:[#allocation5 + $0xe0] sm:$0xff]   ;;  %v5844_v38 = vld [vmem:[#allocation5 + $0xe8] sm:$0xff]  }
  0x41   :  { %v5845_v39 = vld [vmem:[#allocation5 + $0xf0] sm:$0xff]   ;;  %v5846_v40 = vld [vmem:[#allocation5 + $0xf8] sm:$0xff]   ;;  %v5847_v41 = vld [vmem:[#allocation5 + $0x100] sm:$0xff]  }
  0x42   :  { %5402 = vmatpush3.bf16.msra.mxu0 %v5810_v3  ;;  %v5848_v42 = vld [vmem:[#allocation5 + $0x108] sm:$0xff]   ;;  %v5849_v43 = vld [vmem:[#allocation5 + $0x110] sm:$0xff]   ;;  %v5850_v44 = vld [vmem:[#allocation5 + $0x118] sm:$0xff]  }
  0x43   :  { %5403 = vmatprep.subr.bf16.mxu0 %v5811_v5  ;;  %v5851_v45 = vld [vmem:[#allocation5 + $0x120] sm:$0xff]   ;;  %v5852_v46 = vld [vmem:[#allocation5 + $0x128] sm:$0xff]   ;;  %v5853_v47 = vld [vmem:[#allocation5 + $0x130] sm:$0xff]  }
  0x44   :  { %v5854_v48 = vld [vmem:[#allocation5 + $0x138] sm:$0xff]   ;;  %v5883_v0 = vld [vmem:[#allocation2 + $0xc] ss:$20 sps:$4 sm:$0xff]  }
  0x45   :  { %v5857_v49 = vld [vmem:[#allocation2 + $0x4] ss:$20 sps:$4 sm:$0xff]  }
  0x46   :  { %5404 = vmatpush3.bf16.msra.mxu0 %v5811_v5  ;;  %2176 = vmatprep.mubr.bf16.mxu1 %v5857_v49 }
  0x47   :  { %5405 = vmatprep.subr.bf16.mxu0 %v5812_v6 }
  0x4a   :  { %5406 = vmatpush3.bf16.msra.mxu0 %v5812_v6 }
  0x4b   :  { %5407 = vmatprep.subr.bf16.mxu0 %v5813_v7 }
  0x4e   :  { %5408 = vmatpush3.bf16.msra.mxu0 %v5813_v7 }
  0x4f   :  { %5409 = vmatprep.subr.bf16.mxu0 %v5814_v8 }
  0x52   :  { %5410 = vmatpush3.bf16.msra.mxu0 %v5814_v8 }
  0x53   :  { %2497 = vmatprep.subr.bf16.mxu0 %v7867_v35 }
  0x55   :  { %5412 = vmatmul.mubr.bf16.vlgmr.msra.gmra.mxu0 %v5816_v9 }
  0x56   :  { %5415 = vmatprep.mubr.bf16.mxu0 %v5817_v10 }
  0x5d   :  { %5416 = vmatmul.mubr.bf16.gmra.mxu0 %v5818_v11 }
  0x5e   :  { %5419 = vmatprep.mubr.bf16.mxu0 %v5819_v12 }
  0x65   :  { %5420 = vmatmul.mubr.bf16.gmra.mxu0 %v5820_v13 }
  0x66   :  { %5423 = vmatprep.mubr.bf16.mxu0 %v5821_v14 }
  0x6d   :  { %5424 = vmatmul.mubr.bf16.gmra.mxu0 %v5822_v15 }
  0x6e   :  { %5427 = vmatprep.mubr.bf16.mxu0 %v5823_v16 }
  0x75   :  { %5428 = vmatmul.mubr.bf16.gmra.mxu0 %v5824_v17 }
  0x76   :  { %5431 = vmatprep.mubr.bf16.mxu0 %v5825_v18 }
  0x7d   :  { %5432 = vmatmul.mubr.bf16.gmra.mxu0 %v5826_v19 }
  0x7e   :  { %5435 = vmatprep.mubr.bf16.mxu0 %v5827_v20 }
  0x85   :  { %5436 = vmatmul.mubr.bf16.gmra.mxu0 %v5828_v21 }
  0x86   :  { %5439 = vmatprep.mubr.bf16.mxu0 %v5829_v22 }
  0x8d   :  { %5440 = vmatmul.mubr.bf16.gmra.mxu0 %v5830_v23 }
  0x8e   :  { %5443 = vmatprep.mubr.bf16.mxu0 %v5831_v24 }
  0x95   :  { %5444 = vmatmul.mubr.bf16.gmra.mxu0 %v5832_v25 }
  0x96   :  { %5447 = vmatprep.mubr.bf16.mxu0 %v5833_v26 }
  0x9d   :  { %5448 = vmatmul.mubr.bf16.gmra.mxu0 %v5834_v27 }
  0x9e   :  { %5451 = vmatprep.mubr.bf16.mxu0 %v5835_v28 }
  0xa5   :  { %5452 = vmatmul.mubr.bf16.gmra.mxu0 %v5836_v29 }
  0xa6   :  { %5455 = vmatprep.mubr.bf16.mxu0 %v5837_v30 }
  0xad   :  { %5456 = vmatmul.mubr.bf16.gmra.mxu0 %v5838_v31 }
  0xae   :  { %5459 = vmatprep.mubr.bf16.mxu0 %v5839_v32 }
  0xb5   :  { %5460 = vmatmul.mubr.bf16.gmra.mxu0 %v5840_v33 }
  0xb6   :  { %5463 = vmatprep.mubr.bf16.mxu0 %v5841_v34 }
  0xbd   :  { %5464 = vmatmul.mubr.bf16.gmra.mxu0 %v5842_v36 }
  0xbe   :  { %5467 = vmatprep.mubr.bf16.mxu0 %v5843_v37 }
  0xc5   :  { %5468 = vmatmul.mubr.bf16.gmra.mxu0 %v5844_v38 }
  0xc6   :  { %5471 = vmatprep.mubr.bf16.mxu0 %v5845_v39 }
  0xcd   :  { %5472 = vmatmul.mubr.bf16.gmra.mxu0 %v5846_v40 }
  0xce   :  { %5475 = vmatprep.mubr.bf16.mxu0 %v5847_v41 }
  0xd5   :  { %5476 = vmatmul.mubr.bf16.gmra.mxu0 %v5848_v42 }
  0xd6   :  { %5479 = vmatprep.mubr.bf16.mxu0 %v5849_v43 }
  0xdd   :  { %5480 = vmatmul.mubr.bf16.gmra.mxu0 %v5850_v44 }
  0xde   :  { %5483 = vmatprep.mubr.bf16.mxu0 %v5851_v45 }
  0xe5   :  { %5484 = vmatmul.mubr.bf16.gmra.mxu0 %v5852_v46 }
  0xe6   :  { %5487 = vmatprep.mubr.bf16.mxu0 %v5853_v47 }
  0xed   :  { %5488 = vmatmul.mubr.bf16.gmra.mxu0 %v5854_v48 }
  0xee   :  { %2529 = vmatprep.mubr.bf16.mxu0 %v5883_v0 }
 0x115   :  { %v5413_v50 = vpop.f32.mrf.mxu0 }
 0x117   :  { %v498_v51 = vpop.f32.mrf.mxu0 }
 0x119   :  { %v5414_v52 = vpop.f32.mrf.mxu0 }
 0x11a   :  { %v1058_v20 = vpack.c.bf16 %v5414_v52, %v5413_v50  ;;  %v5855_v50 = vld [vmem:[#allocation2] ss:$20 sps:$4 sm:$0xff]  }
 0x11b   :  { %v501_v53 = vpop.f32.mrf.mxu0 }
 0x11c   :  { %v1057_v23 = vpack.c.bf16 %v501_v53, %v498_v51  ;;  %v5858_v51 = vld [vmem:[#allocation2 + $0x2c] ss:$20 sps:$4 sm:$0xff]  }
 0x11d   :  { %v5417_v54 = vpop.f32.mrf.mxu0 }
 0x11f   :  { %v514_v55 = vpop.f32.mrf.mxu0 }
 0x121   :  { %v5418_v56 = vpop.f32.mrf.mxu0 }
 0x122   :  { %v1060_v14 = vpack.c.bf16 %v5418_v56, %v5417_v54 }
 0x123   :  { %v517_v57 = vpop.f32.mrf.mxu0 }
 0x124   :  { %v1059_v17 = vpack.c.bf16 %v517_v57, %v514_v55 }
 0x125   :  { %v5421_v58 = vpop.f32.mrf.mxu0 }
 0x127   :  { %v530_v59 = vpop.f32.mrf.mxu0 }
 0x129   :  { %v5422_v60 = vpop.f32.mrf.mxu0 }
 0x12a   :  { %v1062_v8 = vpack.c.bf16 %v5422_v60, %v5421_v58  ;;  %v5860_v58 = vld [vmem:[#allocation2 + $0x28] ss:$20 sps:$4 sm:$0xff]  }
 0x12b   :  { %v533_v61 = vpop.f32.mrf.mxu0  ;;  %v5861_v60 = vld [vmem:[#allocation2 + $0x54] ss:$20 sps:$4 sm:$0xff]  }
 0x12c   :  { %v1061_v11 = vpack.c.bf16 %v533_v61, %v530_v59 }
 0x12d   :  { %v5425_v62 = vpop.f32.mrf.mxu0 }
 0x12f   :  { %v546_v63 = vpop.f32.mrf.mxu0 }
 0x131   :  { %v5426_v1 = vpop.f32.mrf.mxu0 }
 0x132   :  { %v1064_v2 = vpack.c.bf16 %v5426_v1, %v5425_v62 }
 0x133   :  { %v549_v3 = vpop.f32.mrf.mxu0 }
 0x134   :  { %2145 = vmatpush1.bf16.msra.mxu1 %v1064_v2  ;;  %v1063_v5 = vpack.c.bf16 %v549_v3, %v546_v63  ;;  %v5863_v2 = vld [vmem:[#allocation2 + $0x50] ss:$20 sps:$4 sm:$0xff]  }
 0x135   :  { %v6523_v4 = vpop.f32.mrf.mxu0  ;;  %2146 = vmatprep.subr.bf16.mxu1 %v7867_v35 }
 0x137   :  { %v6526_v6 = vpop.f32.mrf.mxu0 }
 0x138   :  { %2147 = vmatpush1.bf16.msra.mxu1 %v1063_v5 }
 0x139   :  { %v6528_v7 = vpop.f32.mrf.mxu0  ;;  %2148 = vmatprep.subr.bf16.mxu1 %v7867_v35 }
 0x13a   :  { %v1066_v45 = vpack.c.bf16 %v6528_v7, %v6523_v4  ;;  %v5864_v4 = vld [vmem:[#allocation2 + $0x7c] ss:$20 sps:$4 sm:$0xff]  }
 0x13b   :  { %v6531_v9 = vpop.f32.mrf.mxu0 }
 0x13c   :  { %2149 = vmatpush1.bf16.msra.mxu1 %v1062_v8  ;;  %v1065_v48 = vpack.c.bf16 %v6531_v9, %v6526_v6 }
 0x13d   :  { %v5433_v10 = vpop.f32.mrf.mxu0  ;;  %2150 = vmatprep.subr.bf16.mxu1 %v7867_v35 }
 0x13f   :  { %v578_v12 = vpop.f32.mrf.mxu0 }
 0x140   :  { %2151 = vmatpush1.bf16.msra.mxu1 %v1061_v11 }
 0x141   :  { %v5434_v13 = vpop.f32.mrf.mxu0  ;;  %2152 = vmatprep.subr.bf16.mxu1 %v7867_v35 }
 0x142   :  { %v1068_v39 = vpack.c.bf16 %v5434_v13, %v5433_v10  ;;  %v5866_v10 = vld [vmem:[#allocation2 + $0x78] ss:$20 sps:$4 sm:$0xff]  }
 0x143   :  { %v581_v15 = vpop.f32.mrf.mxu0 }
 0x144   :  { %2153 = vmatpush1.bf16.msra.mxu1 %v1060_v14  ;;  %v1067_v42 = vpack.c.bf16 %v581_v15, %v578_v12  ;;  %v5867_v12 = vld [vmem:[#allocation2 + $0xa4] ss:$20 sps:$4 sm:$0xff]  }
 0x145   :  { %v5437_v16 = vpop.f32.mrf.mxu0  ;;  %2154 = vmatprep.subr.bf16.mxu1 %v7867_v35 }
 0x147   :  { %v594_v18 = vpop.f32.mrf.mxu0 }
 0x148   :  { %2155 = vmatpush1.bf16.msra.mxu1 %v1059_v17 }
 0x149   :  { %v5438_v19 = vpop.f32.mrf.mxu0  ;;  %2156 = vmatprep.subr.bf16.mxu1 %v7867_v35 }
 0x14a   :  { %v1070_v32 = vpack.c.bf16 %v5438_v19, %v5437_v16  ;;  %v5870_v19 = vld [vmem:[#allocation2 + $0xcc] ss:$20 sps:$4 sm:$0xff]  }
 0x14b   :  { %v597_v21 = vpop.f32.mrf.mxu0 }
 0x14c   :  { %2157 = vmatpush1.bf16.msra.mxu1 %v1058_v20  ;;  %v1069_v36 = vpack.c.bf16 %v597_v21, %v594_v18  ;;  %v5869_v18 = vld [vmem:[#allocation2 + $0xa0] ss:$20 sps:$4 sm:$0xff]  }
 0x14d   :  { %v5441_v22 = vpop.f32.mrf.mxu0  ;;  %2158 = vmatprep.subr.bf16.mxu1 %v7867_v35 }
 0x14f   :  { %v610_v24 = vpop.f32.mrf.mxu0 }
 0x150   :  { %2159 = vmatpush1.bf16.msra.mxu1 %v1057_v23 }
 0x151   :  { %v5442_v25 = vpop.f32.mrf.mxu0  ;;  %2160 = vmatprep.subr.bf16.mxu1 %v7867_v35 }
 0x152   :  { %v1072_v26 = vpack.c.bf16 %v5442_v25, %v5441_v22 }
 0x153   :  { %v613_v27 = vpop.f32.mrf.mxu0 }
 0x154   :  { %2161 = vmatpush2.bf16.msra.mxu1 %v1072_v26  ;;  %v1071_v29 = vpack.c.bf16 %v613_v27, %v610_v24  ;;  %v5872_v26 = vld [vmem:[#allocation2 + $0xc8] ss:$20 sps:$4 sm:$0xff]  }
 0x155   :  { %v6539_v28 = vpop.f32.mrf.mxu0  ;;  %2162 = vmatprep.subr.bf16.mxu1 %v7867_v35 }
 0x157   :  { %v6542_v30 = vpop.f32.mrf.mxu0 }
 0x158   :  { %2163 = vmatpush2.bf16.msra.mxu1 %v1071_v29 }
 0x159   :  { %v6544_v31 = vpop.f32.mrf.mxu0  ;;  %2164 = vmatprep.subr.bf16.mxu1 %v7867_v35 }
 0x15a   :  { %v1074_v11 = vpack.c.bf16 %v6544_v31, %v6539_v28  ;;  %v5873_v28 = vld [vmem:[#allocation2 + $0xf4] ss:$20 sps:$4 sm:$0xff]  }
 0x15b   :  { %v6547_v33 = vpop.f32.mrf.mxu0 }
 0x15c   :  { %2165 = vmatpush2.bf16.msra.mxu1 %v1070_v32  ;;  %v1073_v15 = vpack.c.bf16 %v6547_v33, %v6542_v30 }
 0x15d   :  { %v5449_v34 = vpop.f32.mrf.mxu0  ;;  %2166 = vmatprep.subr.bf16.mxu1 %v7867_v35 }
 0x15f   :  { %v6550_v37 = vpop.f32.mrf.mxu0 }
 0x160   :  { %2167 = vmatpush2.bf16.msra.mxu1 %v1069_v36 }
 0x161   :  { %v5450_v38 = vpop.f32.mrf.mxu0  ;;  %2168 = vmatprep.subr.bf16.mxu1 %v7867_v35 }
 0x162   :  { %v1076_v3 = vpack.c.bf16 %v5450_v38, %v5449_v34  ;;  %v5875_v34 = vld [vmem:[#allocation2 + $0xf0] ss:$20 sps:$4 sm:$0xff]  }
 0x163   :  { %v645_v40 = vpop.f32.mrf.mxu0 }
 0x164   :  { %2169 = vmatpush2.bf16.msra.mxu1 %v1068_v39  ;;  %v1075_v7 = vpack.c.bf16 %v645_v40, %v6550_v37  ;;  %v5876_v37 = vld [vmem:[#allocation2 + $0x11c] ss:$20 sps:$4 sm:$0xff]  }
 0x165   :  { %v5453_v41 = vpop.f32.mrf.mxu0  ;;  %2170 = vmatprep.subr.bf16.mxu1 %v7867_v35 }
 0x167   :  { %v658_v43 = vpop.f32.mrf.mxu0 }
 0x168   :  { %2171 = vmatpush2.bf16.msra.mxu1 %v1067_v42 }
 0x169   :  { %v5454_v44 = vpop.f32.mrf.mxu0  ;;  %2172 = vmatprep.subr.bf16.mxu1 %v7867_v35 }
 0x16a   :  { %v1078_v59 = vpack.c.bf16 %v5454_v44, %v5453_v41 }
 0x16b   :  { %v661_v46 = vpop.f32.mrf.mxu0 }
 0x16c   :  { %2173 = vmatpush2.bf16.msra.mxu1 %v1066_v45  ;;  %v1077_v63 = vpack.c.bf16 %v661_v46, %v658_v43  ;;  %v5878_v43 = vld [vmem:[#allocation2 + $0x118] ss:$20 sps:$4 sm:$0xff]  }
 0x16d   :  { %v5457_v47 = vpop.f32.mrf.mxu0  ;;  %2174 = vmatprep.subr.bf16.mxu1 %v7867_v35  ;;  %v5879_v45 = vld [vmem:[#allocation2 + $0x144] ss:$20 sps:$4 sm:$0xff]  }
 0x16f   :  { %v674_v49 = vpop.f32.mrf.mxu0 }
 0x170   :  { %2175 = vmatpush2.bf16.msra.mxu1 %v1065_v48 }
 0x171   :  { %v5458_v52 = vpop.f32.mrf.mxu0 }
 0x172   :  { %v1080_v53 = vpack.c.bf16 %v5458_v52, %v5457_v47  ;;  %v5884_v52 = vld [vmem:[#allocation2 + $0x140] ss:$20 sps:$4 sm:$0xff]  }
 0x173   :  { %v677_v54 = vpop.f32.mrf.mxu0  ;;  %2177 = vmatmul.mubr.bf16.vlgmr.msra.gmra.mxu1 %v5855_v50 }
 0x174   :  { %v1079_v55 = vpack.c.bf16 %v677_v54, %v674_v49  ;;  %2498 = vmatpush1.bf16.msra.mxu0 %v1080_v53  ;;  %2184 = vmatprep.mubr.bf16.mxu1 %v5858_v51  ;;  %v5881_v51 = vld [vmem:[#allocation2 + $0x8] ss:$20 sps:$4 sm:$0xff]   ;;  %v5885_v53 = vld [vmem:[#allocation2 + $0x16c] ss:$20 sps:$4 sm:$0xff]  }
 0x175   :  { %v6560_v56 = vpop.f32.mrf.mxu0  ;;  %2499 = vmatprep.subr.bf16.mxu0 %v7867_v35 }
 0x177   :  { %v6563_v57 = vpop.f32.mrf.mxu0 }
 0x178   :  { %2500 = vmatpush1.bf16.msra.mxu0 %v1079_v55  ;;  %v5887_v55 = vld [vmem:[#allocation2 + $0x34] ss:$20 sps:$4 sm:$0xff]  }
 0x179   :  { %v6565_v61 = vpop.f32.mrf.mxu0  ;;  %2501 = vmatprep.subr.bf16.mxu0 %v7867_v35 }
 0x17a   :  { %v1082_v44 = vpack.c.bf16 %v6565_v61, %v6560_v56  ;;  %v5890_v61 = vld [vmem:[#allocation2 + $0x30] ss:$20 sps:$4 sm:$0xff]  }
 0x17b   :  { %v6568_v62 = vpop.f32.mrf.mxu0  ;;  %2185 = vmatmul.mubr.bf16.gmra.mxu1 %v5860_v58 }
 0x17c   :  { %2502 = vmatpush1.bf16.msra.mxu0 %v1078_v59  ;;  %2192 = vmatprep.mubr.bf16.mxu1 %v5861_v60  ;;  %v1081_v48 = vpack.c.bf16 %v6568_v62, %v6563_v57  ;;  %v5889_v60 = vld [vmem:[#allocation2 + $0x168] ss:$20 sps:$4 sm:$0xff]  }
 0x17d   :  { %v6570_v0 = vpop.f32.mrf.mxu0  ;;  %2503 = vmatprep.subr.bf16.mxu0 %v7867_v35  ;;  %v5891_v62 = vld [vmem:[#allocation2 + $0x194] ss:$20 sps:$4 sm:$0xff]  }
 0x17f   :  { %v6573_v1 = vpop.f32.mrf.mxu0 }
 0x180   :  { %2504 = vmatpush1.bf16.msra.mxu0 %v1077_v63  ;;  %v5893_v63 = vld [vmem:[#allocation2 + $0x5c] ss:$20 sps:$4 sm:$0xff]  }
 0x181   :  { %v5466_v5 = vpop.f32.mrf.mxu0  ;;  %2505 = vmatprep.subr.bf16.mxu0 %v7867_v35 }
 0x182   :  { %v1084_v36 = vpack.c.bf16 %v5466_v5, %v6570_v0  ;;  %v5899_v5 = vld [vmem:[#allocation2 + $0x84] ss:$20 sps:$4 sm:$0xff]  }
 0x183   :  { %v6576_v6 = vpop.f32.mrf.mxu0  ;;  %2193 = vmatmul.mubr.bf16.gmra.mxu1 %v5863_v2  ;;  %v5895_v2 = vld [vmem:[#allocation2 + $0x190] ss:$20 sps:$4 sm:$0xff]  }
 0x184   :  { %2506 = vmatpush1.bf16.msra.mxu0 %v1076_v3  ;;  %2200 = vmatprep.mubr.bf16.mxu1 %v5864_v4  ;;  %v1083_v40 = vpack.c.bf16 %v6576_v6, %v6573_v1  ;;  %v5896_v3 = vld [vmem:[#allocation2 + $0x58] ss:$20 sps:$4 sm:$0xff]   ;;  %v5897_v4 = vld [vmem:[#allocation2 + $0x1bc] ss:$20 sps:$4 sm:$0xff]  }
 0x185   :  { %v5469_v8 = vpop.f32.mrf.mxu0  ;;  %2507 = vmatprep.subr.bf16.mxu0 %v7867_v35 }
 0x187   :  { %v722_v9 = vpop.f32.mrf.mxu0 }
 0x188   :  { %2508 = vmatpush1.bf16.msra.mxu0 %v1075_v7 }
 0x189   :  { %v5470_v13 = vpop.f32.mrf.mxu0  ;;  %2509 = vmatprep.subr.bf16.mxu0 %v7867_v35 }
 0x18a   :  { %v1086_v27 = vpack.c.bf16 %v5470_v13, %v5469_v8  ;;  %v5901_v8 = vld [vmem:[#allocation2 + $0x1b8] ss:$20 sps:$4 sm:$0xff]   ;;  %v5907_v13 = vld [vmem:[#allocation2 + $0x1e0] ss:$20 sps:$4 sm:$0xff]  }
 0x18b   :  { %v725_v14 = vpop.f32.mrf.mxu0  ;;  %2201 = vmatmul.mubr.bf16.gmra.mxu1 %v5866_v10  ;;  %v5903_v10 = vld [vmem:[#allocation2 + $0x1e4] ss:$20 sps:$4 sm:$0xff]  }
 0x18c   :  { %2510 = vmatpush1.bf16.msra.mxu0 %v1074_v11  ;;  %2208 = vmatprep.mubr.bf16.mxu1 %v5867_v12  ;;  %v1085_v31 = vpack.c.bf16 %v725_v14, %v722_v9  ;;  %v5902_v9 = vld [vmem:[#allocation2 + $0x80] ss:$20 sps:$4 sm:$0xff]   ;;  %v5908_v14 = vld [vmem:[#allocation2 + $0xa8] ss:$20 sps:$4 sm:$0xff]  }
 0x18d   :  { %v5473_v16 = vpop.f32.mrf.mxu0  ;;  %2511 = vmatprep.subr.bf16.mxu0 %v7867_v35  ;;  %v5905_v11 = vld [vmem:[#allocation2 + $0xac] ss:$20 sps:$4 sm:$0xff]  }
 0x18f   :  { %v738_v17 = vpop.f32.mrf.mxu0 }
 0x190   :  { %2512 = vmatpush1.bf16.msra.mxu0 %v1073_v15  ;;  %v5909_v15 = vld [vmem:[#allocation2 + $0x20c] ss:$20 sps:$4 sm:$0xff]  }
 0x191   :  { %v5474_v20 = vpop.f32.mrf.mxu0  ;;  %2513 = vmatprep.subr.bf16.mxu0 %v7867_v35 }
 0x192   :  { %v1088_v21 = vpack.c.bf16 %v5474_v20, %v5473_v16  ;;  %v5911_v16 = vld [vmem:[#allocation2 + $0xd4] ss:$20 sps:$4 sm:$0xff]   ;;  %v5917_v20 = vld [vmem:[#allocation2 + $0xfc] ss:$20 sps:$4 sm:$0xff]  }
 0x193   :  { %v741_v22 = vpop.f32.mrf.mxu0  ;;  %2209 = vmatmul.mubr.bf16.gmra.mxu1 %v5869_v18  ;;  %v5914_v18 = vld [vmem:[#allocation2 + $0xd0] ss:$20 sps:$4 sm:$0xff]  }
 0x194   :  { %v1087_v23 = vpack.c.bf16 %v741_v22, %v738_v17  ;;  %2514 = vmatpush2.bf16.msra.mxu0 %v1088_v21  ;;  %2216 = vmatprep.mubr.bf16.mxu1 %v5870_v19  ;;  %v5913_v17 = vld [vmem:[#allocation2 + $0x208] ss:$20 sps:$4 sm:$0xff]   ;;  %v5919_v21 = vld [vmem:[#allocation2 + $0x230] ss:$20 sps:$4 sm:$0xff]   ;;  %v5920_v22 = vld [vmem:[#allocation2 + $0xf8] ss:$20 sps:$4 sm:$0xff]  }
 0x195   :  { %v6587_v24 = vpop.f32.mrf.mxu0  ;;  %2515 = vmatprep.subr.bf16.mxu0 %v7867_v35  ;;  %v5915_v19 = vld [vmem:[#allocation2 + $0x234] ss:$20 sps:$4 sm:$0xff]  }
 0x197   :  { %v6590_v25 = vpop.f32.mrf.mxu0 }
 0x198   :  { %2516 = vmatpush2.bf16.msra.mxu0 %v1087_v23  ;;  %v5921_v23 = vld [vmem:[#allocation2 + $0x25c] ss:$20 sps:$4 sm:$0xff]  }
 0x199   :  { %v6592_v29 = vpop.f32.mrf.mxu0  ;;  %2517 = vmatprep.subr.bf16.mxu0 %v7867_v35 }
 0x19a   :  { %v1090_v7 = vpack.c.bf16 %v6592_v29, %v6587_v24  ;;  %v5923_v24 = vld [vmem:[#allocation2 + $0x124] ss:$20 sps:$4 sm:$0xff]   ;;  %v5929_v29 = vld [vmem:[#allocation2 + $0x148] ss:$20 sps:$4 sm:$0xff]  }
 0x19b   :  { %v6595_v30 = vpop.f32.mrf.mxu0  ;;  %2217 = vmatmul.mubr.bf16.gmra.mxu1 %v5872_v26  ;;  %v5926_v26 = vld [vmem:[#allocation2 + $0x120] ss:$20 sps:$4 sm:$0xff]  }
 0x19c   :  { %2518 = vmatpush2.bf16.msra.mxu0 %v1086_v27  ;;  %2224 = vmatprep.mubr.bf16.mxu1 %v5873_v28  ;;  %v1089_v12 = vpack.c.bf16 %v6595_v30, %v6590_v25  ;;  %v5925_v25 = vld [vmem:[#allocation2 + $0x258] ss:$20 sps:$4 sm:$0xff]   ;;  %v5932_v30 = vld [vmem:[#allocation2 + $0x280] ss:$20 sps:$4 sm:$0xff]  }
 0x19d   :  { %v5481_v32 = vpop.f32.mrf.mxu0  ;;  %2519 = vmatprep.subr.bf16.mxu0 %v7867_v35  ;;  %v5927_v27 = vld [vmem:[#allocation2 + $0x284] ss:$20 sps:$4 sm:$0xff]   ;;  %v5931_v28 = vld [vmem:[#allocation2 + $0x14c] ss:$20 sps:$4 sm:$0xff]  }
 0x19f   :  { %v6598_v33 = vpop.f32.mrf.mxu0 }
 0x1a0   :  { %2520 = vmatpush2.bf16.msra.mxu0 %v1085_v31  ;;  %v5933_v31 = vld [vmem:[#allocation2 + $0x2ac] ss:$20 sps:$4 sm:$0xff]  }
 0x1a1   :  { %v5482_v38 = vpop.f32.mrf.mxu0  ;;  %2521 = vmatprep.subr.bf16.mxu0 %v7867_v35 }
 0x1a2   :  { %v1092_v1 = vpack.c.bf16 %v5482_v38, %v5481_v32  ;;  %v5937_v32 = vld [vmem:[#allocation2 + $0x174] ss:$20 sps:$4 sm:$0xff]   ;;  %v5941_v38 = vld [vmem:[#allocation2 + $0x198] ss:$20 sps:$4 sm:$0xff]  }
 0x1a3   :  { %v773_v39 = vpop.f32.mrf.mxu0  ;;  %2225 = vmatmul.mubr.bf16.gmra.mxu1 %v5875_v34  ;;  %v5938_v34 = vld [vmem:[#allocation2 + $0x2a8] ss:$20 sps:$4 sm:$0xff]  }
 0x1a4   :  { %2522 = vmatpush2.bf16.msra.mxu0 %v1084_v36  ;;  %2232 = vmatprep.mubr.bf16.mxu1 %v5876_v37  ;;  %v1091_v6 = vpack.c.bf16 %v773_v39, %v6598_v33  ;;  %v5935_v33 = vld [vmem:[#allocation2 + $0x170] ss:$20 sps:$4 sm:$0xff]   ;;  %v5939_v36 = vld [vmem:[#allocation2 + $0x2d4] ss:$20 sps:$4 sm:$0xff]  }
 0x1a5   :  { %v5485_v41 = vpop.f32.mrf.mxu0  ;;  %2523 = vmatprep.subr.bf16.mxu0 %v7867_v35  ;;  %v5943_v37 = vld [vmem:[#allocation2 + $0x19c] ss:$20 sps:$4 sm:$0xff]  }
 0x1a6   :  { %v5944_v39 = vld [vmem:[#allocation2 + $0x2d0] ss:$20 sps:$4 sm:$0xff]  }
 0x1a7   :  { %v786_v42 = vpop.f32.mrf.mxu0 }
 0x1a8   :  { %2524 = vmatpush2.bf16.msra.mxu0 %v1083_v40  ;;  %v5945_v40 = vld [vmem:[#allocation2 + $0x2fc] ss:$20 sps:$4 sm:$0xff]  }
 0x1a9   :  { %v5486_v46 = vpop.f32.mrf.mxu0  ;;  %2525 = vmatprep.subr.bf16.mxu0 %v7867_v35 }
 0x1aa   :  { %v1094_v57 = vpack.c.bf16 %v5486_v46, %v5485_v41  ;;  %v5949_v41 = vld [vmem:[#allocation2 + $0x1c4] ss:$20 sps:$4 sm:$0xff]   ;;  %v5953_v46 = vld [vmem:[#allocation2 + $0x1e8] ss:$20 sps:$4 sm:$0xff]  }
 0x1ab   :  { %v789_v47 = vpop.f32.mrf.mxu0  ;;  %2233 = vmatmul.mubr.bf16.gmra.mxu1 %v5878_v43  ;;  %v5950_v43 = vld [vmem:[#allocation2 + $0x2f8] ss:$20 sps:$4 sm:$0xff]  }
 0x1ac   :  { %2526 = vmatpush2.bf16.msra.mxu0 %v1082_v44  ;;  %2240 = vmatprep.mubr.bf16.mxu1 %v5879_v45  ;;  %v1093_v0 = vpack.c.bf16 %v789_v47, %v786_v42  ;;  %v5947_v42 = vld [vmem:[#allocation2 + $0x1c0] ss:$20 sps:$4 sm:$0xff]   ;;  %v5951_v44 = vld [vmem:[#allocation2 + $0x324] ss:$20 sps:$4 sm:$0xff]  }
 0x1ad   :  { %v5489_v49 = vpop.f32.mrf.mxu0  ;;  %2527 = vmatprep.subr.bf16.mxu0 %v7867_v35  ;;  %v5955_v45 = vld [vmem:[#allocation2 + $0x1ec] ss:$20 sps:$4 sm:$0xff]  }
 0x1ae   :  { %v5956_v47 = vld [vmem:[#allocation2 + $0x320] ss:$20 sps:$4 sm:$0xff]  }
 0x1af   :  { %v802_v50 = vpop.f32.mrf.mxu0 }
 0x1b0   :  { %2528 = vmatpush2.bf16.msra.mxu0 %v1081_v48  ;;  %v5957_v48 = vld [vmem:[#allocation2 + $0x34c] ss:$20 sps:$4 sm:$0xff]  }
 0x1b1   :  { %v5490_v54 = vpop.f32.mrf.mxu0 }
 0x1b2   :  { %v1096_v56 = vpack.c.bf16 %v5490_v54, %v5489_v49  ;;  %v5961_v49 = vld [vmem:[#allocation2 + $0x214] ss:$20 sps:$4 sm:$0xff]   ;;  %v5965_v54 = vld [vmem:[#allocation2 + $0x238] ss:$20 sps:$4 sm:$0xff]  }
 0x1b3   :  { %2241 = vmatmul.mubr.bf16.gmra.mxu1 %v5884_v52  ;;  %2530 = vmatmul.mubr.bf16.vlgmr.msra.gmra.mxu0 %v5881_v51  ;;  %v805_v58 = vpop.f32.mrf.mxu0  ;;  %v5962_v51 = vld [vmem:[#allocation2 + $0x348] ss:$20 sps:$4 sm:$0xff]  }
 0x1b4   :  { %5491 = vmatprep.subr.bf16.mxu1 %v1096_v56  ;;  %v1095_v59 = vpack.c.bf16 %v805_v58, %v802_v50  ;;  %2248 = vmatprep.mubr.bf16.mxu1 %v5885_v53  ;;  %v5959_v50 = vld [vmem:[#allocation2 + $0x210] ss:$20 sps:$4 sm:$0xff]   ;;  %v5963_v52 = vld [vmem:[#allocation2 + $0x374] ss:$20 sps:$4 sm:$0xff]  }
 0x1b5   :  { %5492 = vmatpush3.bf16.msra.mxu1 %v1096_v56  ;;  %2537 = vmatprep.mubr.bf16.mxu0 %v5887_v55  ;;  %v5967_v53 = vld [vmem:[#allocation2 + $0x23c] ss:$20 sps:$4 sm:$0xff]   ;;  %v5973_v58 = vld [vmem:[#allocation2 + $0x264] ss:$20 sps:$4 sm:$0xff]  }
 0x1b6   :  { %5493 = vmatprep.subr.bf16.mxu1 %v1095_v59  ;;  %v5968_v55 = vld [vmem:[#allocation2 + $0x370] ss:$20 sps:$4 sm:$0xff]  }
 0x1b7   :  { %v5969_v56 = vld [vmem:[#allocation2 + $0x39c] ss:$20 sps:$4 sm:$0xff]  }
 0x1b9   :  { %5494 = vmatpush3.bf16.msra.mxu1 %v1095_v59  ;;  %v6059_v59 = vld [vmem:[#allocation8 + $0x38] sm:$0xff]  }
 0x1ba   :  { %5495 = vmatprep.subr.bf16.mxu1 %v1094_v57  ;;  %5587 = vmatprep.subr.bf16.mxu0 %v6059_v59 }
 0x1bb   :  { %2249 = vmatmul.mubr.bf16.gmra.mxu1 %v5889_v60  ;;  %2538 = vmatmul.mubr.bf16.gmra.mxu0 %v5890_v61  ;;  %v5974_v60 = vld [vmem:[#allocation2 + $0x398] ss:$20 sps:$4 sm:$0xff]  }
 0x1bc   :  { %2256 = vmatprep.mubr.bf16.mxu1 %v5891_v62  ;;  %2545 = vmatprep.mubr.bf16.mxu0 %v5893_v63  ;;  %v5975_v61 = vld [vmem:[#allocation2 + $0x3c4] ss:$20 sps:$4 sm:$0xff]   ;;  %v5979_v62 = vld [vmem:[#allocation2 + $0x28c] ss:$20 sps:$4 sm:$0xff]   ;;  %v5977_v63 = vld [vmem:[#allocation2 + $0x288] ss:$20 sps:$4 sm:$0xff]  }
 0x1bd   :  { %5496 = vmatpush3.bf16.msra.mxu1 %v1094_v57  ;;  %5588 = vmatpush3.bf16.msra.mxu0 %v6059_v59  ;;  %v5971_v57 = vld [vmem:[#allocation2 + $0x260] ss:$20 sps:$4 sm:$0xff]   ;;  %v6025_v59 = vld [vmem:[#allocation2 + $0x504] ss:$20 sps:$4 sm:$0xff]  }
 0x1be   :  { %5497 = vmatprep.subr.bf16.mxu1 %v1093_v0 }
 0x1c1   :  { %5498 = vmatpush3.bf16.msra.mxu1 %v1093_v0  ;;  %v5980_v0 = vld [vmem:[#allocation2 + $0x3c0] ss:$20 sps:$4 sm:$0xff]  }
 0x1c2   :  { %5499 = vmatprep.subr.bf16.mxu1 %v1092_v1 }
 0x1c3   :  { %2257 = vmatmul.mubr.bf16.gmra.mxu1 %v5895_v2  ;;  %2546 = vmatmul.mubr.bf16.gmra.mxu0 %v5896_v3  ;;  %v5985_v2 = vld [vmem:[#allocation2 + $0x2b4] ss:$20 sps:$4 sm:$0xff]  }
 0x1c4   :  { %2264 = vmatprep.mubr.bf16.mxu1 %v5897_v4  ;;  %2553 = vmatprep.mubr.bf16.mxu0 %v5899_v5 }
 0x1c5   :  { %5500 = vmatpush3.bf16.msra.mxu1 %v1092_v1  ;;  %v5981_v1 = vld [vmem:[#allocation2 + $0x3ec] ss:$20 sps:$4 sm:$0xff]  }
 0x1c6   :  { %5501 = vmatprep.subr.bf16.mxu1 %v1091_v6 }
 0x1c9   :  { %5502 = vmatpush3.bf16.msra.mxu1 %v1091_v6  ;;  %v5983_v6 = vld [vmem:[#allocation2 + $0x2b0] ss:$20 sps:$4 sm:$0xff]  }
 0x1ca   :  { %5503 = vmatprep.subr.bf16.mxu1 %v1090_v7 }
 0x1cb   :  { %2265 = vmatmul.mubr.bf16.gmra.mxu1 %v5901_v8  ;;  %2554 = vmatmul.mubr.bf16.gmra.mxu0 %v5902_v9  ;;  %v5987_v8 = vld [vmem:[#allocation2 + $0x414] ss:$20 sps:$4 sm:$0xff]   ;;  %v5991_v9 = vld [vmem:[#allocation2 + $0x2dc] ss:$20 sps:$4 sm:$0xff]  }
 0x1cc   :  { %2272 = vmatprep.mubr.bf16.mxu1 %v5903_v10  ;;  %2561 = vmatprep.mubr.bf16.mxu0 %v5905_v11 }
 0x1cd   :  { %5504 = vmatpush3.bf16.msra.mxu1 %v1090_v7  ;;  %v5986_v7 = vld [vmem:[#allocation2 + $0x3e8] ss:$20 sps:$4 sm:$0xff]  }
 0x1ce   :  { %5505 = vmatprep.subr.bf16.mxu1 %v1089_v12 }
 0x1d1   :  { %5506 = vmatpush3.bf16.msra.mxu1 %v1089_v12 }
 0x1d2   :  { %3787 = vmatprep.subr.bf16.mxu1 %v7867_v35 }
 0x1d3   :  { %2273 = vmatmul.mubr.bf16.gmra.mxu1 %v5907_v13  ;;  %2562 = vmatmul.mubr.bf16.gmra.mxu0 %v5908_v14  ;;  %v5989_v14 = vld [vmem:[#allocation2 + $0x2d8] ss:$20 sps:$4 sm:$0xff]  }
 0x1d4   :  { %2280 = vmatprep.mubr.bf16.mxu1 %v5909_v15  ;;  %2569 = vmatprep.mubr.bf16.mxu0 %v5911_v16  ;;  %v5992_v15 = vld [vmem:[#allocation2 + $0x410] ss:$20 sps:$4 sm:$0xff]  }
 0x1d5   :  { %v5993_v16 = vld [vmem:[#allocation2 + $0x43c] ss:$20 sps:$4 sm:$0xff]  }
 0x1db   :  { %2281 = vmatmul.mubr.bf16.gmra.mxu1 %v5913_v17  ;;  %2570 = vmatmul.mubr.bf16.gmra.mxu0 %v5914_v18  ;;  %v5997_v17 = vld [vmem:[#allocation2 + $0x304] ss:$20 sps:$4 sm:$0xff]  }
 0x1dc   :  { %2288 = vmatprep.mubr.bf16.mxu1 %v5915_v19  ;;  %2577 = vmatprep.mubr.bf16.mxu0 %v5917_v20 }
 0x1e3   :  { %2289 = vmatmul.mubr.bf16.gmra.mxu1 %v5919_v21  ;;  %2578 = vmatmul.mubr.bf16.gmra.mxu0 %v5920_v22  ;;  %v5995_v22 = vld [vmem:[#allocation2 + $0x300] ss:$20 sps:$4 sm:$0xff]  }
 0x1e4   :  { %2296 = vmatprep.mubr.bf16.mxu1 %v5921_v23  ;;  %2585 = vmatprep.mubr.bf16.mxu0 %v5923_v24  ;;  %v5998_v23 = vld [vmem:[#allocation2 + $0x438] ss:$20 sps:$4 sm:$0xff]  }
 0x1e5   :  { %v6001_v24 = vld [vmem:[#allocation2 + $0x464] ss:$20 sps:$4 sm:$0xff]  }
 0x1eb   :  { %2297 = vmatmul.mubr.bf16.gmra.mxu1 %v5925_v25  ;;  %2586 = vmatmul.mubr.bf16.gmra.mxu0 %v5926_v26  ;;  %v6004_v25 = vld [vmem:[#allocation2 + $0x32c] ss:$20 sps:$4 sm:$0xff]  }
 0x1ec   :  { %2304 = vmatprep.mubr.bf16.mxu1 %v5927_v27  ;;  %2593 = vmatprep.mubr.bf16.mxu0 %v5931_v28  ;;  %v6087_v27 = vld [vmem:[#allocation8 + $0x30] sm:$0xff]  }
 0x1ed   :  { %5589 = vmatprep.subr.bf16.mxu0 %v6087_v27 }
 0x1ee   :  { %5590 = vmatpush3.bf16.msra.mxu0 %v6087_v27 }
 0x1f3   :  { %2305 = vmatmul.mubr.bf16.gmra.mxu1 %v5932_v30  ;;  %2594 = vmatmul.mubr.bf16.gmra.mxu0 %v5929_v29 }
 0x1f4   :  { %2312 = vmatprep.mubr.bf16.mxu1 %v5933_v31  ;;  %2601 = vmatprep.mubr.bf16.mxu0 %v5937_v32  ;;  %v5999_v31 = vld [vmem:[#allocation2 + $0x460] ss:$20 sps:$4 sm:$0xff]   ;;  %v6002_v32 = vld [vmem:[#allocation2 + $0x328] ss:$20 sps:$4 sm:$0xff]  }
 0x1fb   :  { %2313 = vmatmul.mubr.bf16.gmra.mxu1 %v5938_v34  ;;  %2602 = vmatmul.mubr.bf16.gmra.mxu0 %v5935_v33  ;;  %v6007_v33 = vld [vmem:[#allocation2 + $0x48c] ss:$20 sps:$4 sm:$0xff]   ;;  %v6010_v34 = vld [vmem:[#allocation2 + $0x354] ss:$20 sps:$4 sm:$0xff]  }
 0x1fc   :  { %2320 = vmatprep.mubr.bf16.mxu1 %v5939_v36  ;;  %2609 = vmatprep.mubr.bf16.mxu0 %v5943_v37 }
 0x203   :  { %2321 = vmatmul.mubr.bf16.gmra.mxu1 %v5944_v39  ;;  %2610 = vmatmul.mubr.bf16.gmra.mxu0 %v5941_v38 }
 0x204   :  { %2328 = vmatprep.mubr.bf16.mxu1 %v5945_v40  ;;  %2617 = vmatprep.mubr.bf16.mxu0 %v5949_v41  ;;  %v6005_v40 = vld [vmem:[#allocation2 + $0x488] ss:$20 sps:$4 sm:$0xff]   ;;  %v6008_v41 = vld [vmem:[#allocation2 + $0x350] ss:$20 sps:$4 sm:$0xff]  }
 0x20b   :  { %2329 = vmatmul.mubr.bf16.gmra.mxu1 %v5950_v43  ;;  %2618 = vmatmul.mubr.bf16.gmra.mxu0 %v5947_v42  ;;  %v6013_v42 = vld [vmem:[#allocation2 + $0x4b4] ss:$20 sps:$4 sm:$0xff]   ;;  %v6016_v43 = vld [vmem:[#allocation2 + $0x37c] ss:$20 sps:$4 sm:$0xff]  }
 0x20c   :  { %2336 = vmatprep.mubr.bf16.mxu1 %v5951_v44  ;;  %2625 = vmatprep.mubr.bf16.mxu0 %v5955_v45 }
 0x213   :  { %2337 = vmatmul.mubr.bf16.gmra.mxu1 %v5956_v47  ;;  %2626 = vmatmul.mubr.bf16.gmra.mxu0 %v5953_v46 }
 0x214   :  { %2344 = vmatprep.mubr.bf16.mxu1 %v5957_v48  ;;  %2633 = vmatprep.mubr.bf16.mxu0 %v5961_v49  ;;  %v6011_v48 = vld [vmem:[#allocation2 + $0x4b0] ss:$20 sps:$4 sm:$0xff]   ;;  %v6014_v49 = vld [vmem:[#allocation2 + $0x378] ss:$20 sps:$4 sm:$0xff]  }
 0x21b   :  { %2345 = vmatmul.mubr.bf16.gmra.mxu1 %v5962_v51  ;;  %2634 = vmatmul.mubr.bf16.gmra.mxu0 %v5959_v50  ;;  %v6019_v50 = vld [vmem:[#allocation2 + $0x4dc] ss:$20 sps:$4 sm:$0xff]   ;;  %v6022_v51 = vld [vmem:[#allocation2 + $0x3a4] ss:$20 sps:$4 sm:$0xff]  }
 0x21c   :  { %2352 = vmatprep.mubr.bf16.mxu1 %v5963_v52  ;;  %2641 = vmatprep.mubr.bf16.mxu0 %v5967_v53 }
 0x223   :  { %2353 = vmatmul.mubr.bf16.gmra.mxu1 %v5968_v55  ;;  %2642 = vmatmul.mubr.bf16.gmra.mxu0 %v5965_v54 }
 0x224   :  { %2360 = vmatprep.mubr.bf16.mxu1 %v5969_v56  ;;  %2649 = vmatprep.mubr.bf16.mxu0 %v5973_v58  ;;  %v6017_v56 = vld [vmem:[#allocation2 + $0x4d8] ss:$20 sps:$4 sm:$0xff]   ;;  %v6020_v58 = vld [vmem:[#allocation2 + $0x3a0] ss:$20 sps:$4 sm:$0xff]  }
 0x22b   :  { %2361 = vmatmul.mubr.bf16.gmra.mxu1 %v5974_v60  ;;  %2650 = vmatmul.mubr.bf16.gmra.mxu0 %v5971_v57  ;;  %v6028_v57 = vld [vmem:[#allocation2 + $0x3cc] ss:$20 sps:$4 sm:$0xff]  }
 0x22c   :  { %2368 = vmatprep.mubr.bf16.mxu1 %v5975_v61  ;;  %2657 = vmatprep.mubr.bf16.mxu0 %v5979_v62 }
 0x233   :  { %v6617_v3 = vpop.f32.mrf.mxu1  ;;  %2369 = vmatmul.mubr.bf16.gmra.mxu1 %v5980_v0  ;;  %2658 = vmatmul.mubr.bf16.gmra.mxu0 %v5977_v63  ;;  %v6650_v63 = vld [vmem:[%s7863_s3] ss:$0 sm:$0xff] }
 0x234   :  { %2376 = vmatprep.mubr.bf16.mxu1 %v5981_v1  ;;  %2665 = vmatprep.mubr.bf16.mxu0 %v5985_v2  ;;  %v6023_v1 = vld [vmem:[#allocation2 + $0x500] ss:$20 sps:$4 sm:$0xff]   ;;  %v6026_v2 = vld [vmem:[#allocation2 + $0x3c8] ss:$20 sps:$4 sm:$0xff]  }
 0x235   :  { %v2180_v4 = vpop.f32.mrf.mxu1 }
 0x236   :  { %v6031_v4 = vld [vmem:[#allocation2 + $0x52c] ss:$20 sps:$4 sm:$0xff]  }
 0x237   :  { %v6619_v5 = vpop.f32.mrf.mxu1 }
 0x239   :  { %v2183_v10 = vpop.f32.mrf.mxu1 }
 0x23b   :  { %v6621_v11 = vpop.f32.mrf.mxu1  ;;  %2377 = vmatmul.mubr.bf16.gmra.mxu1 %v5986_v7  ;;  %2666 = vmatmul.mubr.bf16.gmra.mxu0 %v5983_v6  ;;  %v6034_v6 = vld [vmem:[#allocation2 + $0x3f4] ss:$20 sps:$4 sm:$0xff]  }
 0x23c   :  { %2384 = vmatprep.mubr.bf16.mxu1 %v5987_v8  ;;  %2673 = vmatprep.mubr.bf16.mxu0 %v5991_v9  ;;  %v6113_v8 = vld [vmem:[#allocation8 + $0x28] sm:$0xff]   ;;  %v2179_v9 = vadd.f32 %v6650_v63, %v6617_v3 }
 0x23d   :  { %v2188_v12 = vpop.f32.mrf.mxu1  ;;  %5591 = vmatprep.subr.bf16.mxu0 %v6113_v8  ;;  %v6029_v3 = vld [vmem:[#allocation2 + $0x528] ss:$20 sps:$4 sm:$0xff]  }
 0x23e   :  { %5592 = vmatpush3.bf16.msra.mxu0 %v6113_v8 }
 0x23f   :  { %v6623_v13 = vpop.f32.mrf.mxu1 }
 0x241   :  { %v2191_v18 = vpop.f32.mrf.mxu1 }
 0x243   :  { %v6625_v19 = vpop.f32.mrf.mxu1  ;;  %2385 = vmatmul.mubr.bf16.gmra.mxu1 %v5992_v15  ;;  %2674 = vmatmul.mubr.bf16.gmra.mxu0 %v5989_v14 }
 0x244   :  { %2392 = vmatprep.mubr.bf16.mxu1 %v5993_v16  ;;  %2681 = vmatprep.mubr.bf16.mxu0 %v5997_v17  ;;  %v2182_v17 = vadd.f32 %v6650_v63, %v6619_v5 }
 0x245   :  { %v2196_v20 = vpop.f32.mrf.mxu1 }
 0x247   :  { %v6627_v21 = vpop.f32.mrf.mxu1 }
 0x249   :  { %v2199_v26 = vpop.f32.mrf.mxu1 }
 0x24b   :  { %v6629_v28 = vpop.f32.mrf.mxu1  ;;  %2393 = vmatmul.mubr.bf16.gmra.mxu1 %v5998_v23  ;;  %2682 = vmatmul.mubr.bf16.gmra.mxu0 %v5995_v22  ;;  %v6032_v22 = vld [vmem:[#allocation2 + $0x3f0] ss:$20 sps:$4 sm:$0xff]  }
 0x24c   :  { %2400 = vmatprep.mubr.bf16.mxu1 %v6001_v24  ;;  %2689 = vmatprep.mubr.bf16.mxu0 %v6004_v25  ;;  %v6037_v24 = vld [vmem:[#allocation2 + $0x554] ss:$20 sps:$4 sm:$0xff]   ;;  %v6040_v25 = vld [vmem:[#allocation2 + $0x41c] ss:$20 sps:$4 sm:$0xff]  }
 0x24d   :  { %v2204_v29 = vpop.f32.mrf.mxu1 }
 0x24e   :  { %v2187_v29 = vadd.f32 %v6650_v63, %v6621_v11 }
 0x24f   :  { %v6631_v30 = vpop.f32.mrf.mxu1 }
 0x251   :  { %v2207_v36 = vpop.f32.mrf.mxu1 }
 0x252   :  { %v2190_v36 = vadd.f32 %v6650_v63, %v6623_v13 }
 0x253   :  { %v6633_v37 = vpop.f32.mrf.mxu1  ;;  %2401 = vmatmul.mubr.bf16.gmra.mxu1 %v5999_v31  ;;  %2690 = vmatmul.mubr.bf16.gmra.mxu0 %v6002_v32 }
 0x254   :  { %2408 = vmatprep.mubr.bf16.mxu1 %v6007_v33  ;;  %2697 = vmatprep.mubr.bf16.mxu0 %v6010_v34 }
 0x255   :  { %v2212_v38 = vpop.f32.mrf.mxu1 }
 0x257   :  { %v6635_v39 = vpop.f32.mrf.mxu1 }
 0x259   :  { %v2215_v44 = vpop.f32.mrf.mxu1 }
 0x25a   :  { %v6046_v44 = vld [vmem:[#allocation2 + $0x444] ss:$20 sps:$4 sm:$0xff]  }
 0x25b   :  { %v6637_v45 = vpop.f32.mrf.mxu1  ;;  %2409 = vmatmul.mubr.bf16.gmra.mxu1 %v6005_v40  ;;  %2698 = vmatmul.mubr.bf16.gmra.mxu0 %v6008_v41  ;;  %v6035_v41 = vld [vmem:[#allocation2 + $0x550] ss:$20 sps:$4 sm:$0xff]  }
 0x25c   :  { %2416 = vmatprep.mubr.bf16.mxu1 %v6013_v42  ;;  %2705 = vmatprep.mubr.bf16.mxu0 %v6016_v43  ;;  %v6038_v42 = vld [vmem:[#allocation2 + $0x418] ss:$20 sps:$4 sm:$0xff]   ;;  %v6043_v43 = vld [vmem:[#allocation2 + $0x57c] ss:$20 sps:$4 sm:$0xff]  }
 0x25d   :  { %v2220_v46 = vpop.f32.mrf.mxu1 }
 0x25f   :  { %v6639_v47 = vpop.f32.mrf.mxu1 }
 0x261   :  { %v2223_v52 = vpop.f32.mrf.mxu1 }
 0x263   :  { %v6641_v53 = vpop.f32.mrf.mxu1  ;;  %2417 = vmatmul.mubr.bf16.gmra.mxu1 %v6011_v48  ;;  %2706 = vmatmul.mubr.bf16.gmra.mxu0 %v6014_v49  ;;  %v2195_v49 = vadd.f32 %v6650_v63, %v6625_v19 }
 0x264   :  { %2424 = vmatprep.mubr.bf16.mxu1 %v6019_v50  ;;  %2713 = vmatprep.mubr.bf16.mxu0 %v6022_v51 }
 0x265   :  { %v2228_v54 = vpop.f32.mrf.mxu1 }
 0x267   :  { %v6643_v55 = vpop.f32.mrf.mxu1 }
 0x269   :  { %v2231_v60 = vpop.f32.mrf.mxu1 }
 0x26a   :  { %v6044_v60 = vld [vmem:[#allocation2 + $0x440] ss:$20 sps:$4 sm:$0xff]  }
 0x26b   :  { %v6645_v61 = vpop.f32.mrf.mxu1  ;;  %2425 = vmatmul.mubr.bf16.gmra.mxu1 %v6017_v56  ;;  %2714 = vmatmul.mubr.bf16.gmra.mxu0 %v6020_v58  ;;  %v2198_v56 = vadd.f32 %v6650_v63, %v6627_v21 }
 0x26c   :  { %2432 = vmatprep.mubr.bf16.mxu1 %v6025_v59  ;;  %2721 = vmatprep.mubr.bf16.mxu0 %v6028_v57  ;;  %v6041_v57 = vld [vmem:[#allocation2 + $0x578] ss:$20 sps:$4 sm:$0xff]  }
 0x26d   :  { %v2236_v62 = vpop.f32.mrf.mxu1 }
 0x26e   :  { %v6049_v62 = vld [vmem:[#allocation2 + $0x5a4] ss:$20 sps:$4 sm:$0xff]  }
 0x26f   :  { %v6652_v0 = vpop.f32.mrf.mxu1 }
 0x271   :  { %v2239_v7 = vpop.f32.mrf.mxu1 }
 0x273   :  { %v6656_v10 = vpop.f32.mrf.mxu1  ;;  %2433 = vmatmul.mubr.bf16.gmra.mxu1 %v6023_v1  ;;  %v2531_v12 = vpop.f32.mrf.mxu0  ;;  %2722 = vmatmul.mubr.bf16.gmra.mxu0 %v6026_v2  ;;  %v6052_v1 = vld [vmem:[#allocation2 + $0x46c] ss:$20 sps:$4 sm:$0xff]  }
 0x274   :  { %v6658_v14 = vadd.f32 %v2531_v12, %v2179_v9  ;;  %2440 = vmatprep.mubr.bf16.mxu1 %v6031_v4  ;;  %2729 = vmatprep.mubr.bf16.mxu0 %v6034_v6  ;;  %v2203_v6 = vadd.f32 %v6650_v63, %v6629_v28 }
 0x275   :  { %v2244_v15 = vpop.f32.mrf.mxu1  ;;  %v2533_v16 = vpop.f32.mrf.mxu0 }
 0x276   :  { %v2206_v15 = vadd.f32 %v6650_v63, %v6631_v30 }
 0x277   :  { %v6662_v18 = vpop.f32.mrf.mxu1  ;;  %v2534_v20 = vpop.f32.mrf.mxu0 }
 0x278   :  { %v6664_v23 = vadd.f32 %v2534_v20, %v2182_v17  ;;  %v6047_v20 = vld [vmem:[#allocation2 + $0x5a0] ss:$20 sps:$4 sm:$0xff]  }
 0x279   :  { %v2247_v26 = vpop.f32.mrf.mxu1  ;;  %v2536_v27 = vpop.f32.mrf.mxu0 }
 0x27a   :  { %v2211_v27 = vadd.f32 %v6650_v63, %v6633_v37 }
 0x27b   :  { %v6668_v31 = vpop.f32.mrf.mxu1  ;;  %2441 = vmatmul.mubr.bf16.gmra.mxu1 %v6029_v3  ;;  %v2539_v32 = vpop.f32.mrf.mxu0  ;;  %2730 = vmatmul.mubr.bf16.gmra.mxu0 %v6032_v22  ;;  %v6050_v3 = vld [vmem:[#allocation2 + $0x468] ss:$20 sps:$4 sm:$0xff]   ;;  %v6055_v22 = vld [vmem:[#allocation2 + $0x5cc] ss:$20 sps:$4 sm:$0xff]  }
 0x27c   :  { %v6670_v5 = vadd.f32 %v2539_v32, %v2187_v29  ;;  %2448 = vmatprep.mubr.bf16.mxu1 %v6037_v24  ;;  %2737 = vmatprep.mubr.bf16.mxu0 %v6040_v25  ;;  %v6058_v24 = vld [vmem:[#allocation2 + $0x494] ss:$20 sps:$4 sm:$0xff]  }
 0x27d   :  { %v2252_v33 = vpop.f32.mrf.mxu1  ;;  %v2541_v34 = vpop.f32.mrf.mxu0 }
 0x27f   :  { %v6674_v38 = vpop.f32.mrf.mxu1  ;;  %v2542_v40 = vpop.f32.mrf.mxu0 }
 0x280   :  { %v6676_v11 = vadd.f32 %v2542_v40, %v2190_v36  ;;  %v2214_v36 = vadd.f32 %v6650_v63, %v6635_v39 }
 0x281   :  { %v2255_v46 = vpop.f32.mrf.mxu1  ;;  %v2544_v48 = vpop.f32.mrf.mxu0 }
 0x282   :  { %v6065_v46 = vld [vmem:[#allocation2 + $0x4bc] ss:$20 sps:$4 sm:$0xff]  }
 0x283   :  { %v6680_v50 = vpop.f32.mrf.mxu1  ;;  %2449 = vmatmul.mubr.bf16.gmra.mxu1 %v6035_v41  ;;  %v2547_v51 = vpop.f32.mrf.mxu0  ;;  %2738 = vmatmul.mubr.bf16.gmra.mxu0 %v6038_v42  ;;  %v6053_v42 = vld [vmem:[#allocation2 + $0x5c8] ss:$20 sps:$4 sm:$0xff]  }
 0x284   :  { %v6682_v13 = vadd.f32 %v2547_v51, %v2195_v49  ;;  %2456 = vmatprep.mubr.bf16.mxu1 %v6043_v43  ;;  %2745 = vmatprep.mubr.bf16.mxu0 %v6046_v44  ;;  %v6056_v43 = vld [vmem:[#allocation2 + $0x490] ss:$20 sps:$4 sm:$0xff]   ;;  %v6062_v44 = vld [vmem:[#allocation2 + $0x5f4] ss:$20 sps:$4 sm:$0xff]  }
 0x285   :  { %v2260_v52 = vpop.f32.mrf.mxu1  ;;  %v2549_v54 = vpop.f32.mrf.mxu0  ;;  %v6124_v51 = vld [vmem:[#allocation8 + $0x20] sm:$0xff]  }
 0x286   :  { %v2219_v52 = vadd.f32 %v6650_v63, %v6637_v45  ;;  %5593 = vmatprep.subr.bf16.mxu0 %v6124_v51  ;;  %v6060_v45 = vld [vmem:[#allocation2 + $0x5f0] ss:$20 sps:$4 sm:$0xff]  }
 0x287   :  { %v6686_v58 = vpop.f32.mrf.mxu1  ;;  %v2550_v59 = vpop.f32.mrf.mxu0  ;;  %5594 = vmatpush3.bf16.msra.mxu0 %v6124_v51 }
 0x288   :  { %v6688_v19 = vadd.f32 %v2550_v59, %v2198_v56 }
 0x289   :  { %v2263_v2 = vpop.f32.mrf.mxu1  ;;  %v2552_v4 = vpop.f32.mrf.mxu0 }
 0x28a   :  { %v6063_v2 = vld [vmem:[#allocation2 + $0x4b8] ss:$20 sps:$4 sm:$0xff]  }
 0x28b   :  { %v6692_v7 = vpop.f32.mrf.mxu1  ;;  %2457 = vmatmul.mubr.bf16.gmra.mxu1 %v6041_v57  ;;  %v2555_v8 = vpop.f32.mrf.mxu0  ;;  %2746 = vmatmul.mubr.bf16.gmra.mxu0 %v6044_v60  ;;  %v2222_v60 = vadd.f32 %v6650_v63, %v6639_v47 }
 0x28c   :  { %v6694_v21 = vadd.f32 %v2555_v8, %v2203_v6  ;;  %2464 = vmatprep.mubr.bf16.mxu1 %v6049_v62  ;;  %2753 = vmatprep.mubr.bf16.mxu0 %v6052_v1  ;;  %v6068_v6 = vld [vmem:[#allocation2 + $0x61c] ss:$20 sps:$4 sm:$0xff]   ;;  %v6071_v8 = vld [vmem:[#allocation2 + $0x4e4] ss:$20 sps:$4 sm:$0xff]  }
 0x28d   :  { %v2268_v9 = vpop.f32.mrf.mxu1  ;;  %v2557_v12 = vpop.f32.mrf.mxu0 }
 0x28f   :  { %v6698_v16 = vpop.f32.mrf.mxu1  ;;  %v2558_v17 = vpop.f32.mrf.mxu0 }
 0x290   :  { %v6700_v28 = vadd.f32 %v2558_v17, %v2206_v15  ;;  %v2227_v15 = vadd.f32 %v6650_v63, %v6641_v53 }
 0x291   :  { %v2271_v25 = vpop.f32.mrf.mxu1  ;;  %v2560_v26 = vpop.f32.mrf.mxu0 }
 0x293   :  { %v6704_v29 = vpop.f32.mrf.mxu1  ;;  %2465 = vmatmul.mubr.bf16.gmra.mxu1 %v6047_v20  ;;  %v2563_v32 = vpop.f32.mrf.mxu0  ;;  %2754 = vmatmul.mubr.bf16.gmra.mxu0 %v6050_v3 }
 0x294   :  { %v6706_v30 = vadd.f32 %v2563_v32, %v2211_v27  ;;  %2472 = vmatprep.mubr.bf16.mxu1 %v6055_v22  ;;  %2761 = vmatprep.mubr.bf16.mxu0 %v6058_v24  ;;  %v2230_v24 = vadd.f32 %v6650_v63, %v6643_v55  ;;  %v6066_v27 = vld [vmem:[#allocation2 + $0x618] ss:$20 sps:$4 sm:$0xff]   ;;  %v6069_v32 = vld [vmem:[#allocation2 + $0x4e0] ss:$20 sps:$4 sm:$0xff]  }
 0x295   :  { %v2276_v33 = vpop.f32.mrf.mxu1  ;;  %v2565_v34 = vpop.f32.mrf.mxu0 }
 0x296   :  { %v6074_v33 = vld [vmem:[#allocation2 + $0x50c] ss:$20 sps:$4 sm:$0xff]   ;;  %v6075_v34 = vld [vmem:[#allocation2 + $0x10] ss:$20 sps:$4 sm:$0xff]  }
 0x297   :  { %v6710_v40 = vpop.f32.mrf.mxu1  ;;  %v2566_v41 = vpop.f32.mrf.mxu0 }
 0x298   :  { %v6712_v37 = vadd.f32 %v2566_v41, %v2214_v36 }
 0x299   :  { %v2279_v48 = vpop.f32.mrf.mxu1  ;;  %v2568_v49 = vpop.f32.mrf.mxu0 }
 0x29a   :  { %v2238_v49 = vadd.f32 %v6650_v63, %v6652_v0 }
 0x29b   :  { %v6716_v54 = vpop.f32.mrf.mxu1  ;;  %2473 = vmatmul.mubr.bf16.gmra.mxu1 %v6053_v42  ;;  %v2571_v56 = vpop.f32.mrf.mxu0  ;;  %2762 = vmatmul.mubr.bf16.gmra.mxu0 %v6056_v43  ;;  %v2235_v42 = vadd.f32 %v6650_v63, %v6645_v61 }
 0x29c   :  { %v6718_v39 = vadd.f32 %v2571_v56, %v2219_v52  ;;  %2480 = vmatprep.mubr.bf16.mxu1 %v6062_v44  ;;  %2769 = vmatprep.mubr.bf16.mxu0 %v6065_v46  ;;  %v6072_v56 = vld [vmem:[#allocation2 + $0x508] ss:$20 sps:$4 sm:$0xff]  }
 0x29d   :  { %v2284_v59 = vpop.f32.mrf.mxu1  ;;  %v2573_v57 = vpop.f32.mrf.mxu0 }
 0x29e   :  { %v6076_v59 = vld [vmem:[#allocation2 + $0x38] ss:$20 sps:$4 sm:$0xff]   ;;  %v6079_v57 = vld [vmem:[#allocation2 + $0x534] ss:$20 sps:$4 sm:$0xff]  }
 0x29f   :  { %v6722_v62 = vpop.f32.mrf.mxu1  ;;  %v2574_v1 = vpop.f32.mrf.mxu0 }
 0x2a0   :  { %v6724_v4 = vadd.f32 %v2574_v1, %v2222_v60  ;;  %v6080_v60 = vld [vmem:[#allocation2 + $0x60] ss:$20 sps:$4 sm:$0xff]  }
 0x2a1   :  { %v2287_v9 = vpop.f32.mrf.mxu1  ;;  %v2576_v12 = vpop.f32.mrf.mxu0 }
 0x2a3   :  { %v6728_v17 = vpop.f32.mrf.mxu1  ;;  %2481 = vmatmul.mubr.bf16.gmra.mxu1 %v6060_v45  ;;  %v2579_v20 = vpop.f32.mrf.mxu0  ;;  %2770 = vmatmul.mubr.bf16.gmra.mxu0 %v6063_v2  ;;  %v2243_v2 = vadd.f32 %v6650_v63, %v6656_v10 }
 0x2a4   :  { %v6730_v47 = vadd.f32 %v2579_v20, %v2227_v15  ;;  %2488 = vmatprep.mubr.bf16.mxu1 %v6068_v6  ;;  %2777 = vmatprep.mubr.bf16.mxu0 %v6071_v8  ;;  %v2246_v15 = vadd.f32 %v6650_v63, %v6662_v18 }
 0x2a5   :  { %v2292_v3 = vpop.f32.mrf.mxu1  ;;  %v2581_v22 = vpop.f32.mrf.mxu0 }
 0x2a6   :  { %v6077_v22 = vld [vmem:[#allocation2 + $0x530] ss:$20 sps:$4 sm:$0xff]  }
 0x2a7   :  { %v6734_v25 = vpop.f32.mrf.mxu1  ;;  %v2582_v26 = vpop.f32.mrf.mxu0 }
 0x2a8   :  { %v6736_v53 = vadd.f32 %v2582_v26, %v2230_v24  ;;  %v6081_v24 = vld [vmem:[#allocation2 + $0x88] ss:$20 sps:$4 sm:$0xff]  }
 0x2a9   :  { %v2295_v36 = vpop.f32.mrf.mxu1  ;;  %v2584_v41 = vpop.f32.mrf.mxu0  ;;  %v6084_v26 = vld [vmem:[#allocation2 + $0x55c] ss:$20 sps:$4 sm:$0xff]  }
 0x2ab   :  { %v6740_v43 = vpop.f32.mrf.mxu1  ;;  %2489 = vmatmul.mubr.bf16.gmra.mxu1 %v6066_v27  ;;  %v2587_v44 = vpop.f32.mrf.mxu0  ;;  %2778 = vmatmul.mubr.bf16.gmra.mxu0 %v6069_v32  ;;  %v6085_v27 = vld [vmem:[#allocation2 + $0xb0] ss:$20 sps:$4 sm:$0xff]  }
 0x2ac   :  { %v6742_v55 = vadd.f32 %v2587_v44, %v2235_v42  ;;  %2785 = vmatprep.mubr.bf16.mxu0 %v6074_v33  ;;  %5507 = vmatprep.mubr.bf16.mxu1 %v6075_v34  ;;  %v2251_v34 = vadd.f32 %v6650_v63, %v6668_v31 }
 0x2ad   :  { %v2300_v46 = vpop.f32.mrf.mxu1  ;;  %v2589_v48 = vpop.f32.mrf.mxu0 }
 0x2ae   :  { %v2254_v46 = vadd.f32 %v6650_v63, %v6674_v38 }
 0x2af   :  { %v6746_v51 = vpop.f32.mrf.mxu1  ;;  %v2590_v52 = vpop.f32.mrf.mxu0 }
 0x2b0   :  { %v6748_v61 = vadd.f32 %v2590_v52, %v2238_v49  ;;  %v6082_v52 = vld [vmem:[#allocation2 + $0x558] ss:$20 sps:$4 sm:$0xff]  }
 0x2b1   :  { %v2303_v1 = vpop.f32.mrf.mxu1  ;;  %v2592_v45 = vpop.f32.mrf.mxu0 }
 0x2b2   :  { %v6135_v45 = vld [vmem:[#allocation8 + $0x18] sm:$0xff]  }
 0x2b3   :  { %v6752_v6 = vpop.f32.mrf.mxu1  ;;  %v2595_v8 = vpop.f32.mrf.mxu0  ;;  %2786 = vmatmul.mubr.bf16.gmra.mxu0 %v6072_v56  ;;  %5508 = vmatmul.mubr.bf16.vlgmr.msra.gmra.mxu1 %v6076_v59  ;;  %v6086_v56 = vld [vmem:[#allocation2 + $0xd8] ss:$20 sps:$4 sm:$0xff]  }
 0x2b4   :  { %v6754_v0 = vadd.f32 %v2595_v8, %v2243_v2  ;;  %2793 = vmatprep.mubr.bf16.mxu0 %v6079_v57  ;;  %5511 = vmatprep.mubr.bf16.mxu1 %v6080_v60  ;;  %v6090_v59 = vld [vmem:[#allocation2 + $0x584] ss:$20 sps:$4 sm:$0xff]   ;;  %v6091_v57 = vld [vmem:[#allocation2 + $0x100] ss:$20 sps:$4 sm:$0xff]   ;;  %v2259_v2 = vadd.f32 %v6650_v63, %v6680_v50 }
 0x2b5   :  { %v2308_v9 = vpop.f32.mrf.mxu1  ;;  %v2597_v12 = vpop.f32.mrf.mxu0  ;;  %5595 = vmatprep.subr.bf16.mxu0 %v6135_v45  ;;  %v6088_v50 = vld [vmem:[#allocation2 + $0x580] ss:$20 sps:$4 sm:$0xff]  }
 0x2b6   :  { %5596 = vmatpush3.bf16.msra.mxu0 %v6135_v45  ;;  %v6100_v45 = vld [vmem:[#allocation2 + $0x5d4] ss:$20 sps:$4 sm:$0xff]  }
 0x2b7   :  { %v6758_v20 = vpop.f32.mrf.mxu1  ;;  %v2598_v3 = vpop.f32.mrf.mxu0 }
 0x2b8   :  { %v6760_v10 = vadd.f32 %v2598_v3, %v2246_v15  ;;  %v2262_v3 = vadd.f32 %v6650_v63, %v6686_v58 }
 0x2b9   :  { %v2311_v32 = vpop.f32.mrf.mxu1  ;;  %v2600_v33 = vpop.f32.mrf.mxu0 }
 0x2ba   :  { %v6095_v32 = vld [vmem:[#allocation2 + $0x5ac] ss:$20 sps:$4 sm:$0xff]   ;;  %v6096_v33 = vld [vmem:[#allocation2 + $0x150] ss:$20 sps:$4 sm:$0xff]  }
 0x2bb   :  { %v6764_v36 = vpop.f32.mrf.mxu1  ;;  %v2603_v41 = vpop.f32.mrf.mxu0  ;;  %2794 = vmatmul.mubr.bf16.gmra.mxu0 %v6077_v22  ;;  %5512 = vmatmul.mubr.bf16.gmra.mxu1 %v6081_v24 }
 0x2bc   :  { %v6766_v18 = vadd.f32 %v2603_v41, %v2251_v34  ;;  %2801 = vmatprep.mubr.bf16.mxu0 %v6084_v26  ;;  %5515 = vmatprep.mubr.bf16.mxu1 %v6085_v27  ;;  %v6092_v26 = vld [vmem:[#allocation2 + $0x128] ss:$20 sps:$4 sm:$0xff]  }
 0x2bd   :  { %v2316_v42 = vpop.f32.mrf.mxu1  ;;  %v2605_v44 = vpop.f32.mrf.mxu0 }
 0x2be   :  { %v2267_v42 = vadd.f32 %v6650_v63, %v6692_v7 }
 0x2bf   :  { %v6770_v48 = vpop.f32.mrf.mxu1  ;;  %v2606_v49 = vpop.f32.mrf.mxu0 }
 0x2c0   :  { %v6772_v31 = vadd.f32 %v2606_v49, %v2254_v46 }
 0x2c1   :  { %v2319_v60 = vpop.f32.mrf.mxu1  ;;  %v2608_v1 = vpop.f32.mrf.mxu0 }
 0x2c2   :  { %v6093_v60 = vld [vmem:[#allocation2 + $0x5a8] ss:$20 sps:$4 sm:$0xff]   ;;  %v6097_v1 = vld [vmem:[#allocation2 + $0x178] ss:$20 sps:$4 sm:$0xff]  }
 0x2c3   :  { %v6776_v8 = vpop.f32.mrf.mxu1  ;;  %v2611_v9 = vpop.f32.mrf.mxu0  ;;  %2802 = vmatmul.mubr.bf16.gmra.mxu0 %v6082_v52  ;;  %5516 = vmatmul.mubr.bf16.gmra.mxu1 %v6086_v56  ;;  %v2270_v56 = vadd.f32 %v6650_v63, %v6698_v16 }
 0x2c4   :  { %v6778_v38 = vadd.f32 %v2611_v9, %v2259_v2  ;;  %2809 = vmatprep.mubr.bf16.mxu0 %v6090_v59  ;;  %5519 = vmatprep.mubr.bf16.mxu1 %v6091_v57  ;;  %v6101_v2 = vld [vmem:[#allocation2 + $0x1a0] ss:$20 sps:$4 sm:$0xff]  }
 0x2c5   :  { %v2324_v12 = vpop.f32.mrf.mxu1  ;;  %v2613_v15 = vpop.f32.mrf.mxu0 }
 0x2c6   :  { %v2275_v15 = vadd.f32 %v6650_v63, %v6704_v29 }
 0x2c7   :  { %v6782_v22 = vpop.f32.mrf.mxu1  ;;  %v2614_v24 = vpop.f32.mrf.mxu0 }
 0x2c8   :  { %v6784_v27 = vadd.f32 %v2614_v24, %v2262_v3 }
 0x2c9   :  { %v2327_v34 = vpop.f32.mrf.mxu1  ;;  %v2616_v41 = vpop.f32.mrf.mxu0 }
 0x2ca   :  { %v6098_v41 = vld [vmem:[#allocation2 + $0x5d0] ss:$20 sps:$4 sm:$0xff]  }
 0x2cb   :  { %v6788_v44 = vpop.f32.mrf.mxu1  ;;  %v2619_v46 = vpop.f32.mrf.mxu0  ;;  %2810 = vmatmul.mubr.bf16.gmra.mxu0 %v6088_v50  ;;  %5520 = vmatmul.mubr.bf16.gmra.mxu1 %v6092_v26 }
 0x2cc   :  { %v6790_v58 = vadd.f32 %v2619_v46, %v2267_v42  ;;  %2817 = vmatprep.mubr.bf16.mxu0 %v6095_v32  ;;  %5523 = vmatprep.mubr.bf16.mxu1 %v6096_v33  ;;  %v2278_v32 = vadd.f32 %v6650_v63, %v6710_v40  ;;  %v6102_v42 = vld [vmem:[#allocation2 + $0x1c8] ss:$20 sps:$4 sm:$0xff]  }
 0x2cd   :  { %v2332_v49 = vpop.f32.mrf.mxu1  ;;  %v2621_v52 = vpop.f32.mrf.mxu0  ;;  %v6105_v46 = vld [vmem:[#allocation2 + $0x5fc] ss:$20 sps:$4 sm:$0xff]  }
 0x2ce   :  { %v6106_v49 = vld [vmem:[#allocation2 + $0x1f0] ss:$20 sps:$4 sm:$0xff]  }
 0x2cf   :  { %v6794_v59 = vpop.f32.mrf.mxu1  ;;  %v2622_v57 = vpop.f32.mrf.mxu0 }
 0x2d0   :  { %v6796_v7 = vadd.f32 %v2622_v57, %v2270_v56  ;;  %v2283_v57 = vadd.f32 %v6650_v63, %v6716_v54 }
 0x2d1   :  { %v2335_v9 = vpop.f32.mrf.mxu1  ;;  %v2624_v12 = vpop.f32.mrf.mxu0 }
 0x2d2   :  { %v2286_v9 = vadd.f32 %v6650_v63, %v6722_v62 }
 0x2d3   :  { %v6800_v3 = vpop.f32.mrf.mxu1  ;;  %v2627_v24 = vpop.f32.mrf.mxu0  ;;  %2818 = vmatmul.mubr.bf16.gmra.mxu0 %v6093_v60  ;;  %5524 = vmatmul.mubr.bf16.gmra.mxu1 %v6097_v1 }
 0x2d4   :  { %v6802_v16 = vadd.f32 %v2627_v24, %v2275_v15  ;;  %2825 = vmatprep.mubr.bf16.mxu0 %v6100_v45  ;;  %5527 = vmatprep.mubr.bf16.mxu1 %v6101_v2  ;;  %v6103_v24 = vld [vmem:[#allocation2 + $0x5f8] ss:$20 sps:$4 sm:$0xff]  }
 0x2d5   :  { %v2340_v50 = vpop.f32.mrf.mxu1  ;;  %v2629_v26 = vpop.f32.mrf.mxu0 }
 0x2d6   :  { %v6107_v50 = vld [vmem:[#allocation2 + $0x218] ss:$20 sps:$4 sm:$0xff]  }
 0x2d7   :  { %v6806_v33 = vpop.f32.mrf.mxu1  ;;  %v2630_v34 = vpop.f32.mrf.mxu0  ;;  %v6110_v26 = vld [vmem:[#allocation2 + $0x624] ss:$20 sps:$4 sm:$0xff]  }
 0x2d8   :  { %v6808_v29 = vadd.f32 %v2630_v34, %v2278_v32  ;;  %v6111_v32 = vld [vmem:[#allocation2 + $0x240] ss:$20 sps:$4 sm:$0xff]  }
 0x2d9   :  { %v2343_v52 = vpop.f32.mrf.mxu1  ;;  %v2632_v56 = vpop.f32.mrf.mxu0 }
 0x2db   :  { %v6812_v60 = vpop.f32.mrf.mxu1  ;;  %v2635_v1 = vpop.f32.mrf.mxu0  ;;  %2826 = vmatmul.mubr.bf16.gmra.mxu0 %v6098_v41  ;;  %5528 = vmatmul.mubr.bf16.gmra.mxu1 %v6102_v42  ;;  %v2291_v42 = vadd.f32 %v6650_v63, %v6728_v17 }
 0x2dc   :  { %v6814_v40 = vadd.f32 %v2635_v1, %v2283_v57  ;;  %2833 = vmatprep.mubr.bf16.mxu0 %v6105_v46  ;;  %5531 = vmatprep.mubr.bf16.mxu1 %v6106_v49  ;;  %v2294_v57 = vadd.f32 %v6650_v63, %v6734_v25 }
 0x2dd   :  { %v2348_v45 = vpop.f32.mrf.mxu1  ;;  %v2637_v2 = vpop.f32.mrf.mxu0 }
 0x2de   :  { %v6108_v2 = vld [vmem:[#allocation2 + $0x620] ss:$20 sps:$4 sm:$0xff]  }
 0x2df   :  { %v6818_v12 = vpop.f32.mrf.mxu1  ;;  %v2638_v15 = vpop.f32.mrf.mxu0 }
 0x2e0   :  { %v6820_v54 = vadd.f32 %v2638_v15, %v2286_v9  ;;  %v6112_v9 = vld [vmem:[#allocation2 + $0x268] ss:$20 sps:$4 sm:$0xff]   ;;  %v6114_v15 = vld [vmem:[#allocation2 + $0x290] ss:$20 sps:$4 sm:$0xff]  }
 0x2e1   :  { %v2351_v34 = vpop.f32.mrf.mxu1  ;;  %v2640_v41 = vpop.f32.mrf.mxu0 }
 0x2e3   :  { %v6824_v46 = vpop.f32.mrf.mxu1  ;;  %v2643_v49 = vpop.f32.mrf.mxu0  ;;  %2834 = vmatmul.mubr.bf16.gmra.mxu0 %v6103_v24  ;;  %5532 = vmatmul.mubr.bf16.gmra.mxu1 %v6107_v50  ;;  %v6140_v50 = vld [vmem:[#allocation8 + $0x10] sm:$0xff]  }
 0x2e4   :  { %v6826_v62 = vadd.f32 %v2643_v49, %v2291_v42  ;;  %2841 = vmatprep.mubr.bf16.mxu0 %v6110_v26  ;;  %5535 = vmatprep.mubr.bf16.mxu1 %v6111_v32  ;;  %v2299_v26 = vadd.f32 %v6650_v63, %v6740_v43 }
 0x2e5   :  { %v2356_v52 = vpop.f32.mrf.mxu1  ;;  %v2645_v56 = vpop.f32.mrf.mxu0  ;;  %5597 = vmatprep.subr.bf16.mxu0 %v6140_v50 }
 0x2e6   :  { %5598 = vmatpush3.bf16.msra.mxu0 %v6140_v50  ;;  %v2302_v52 = vadd.f32 %v6650_v63, %v6746_v51 }
 0x2e7   :  { %v6830_v1 = vpop.f32.mrf.mxu1  ;;  %v2646_v45 = vpop.f32.mrf.mxu0 }
 0x2e8   :  { %v6832_v17 = vadd.f32 %v2646_v45, %v2294_v57  ;;  %v6115_v45 = vld [vmem:[#allocation2 + $0x2b8] ss:$20 sps:$4 sm:$0xff]  }
 0x2e9   :  { %v2359_v34 = vpop.f32.mrf.mxu1  ;;  %v2648_v24 = vpop.f32.mrf.mxu0 }
 0x2ea   :  { %7869 = vst [vmem:[#allocation15_spill] sm:$0xff] %v6832_v17  ;;  %v6116_v34 = vld [vmem:[#allocation2 + $0x2e0] ss:$20 sps:$4 sm:$0xff]  }
 0x2eb   :  { %v6836_v32 = vpop.f32.mrf.mxu1  ;;  %v2651_v41 = vpop.f32.mrf.mxu0  ;;  %2842 = vmatmul.mubr.bf16.gmra.mxu0 %v6108_v2  ;;  %5536 = vmatmul.mubr.bf16.gmra.mxu1 %v6112_v9  ;;  %v2307_v9 = vadd.f32 %v6650_v63, %v6752_v6  ;;  %v6118_v6 = vld [vmem:[#allocation2 + $0x330] ss:$20 sps:$4 sm:$0xff]  }
 0x2ec   :  { %v6838_v25 = vadd.f32 %v2651_v41, %v2299_v26  ;;  %5539 = vmatprep.mubr.bf16.mxu1 %v6114_v15 }
 0x2ed   :  { %v2364_v42 = vpop.f32.mrf.mxu1  ;;  %v2653_v49 = vpop.f32.mrf.mxu0 }
 0x2ee   :  { %v2310_v42 = vadd.f32 %v6650_v63, %v6758_v20  ;;  %v6142_v20 = vld [vmem:[#allocation8] sm:$0xff]  }
 0x2ef   :  { %v6842_v56 = vpop.f32.mrf.mxu1  ;;  %v2654_v57 = vpop.f32.mrf.mxu0 }
 0x2f0   :  { %v6844_v43 = vadd.f32 %v2654_v57, %v2302_v52  ;;  %v6117_v57 = vld [vmem:[#allocation2 + $0x308] ss:$20 sps:$4 sm:$0xff]  }
 0x2f1   :  { %v2367_v24 = vpop.f32.mrf.mxu1  ;;  %v2656_v2 = vpop.f32.mrf.mxu0 }
 0x2f2   :  { %7870 = vst [vmem:[#allocation16_spill] sm:$0xff] %v6844_v43  ;;  %v6141_v24 = vld [vmem:[#allocation8 + $0x8] sm:$0xff]  }
 0x2f3   :  { %v6848_v15 = vpop.f32.mrf.mxu1  ;;  %v2659_v26 = vpop.f32.mrf.mxu0  ;;  %5540 = vmatmul.mubr.bf16.gmra.mxu1 %v6115_v45  ;;  %5599 = vmatprep.subr.bf16.mxu0 %v6141_v24  ;;  %v2315_v45 = vadd.f32 %v6650_v63, %v6764_v36  ;;  %v6119_v36 = vld [vmem:[#allocation2 + $0x358] ss:$20 sps:$4 sm:$0xff]  }
 0x2f4   :  { %v6850_v50 = vadd.f32 %v2659_v26, %v2307_v9  ;;  %5543 = vmatprep.mubr.bf16.mxu1 %v6116_v34  ;;  %5600 = vmatpush3.bf16.msra.mxu0 %v6141_v24 }
 0x2f5   :  { %v2372_v51 = vpop.f32.mrf.mxu1  ;;  %v2661_v41 = vpop.f32.mrf.mxu0  ;;  %5601 = vmatprep.subr.bf16.mxu0 %v6142_v20 }
 0x2f6   :  { %7871 = vst [vmem:[#allocation17_spill] sm:$0xff] %v6850_v50 }
 0x2f7   :  { %v6854_v49 = vpop.f32.mrf.mxu1  ;;  %v2662_v52 = vpop.f32.mrf.mxu0 }
 0x2f8   :  { %v6856_v2 = vadd.f32 %v2662_v52, %v2310_v42  ;;  %5602 = vmatpush3.bf16.msra.mxu0 %v6142_v20  ;;  %v7874_v52 = vmov 0  }
 0x2f9   :  { %v2375_v35 = vpop.f32.mrf.mxu1  ;;  %v2664_v17 = vpop.f32.mrf.mxu0  ;;  %4140 = vmatprep.subr.bf16.mxu0 %v7874_v52  ;;  %v2326_v52 = vadd.f32 %v6650_v63, %v6782_v22 }
 0x2fa   :  { %7872 = vst [vmem:[#allocation18_spill] sm:$0xff] %v6856_v2  ;;  %v2318_v35 = vadd.f32 %v6650_v63, %v6770_v48 }
 0x2fb   :  { %v6860_v34 = vpop.f32.mrf.mxu1  ;;  %v2667_v9 = vpop.f32.mrf.mxu0  ;;  %5544 = vmatmul.mubr.bf16.gmra.mxu1 %v6117_v57  ;;  %v6120_v57 = vld [vmem:[#allocation2 + $0x380] ss:$20 sps:$4 sm:$0xff]  }
 0x2fc   :  { %v6862_v26 = vadd.f32 %v2667_v9, %v2315_v45  ;;  %5547 = vmatprep.mubr.bf16.mxu1 %v6118_v6  ;;  %v2323_v6 = vadd.f32 %v6650_v63, %v6776_v8 }
 0x2fd   :  { %v2380_v51 = vpop.f32.mrf.mxu1  ;;  %v2669_v41 = vpop.f32.mrf.mxu0 }
 0x2fe   :  { %7873 = vst [vmem:[#allocation19_spill] sm:$0xff] %v6862_v26 }
 0x2ff   :  { %v6866_v17 = vpop.f32.mrf.mxu1  ;;  %v2670_v42 = vpop.f32.mrf.mxu0 }
 0x300   :  { %v6869_v24 = vadd.f32 %v2670_v42, %v2318_v35 }
 0x301   :  { %v2383_v2 = vpop.f32.mrf.mxu1  ;;  %v2672_v45 = vpop.f32.mrf.mxu0 }
 0x302   :  { %7875 = vst [vmem:[#allocation20_spill] sm:$0xff] %v6869_v24  ;;  %v6121_v2 = vld [vmem:[#allocation2 + $0x3a8] ss:$20 sps:$4 sm:$0xff]   ;;  %v6122_v24 = vld [vmem:[#allocation2 + $0x3d0] ss:$20 sps:$4 sm:$0xff]  }
 0x303   :  { %v6873_v9 = vpop.f32.mrf.mxu1  ;;  %v2675_v51 = vpop.f32.mrf.mxu0  ;;  %5548 = vmatmul.mubr.bf16.gmra.mxu1 %v6119_v36  ;;  %v2331_v36 = vadd.f32 %v6650_v63, %v6788_v44 }
 0x304   :  { %v6875_v48 = vadd.f32 %v2675_v51, %v2323_v6  ;;  %5551 = vmatprep.mubr.bf16.mxu1 %v6120_v57 }
 0x305   :  { %v2388_v20 = vpop.f32.mrf.mxu1  ;;  %v2677_v41 = vpop.f32.mrf.mxu0 }
 0x306   :  { %7876 = vst [vmem:[#allocation21_spill] sm:$0xff] %v6875_v48  ;;  %v2334_v41 = vadd.f32 %v6650_v63, %v6794_v59 }
 0x307   :  { %v6879_v35 = vpop.f32.mrf.mxu1  ;;  %v2678_v42 = vpop.f32.mrf.mxu0 }
 0x308   :  { %v6881_v45 = vadd.f32 %v2678_v42, %v2326_v52 }
 0x309   :  { %v2391_v8 = vpop.f32.mrf.mxu1  ;;  %v2680_v50 = vpop.f32.mrf.mxu0 }
 0x30a   :  { %7877 = vst [vmem:[#allocation22_spill] sm:$0xff] %v6881_v45  ;;  %v6123_v8 = vld [vmem:[#allocation2 + $0x3f8] ss:$20 sps:$4 sm:$0xff]   ;;  %v6125_v45 = vld [vmem:[#allocation2 + $0x420] ss:$20 sps:$4 sm:$0xff]  }
 0x30b   :  { %v6885_v6 = vpop.f32.mrf.mxu1  ;;  %v2683_v57 = vpop.f32.mrf.mxu0  ;;  %5552 = vmatmul.mubr.bf16.gmra.mxu1 %v6121_v2  ;;  %v2339_v2 = vadd.f32 %v6650_v63, %v6800_v3 }
 0x30c   :  { %v6887_v51 = vadd.f32 %v2683_v57, %v2331_v36  ;;  %5555 = vmatprep.mubr.bf16.mxu1 %v6122_v24 }
 0x30d   :  { %v2396_v22 = vpop.f32.mrf.mxu1  ;;  %v2685_v20 = vpop.f32.mrf.mxu0 }
 0x30e   :  { %7878 = vst [vmem:[#allocation23_spill] sm:$0xff] %v6887_v51  ;;  %v2342_v20 = vadd.f32 %v6650_v63, %v6806_v33 }
 0x30f   :  { %v6891_v52 = vpop.f32.mrf.mxu1  ;;  %v2686_v42 = vpop.f32.mrf.mxu0 }
 0x310   :  { %v6893_v50 = vadd.f32 %v2686_v42, %v2334_v41 }
 0x311   :  { %v2399_v44 = vpop.f32.mrf.mxu1  ;;  %v2688_v48 = vpop.f32.mrf.mxu0 }
 0x312   :  { %7879 = vst [vmem:[#allocation24_spill] sm:$0xff] %v6893_v50  ;;  %v6126_v44 = vld [vmem:[#allocation2 + $0x448] ss:$20 sps:$4 sm:$0xff]   ;;  %v6127_v50 = vld [vmem:[#allocation2 + $0x470] ss:$20 sps:$4 sm:$0xff]  }
 0x313   :  { %v6897_v36 = vpop.f32.mrf.mxu1  ;;  %v2691_v24 = vpop.f32.mrf.mxu0  ;;  %5556 = vmatmul.mubr.bf16.gmra.mxu1 %v6123_v8  ;;  %v2347_v8 = vadd.f32 %v6650_v63, %v6812_v60 }
 0x314   :  { %v6899_v57 = vadd.f32 %v2691_v24, %v2339_v2  ;;  %5559 = vmatprep.mubr.bf16.mxu1 %v6125_v45 }
 0x315   :  { %v2404_v59 = vpop.f32.mrf.mxu1  ;;  %v2693_v22 = vpop.f32.mrf.mxu0 }
 0x316   :  { %7880 = vst [vmem:[#allocation25_spill] sm:$0xff] %v6899_v57  ;;  %v2350_v22 = vadd.f32 %v6650_v63, %v6818_v12 }
 0x317   :  { %v6903_v41 = vpop.f32.mrf.mxu1  ;;  %v2694_v42 = vpop.f32.mrf.mxu0 }
 0x318   :  { %v6905_v48 = vadd.f32 %v2694_v42, %v2342_v20 }
 0x319   :  { %v2407_v3 = vpop.f32.mrf.mxu1  ;;  %v2696_v51 = vpop.f32.mrf.mxu0 }
 0x31a   :  { %7881 = vst [vmem:[#allocation26_spill] sm:$0xff] %v6905_v48  ;;  %v6128_v3 = vld [vmem:[#allocation2 + $0x498] ss:$20 sps:$4 sm:$0xff]   ;;  %v6129_v48 = vld [vmem:[#allocation2 + $0x4c0] ss:$20 sps:$4 sm:$0xff]  }
 0x31b   :  { %v6909_v2 = vpop.f32.mrf.mxu1  ;;  %v2699_v45 = vpop.f32.mrf.mxu0  ;;  %5560 = vmatmul.mubr.bf16.gmra.mxu1 %v6126_v44  ;;  %v2355_v44 = vadd.f32 %v6650_v63, %v6824_v46 }
 0x31c   :  { %v6911_v24 = vadd.f32 %v2699_v45, %v2347_v8  ;;  %5563 = vmatprep.mubr.bf16.mxu1 %v6127_v50 }
 0x31d   :  { %v2412_v33 = vpop.f32.mrf.mxu1  ;;  %v2701_v59 = vpop.f32.mrf.mxu0 }
 0x31e   :  { %7882 = vst [vmem:[#allocation27_spill] sm:$0xff] %v6911_v24  ;;  %v2358_v59 = vadd.f32 %v6650_v63, %v6830_v1 }
 0x31f   :  { %v6915_v20 = vpop.f32.mrf.mxu1  ;;  %v2702_v42 = vpop.f32.mrf.mxu0 }
 0x320   :  { %v6917_v51 = vadd.f32 %v2702_v42, %v2350_v22 }
 0x321   :  { %v2415_v60 = vpop.f32.mrf.mxu1  ;;  %v2704_v57 = vpop.f32.mrf.mxu0 }
 0x322   :  { %7883 = vst [vmem:[#allocation28_spill] sm:$0xff] %v6917_v51  ;;  %v6130_v60 = vld [vmem:[#allocation2 + $0x4e8] ss:$20 sps:$4 sm:$0xff]   ;;  %v6131_v51 = vld [vmem:[#allocation2 + $0x510] ss:$20 sps:$4 sm:$0xff]  }
 0x323   :  { %v6921_v8 = vpop.f32.mrf.mxu1  ;;  %v2707_v50 = vpop.f32.mrf.mxu0  ;;  %5564 = vmatmul.mubr.bf16.gmra.mxu1 %v6128_v3  ;;  %v2363_v3 = vadd.f32 %v6650_v63, %v6836_v32 }
 0x324   :  { %v6923_v45 = vadd.f32 %v2707_v50, %v2355_v44  ;;  %5567 = vmatprep.mubr.bf16.mxu1 %v6129_v48 }
 0x325   :  { %v2420_v12 = vpop.f32.mrf.mxu1  ;;  %v2709_v33 = vpop.f32.mrf.mxu0 }
 0x326   :  { %7884 = vst [vmem:[#allocation29_spill] sm:$0xff] %v6923_v45  ;;  %v2366_v33 = vadd.f32 %v6650_v63, %v6842_v56 }
 0x327   :  { %v6927_v22 = vpop.f32.mrf.mxu1  ;;  %v2710_v42 = vpop.f32.mrf.mxu0 }
 0x328   :  { %v6929_v57 = vadd.f32 %v2710_v42, %v2358_v59 }
 0x329   :  { %v2423_v46 = vpop.f32.mrf.mxu1  ;;  %v2712_v24 = vpop.f32.mrf.mxu0 }
 0x32a   :  { %7885 = vst [vmem:[#allocation30_spill] sm:$0xff] %v6929_v57  ;;  %v6132_v46 = vld [vmem:[#allocation2 + $0x538] ss:$20 sps:$4 sm:$0xff]   ;;  %v6133_v57 = vld [vmem:[#allocation2 + $0x560] ss:$20 sps:$4 sm:$0xff]  }
 0x32b   :  { %v6933_v44 = vpop.f32.mrf.mxu1  ;;  %v2715_v48 = vpop.f32.mrf.mxu0  ;;  %5568 = vmatmul.mubr.bf16.gmra.mxu1 %v6130_v60  ;;  %v2371_v60 = vadd.f32 %v6650_v63, %v6848_v15 }
 0x32c   :  { %v6935_v50 = vadd.f32 %v2715_v48, %v2363_v3  ;;  %5571 = vmatprep.mubr.bf16.mxu1 %v6131_v51 }
 0x32d   :  { %v2428_v1 = vpop.f32.mrf.mxu1  ;;  %v2717_v12 = vpop.f32.mrf.mxu0 }
 0x32e   :  { %7886 = vst [vmem:[#allocation31_spill] sm:$0xff] %v6935_v50  ;;  %v2374_v12 = vadd.f32 %v6650_v63, %v6854_v49 }
 0x32f   :  { %v6939_v59 = vpop.f32.mrf.mxu1  ;;  %v2718_v42 = vpop.f32.mrf.mxu0 }
 0x330   :  { %v6941_v24 = vadd.f32 %v2718_v42, %v2366_v33 }
 0x331   :  { %v2431_v32 = vpop.f32.mrf.mxu1  ;;  %v2720_v45 = vpop.f32.mrf.mxu0 }
 0x332   :  { %7887 = vst [vmem:[#allocation32_spill] sm:$0xff] %v6941_v24  ;;  %v6134_v32 = vld [vmem:[#allocation2 + $0x588] ss:$20 sps:$4 sm:$0xff]   ;;  %v6136_v24 = vld [vmem:[#allocation2 + $0x5b0] ss:$20 sps:$4 sm:$0xff]  }
 0x333   :  { %v6945_v3 = vpop.f32.mrf.mxu1  ;;  %v2723_v51 = vpop.f32.mrf.mxu0  ;;  %5572 = vmatmul.mubr.bf16.gmra.mxu1 %v6132_v46  ;;  %v2379_v46 = vadd.f32 %v6650_v63, %v6860_v34 }
 0x334   :  { %v6947_v48 = vadd.f32 %v2723_v51, %v2371_v60  ;;  %5575 = vmatprep.mubr.bf16.mxu1 %v6133_v57 }
 0x335   :  { %v2436_v56 = vpop.f32.mrf.mxu1  ;;  %v2725_v1 = vpop.f32.mrf.mxu0 }
 0x336   :  { %7888 = vst [vmem:[#allocation33_spill] sm:$0xff] %v6947_v48  ;;  %v2382_v1 = vadd.f32 %v6650_v63, %v6866_v17 }
 0x337   :  { %v6951_v33 = vpop.f32.mrf.mxu1  ;;  %v2726_v42 = vpop.f32.mrf.mxu0 }
 0x338   :  { %v6953_v45 = vadd.f32 %v2726_v42, %v2374_v12 }
 0x339   :  { %v2439_v15 = vpop.f32.mrf.mxu1  ;;  %v2728_v50 = vpop.f32.mrf.mxu0 }
 0x33a   :  { %7889 = vst [vmem:[#allocation34_spill] sm:$0xff] %v6953_v45  ;;  %v6137_v15 = vld [vmem:[#allocation2 + $0x5d8] ss:$20 sps:$4 sm:$0xff]   ;;  %v6138_v45 = vld [vmem:[#allocation2 + $0x600] ss:$20 sps:$4 sm:$0xff]  }
 0x33b   :  { %v6957_v60 = vpop.f32.mrf.mxu1  ;;  %v2731_v57 = vpop.f32.mrf.mxu0  ;;  %5576 = vmatmul.mubr.bf16.gmra.mxu1 %v6134_v32  ;;  %v2387_v32 = vadd.f32 %v6650_v63, %v6873_v9 }
 0x33c   :  { %v6959_v51 = vadd.f32 %v2731_v57, %v2379_v46  ;;  %5579 = vmatprep.mubr.bf16.mxu1 %v6136_v24 }
 0x33d   :  { %v2444_v49 = vpop.f32.mrf.mxu1  ;;  %v2733_v56 = vpop.f32.mrf.mxu0 }
 0x33e   :  { %7890 = vst [vmem:[#allocation35_spill] sm:$0xff] %v6959_v51  ;;  %v2390_v56 = vadd.f32 %v6650_v63, %v6879_v35  ;;  %v6144_v35 = vld [vmem:[#allocation2 + $0x4] ss:$20 sps:$4 sm:$0xff]  }
 0x33f   :  { %v6963_v12 = vpop.f32.mrf.mxu1  ;;  %v2734_v42 = vpop.f32.mrf.mxu0 }
 0x340   :  { %v6965_v50 = vadd.f32 %v2734_v42, %v2382_v1 }
 0x341   :  { %v2447_v34 = vpop.f32.mrf.mxu1  ;;  %v2736_v48 = vpop.f32.mrf.mxu0 }
 0x342   :  { %7891 = vst [vmem:[#allocation36_spill] sm:$0xff] %v6965_v50  ;;  %v6139_v34 = vld [vmem:[#allocation2 + $0x628] ss:$20 sps:$4 sm:$0xff]  }
 0x343   :  { %v6969_v46 = vpop.f32.mrf.mxu1  ;;  %v2739_v24 = vpop.f32.mrf.mxu0  ;;  %5580 = vmatmul.mubr.bf16.gmra.mxu1 %v6137_v15  ;;  %v6982_v15 = vld [vmem:[%s7863_s3] ss:$0 sm:$0xff] }
 0x344   :  { %v6971_v57 = vadd.f32 %v2739_v24, %v2387_v32  ;;  %5583 = vmatprep.mubr.bf16.mxu1 %v6138_v45  ;;  %v2395_v45 = vadd.f32 %v6982_v15, %v6885_v6 }
 0x345   :  { %v2452_v17 = vpop.f32.mrf.mxu1  ;;  %v2741_v49 = vpop.f32.mrf.mxu0 }
 0x346   :  { %7892 = vst [vmem:[#allocation37_spill] sm:$0xff] %v6971_v57  ;;  %v2403_v57 = vadd.f32 %v6982_v15, %v6897_v36  ;;  %v2411_v36 = vadd.f32 %v6982_v15, %v6909_v2  ;;  %v2419_v2 = vadd.f32 %v6982_v15, %v6921_v8  ;;  %v2427_v8 = vadd.f32 %v6982_v15, %v6933_v44 }
 0x347   :  { %v6975_v1 = vpop.f32.mrf.mxu1  ;;  %v2742_v42 = vpop.f32.mrf.mxu0  ;;  %v2435_v44 = vadd.f32 %v6982_v15, %v6945_v3 }
 0x348   :  { %v6977_v48 = vadd.f32 %v2742_v42, %v2390_v56 }
 0x349   :  { %v2455_v50 = vpop.f32.mrf.mxu1  ;;  %v2744_v9 = vpop.f32.mrf.mxu0 }
 0x34a   :  { %7893 = vst [vmem:[#allocation38_spill] sm:$0xff] %v6977_v48  ;;  %v2398_v50 = vadd.f32 %v6982_v15, %v6891_v52  ;;  %v2406_v52 = vadd.f32 %v6982_v15, %v6903_v41  ;;  %v2414_v41 = vadd.f32 %v6982_v15, %v6915_v20  ;;  %v2422_v20 = vadd.f32 %v6982_v15, %v6927_v22 }
 0x34b   :  { %v6986_v32 = vpop.f32.mrf.mxu1  ;;  %v2747_v24 = vpop.f32.mrf.mxu0  ;;  %5584 = vmatmul.mubr.bf16.gmra.mxu1 %v6139_v34  ;;  %v2430_v22 = vadd.f32 %v6982_v15, %v6939_v59 }
 0x34c   :  { %v6988_v63 = vadd.f32 %v2747_v24, %v2395_v45  ;;  %3819 = vmatprep.mubr.bf16.mxu1 %v6144_v35 }
 0x34d   :  { %v2460_v17 = vpop.f32.mrf.mxu1  ;;  %v2749_v49 = vpop.f32.mrf.mxu0 }
 0x34e   :  { %7894 = vst [vmem:[#allocation39_spill] sm:$0xff] %v6988_v63 }
 0x34f   :  { %v6992_v56 = vpop.f32.mrf.mxu1  ;;  %v2750_v42 = vpop.f32.mrf.mxu0 }
 0x350   :  { %v6994_v9 = vadd.f32 %v2750_v42, %v2398_v50 }
 0x351   :  { %v2463_v48 = vpop.f32.mrf.mxu1  ;;  %v2752_v6 = vpop.f32.mrf.mxu0 }
 0x352   :  { %7895 = vst [vmem:[#allocation40_spill] sm:$0xff] %v6994_v9 }
 0x353   :  { %v6998_v34 = vpop.f32.mrf.mxu1  ;;  %v2755_v45 = vpop.f32.mrf.mxu0 }
 0x354   :  { %v7000_v24 = vadd.f32 %v2755_v45, %v2403_v57 }
 0x355   :  { %v2468_v35 = vpop.f32.mrf.mxu1  ;;  %v2757_v17 = vpop.f32.mrf.mxu0 }
 0x356   :  { %7896 = vst [vmem:[#allocation41_spill] sm:$0xff] %v7000_v24 }
 0x357   :  { %v7004_v49 = vpop.f32.mrf.mxu1  ;;  %v2758_v63 = vpop.f32.mrf.mxu0 }
 0x358   :  { %v7006_v50 = vadd.f32 %v2758_v63, %v2406_v52 }
 0x359   :  { %v2471_v48 = vpop.f32.mrf.mxu1  ;;  %v2760_v42 = vpop.f32.mrf.mxu0 }
 0x35a   :  { %7897 = vst [vmem:[#allocation42_spill] sm:$0xff] %v7006_v50 }
 0x35b   :  { %v7010_v6 = vpop.f32.mrf.mxu1  ;;  %v2763_v9 = vpop.f32.mrf.mxu0 }
 0x35c   :  { %v7012_v57 = vadd.f32 %v2763_v9, %v2411_v36 }
 0x35d   :  { %v2476_v45 = vpop.f32.mrf.mxu1  ;;  %v2765_v35 = vpop.f32.mrf.mxu0 }
 0x35e   :  { %7898 = vst [vmem:[#allocation43_spill] sm:$0xff] %v7012_v57 }
 0x35f   :  { %v7016_v17 = vpop.f32.mrf.mxu1  ;;  %v2766_v24 = vpop.f32.mrf.mxu0 }
 0x360   :  { %v7018_v63 = vadd.f32 %v2766_v24, %v2414_v41 }
 0x361   :  { %v2479_v52 = vpop.f32.mrf.mxu1  ;;  %v2768_v48 = vpop.f32.mrf.mxu0 }
 0x362   :  { %7899 = vst [vmem:[#allocation44_spill] sm:$0xff] %v7018_v63 }
 0x363   :  { %v7022_v42 = vpop.f32.mrf.mxu1  ;;  %v2771_v50 = vpop.f32.mrf.mxu0 }
 0x364   :  { %v7024_v9 = vadd.f32 %v2771_v50, %v2419_v2 }
 0x365   :  { %v2484_v36 = vpop.f32.mrf.mxu1  ;;  %v2773_v45 = vpop.f32.mrf.mxu0 }
 0x366   :  { %7900 = vst [vmem:[#allocation45_spill] sm:$0xff] %v7024_v9 }
 0x367   :  { %v7028_v35 = vpop.f32.mrf.mxu1  ;;  %v2774_v57 = vpop.f32.mrf.mxu0 }
 0x368   :  { %v7030_v24 = vadd.f32 %v2774_v57, %v2422_v20 }
 0x369   :  { %v2487_v41 = vpop.f32.mrf.mxu1  ;;  %v2776_v52 = vpop.f32.mrf.mxu0 }
 0x36a   :  { %7901 = vst [vmem:[#allocation46_spill] sm:$0xff] %v7030_v24 }
 0x36b   :  { %v7034_v48 = vpop.f32.mrf.mxu1  ;;  %v2779_v63 = vpop.f32.mrf.mxu0 }
 0x36c   :  { %v7036_v50 = vadd.f32 %v2779_v63, %v2427_v8 }
 0x36d   :  { %v2492_v2 = vpop.f32.mrf.mxu1  ;;  %v2781_v36 = vpop.f32.mrf.mxu0 }
 0x36e   :  { %7902 = vst [vmem:[#allocation47_spill] sm:$0xff] %v7036_v50  ;;  %v2438_v2 = vadd.f32 %v6982_v15, %v6951_v33 }
 0x36f   :  { %v7040_v45 = vpop.f32.mrf.mxu1  ;;  %v2782_v9 = vpop.f32.mrf.mxu0 }
 0x370   :  { %v7042_v57 = vadd.f32 %v2782_v9, %v2430_v22 }
 0x371   :  { %v2495_v20 = vpop.f32.mrf.mxu1  ;;  %v2784_v41 = vpop.f32.mrf.mxu0 }
 0x372   :  { %7903 = vst [vmem:[#allocation48_spill] sm:$0xff] %v7042_v57 }
 0x373   :  { %v2787_v52 = vpop.f32.mrf.mxu0  ;;  %v5509_v24 = vpop.f32.mrf.mxu1 }
 0x374   :  { %v7046_v51 = vadd.f32 %v2787_v52, %v2435_v44  ;;  %v2893_v59 = vadd.f32 %v5509_v24, %v6670_v5  ;;  %v2443_v44 = vadd.f32 %v6982_v15, %v6957_v60 }
 0x375   :  { %v2789_v63 = vpop.f32.mrf.mxu0  ;;  %v2884_v8 = vpop.f32.mrf.mxu1 }
 0x376   :  { %7904 = vst [vmem:[#allocation49_spill] sm:$0xff] %v7046_v51  ;;  %v2885_v9 = vadd.f32 %v2884_v8, %v6658_v14  ;;  %v3205_v52 = vmax.f32 %v2893_v59, 0.0 }
 0x377   :  { %v2790_v36 = vpop.f32.mrf.mxu0  ;;  %v5510_v50 = vpop.f32.mrf.mxu1 }
 0x378   :  { %v7052_v22 = vadd.f32 %v2790_v36, %v2438_v2  ;;  %v2896_v20 = vadd.f32 %v5510_v50, %v6676_v11  ;;  %v3203_v5 = vmax.f32 %v2885_v9, 0.0  ;;  %v2446_v11 = vadd.f32 %v6982_v15, %v6963_v12 }
 0x379   :  { %v2792_v3 = vpop.f32.mrf.mxu0  ;;  %v2887_v41 = vpop.f32.mrf.mxu1 }
 0x37a   :  { %v3206_v63 = vmax.f32 %v2896_v20, 0.0  ;;  %v2888_v51 = vadd.f32 %v2887_v41, %v6664_v23  ;;  %v2451_v3 = vadd.f32 %v6982_v15, %v6969_v46 }
 0x37b   :  { %v2795_v33 = vpop.f32.mrf.mxu0  ;;  %v5513_v57 = vpop.f32.mrf.mxu1 }
 0x37c   :  { %v3284_v24 = vpack.c.bf16 %v3206_v63, %v3205_v52  ;;  %v3204_v26 = vmax.f32 %v2888_v51, 0.0  ;;  %v7058_v43 = vadd.f32 %v2795_v33, %v2443_v44  ;;  %v2909_v50 = vadd.f32 %v5513_v57, %v6694_v21 }
 0x37d   :  { %v2797_v14 = vpop.f32.mrf.mxu0  ;;  %v2900_v8 = vpop.f32.mrf.mxu1 }
 0x37e   :  { %v3283_v2 = vpack.c.bf16 %v3204_v26, %v3203_v5  ;;  %v2901_v36 = vadd.f32 %v2900_v8, %v6682_v13  ;;  %v3209_v41 = vmax.f32 %v2909_v50, 0.0  ;;  %v2454_v5 = vadd.f32 %v6982_v15, %v6975_v1 }
 0x37f   :  { %v2798_v60 = vpop.f32.mrf.mxu0  ;;  %v5514_v59 = vpop.f32.mrf.mxu1 }
 0x380   :  { %v7064_v23 = vadd.f32 %v2798_v60, %v2446_v11  ;;  %v2912_v9 = vadd.f32 %v5514_v59, %v6700_v28  ;;  %5603 = vmatprep.mubr.bf16.mxu0 %v3283_v2  ;;  %v3207_v44 = vmax.f32 %v2901_v36, 0.0  ;;  %v2459_v59 = vadd.f32 %v6982_v15, %v6986_v32 }
 0x381   :  { %v2800_v51 = vpop.f32.mrf.mxu0  ;;  %v2903_v20 = vpop.f32.mrf.mxu1  ;;  %5604 = vmatmul.mubr.bf16.vlgmr.msra.gmra.mxu0 %v3284_v24 }
 0x382   :  { %v3210_v12 = vmax.f32 %v2912_v9, 0.0  ;;  %v2904_v21 = vadd.f32 %v2903_v20, %v6688_v19 }
 0x383   :  { %v2803_v26 = vpop.f32.mrf.mxu0  ;;  %v5517_v57 = vpop.f32.mrf.mxu1 }
 0x384   :  { %v3286_v52 = vpack.c.bf16 %v3210_v12, %v3209_v41  ;;  %v3208_v13 = vmax.f32 %v2904_v21, 0.0  ;;  %v7070_v63 = vadd.f32 %v2803_v26, %v2451_v3  ;;  %v2925_v24 = vadd.f32 %v5517_v57, %v6718_v39 }
 0x385   :  { %v2805_v33 = vpop.f32.mrf.mxu0  ;;  %v2916_v28 = vpop.f32.mrf.mxu1  ;;  %v2462_v21 = vadd.f32 %v6982_v15, %v6992_v56 }
 0x386   :  { %v3285_v14 = vpack.c.bf16 %v3208_v13, %v3207_v44  ;;  %v2917_v11 = vadd.f32 %v2916_v28, %v6706_v30  ;;  %v3213_v36 = vmax.f32 %v2925_v24, 0.0 }
 0x387   :  { %v2806_v46 = vpop.f32.mrf.mxu0  ;;  %v5518_v8 = vpop.f32.mrf.mxu1 }
 0x388   :  { %v7076_v19 = vadd.f32 %v2806_v46, %v2454_v5  ;;  %v2928_v50 = vadd.f32 %v5518_v8, %v6724_v4  ;;  %5607 = vmatprep.mubr.bf16.mxu0 %v3285_v14  ;;  %v3211_v20 = vmax.f32 %v2917_v11, 0.0  ;;  %v2467_v5 = vadd.f32 %v6982_v15, %v6998_v34 }
 0x389   :  { %v2808_v2 = vpop.f32.mrf.mxu0  ;;  %v2919_v60 = vpop.f32.mrf.mxu1  ;;  %5608 = vmatmul.mubr.bf16.gmra.mxu0 %v3286_v52 }
 0x38a   :  { %v3214_v1 = vmax.f32 %v2928_v50, 0.0  ;;  %v2920_v39 = vadd.f32 %v2919_v60, %v6712_v37  ;;  %v2470_v60 = vadd.f32 %v6982_v15, %v7004_v49 }
 0x38b   :  { %v2811_v9 = vpop.f32.mrf.mxu0  ;;  %v5521_v51 = vpop.f32.mrf.mxu1 }
 0x38c   :  { %v3288_v3 = vpack.c.bf16 %v3214_v1, %v3213_v36  ;;  %v3212_v30 = vmax.f32 %v2920_v39, 0.0  ;;  %v7082_v41 = vadd.f32 %v2811_v9, %v2459_v59  ;;  %v2941_v26 = vadd.f32 %v5521_v51, %v6742_v55 }
 0x38d   :  { %v2813_v12 = vpop.f32.mrf.mxu0  ;;  %v2932_v4 = vpop.f32.mrf.mxu1 }
 0x38e   :  { %v3287_v57 = vpack.c.bf16 %v3212_v30, %v3211_v20  ;;  %v2933_v52 = vadd.f32 %v2932_v4, %v6730_v47  ;;  %v3217_v24 = vmax.f32 %v2941_v26, 0.0 }
 0x38f   :  { %v2814_v32 = vpop.f32.mrf.mxu0  ;;  %v5522_v44 = vpop.f32.mrf.mxu1 }
 0x390   :  { %v7088_v37 = vadd.f32 %v2814_v32, %v2462_v21  ;;  %v2944_v13 = vadd.f32 %v5522_v44, %v6748_v61  ;;  %5611 = vmatprep.mubr.bf16.mxu0 %v3287_v57  ;;  %v3215_v8 = vmax.f32 %v2933_v52, 0.0  ;;  %v2478_v44 = vadd.f32 %v6982_v15, %v7016_v17 }
 0x391   :  { %v2816_v33 = vpop.f32.mrf.mxu0  ;;  %v2935_v28 = vpop.f32.mrf.mxu1  ;;  %5612 = vmatmul.mubr.bf16.gmra.mxu0 %v3288_v3  ;;  %v2475_v3 = vadd.f32 %v6982_v15, %v7010_v6 }
 0x392   :  { %v3218_v56 = vmax.f32 %v2944_v13, 0.0  ;;  %v2936_v55 = vadd.f32 %v2935_v28, %v6736_v53 }
 0x393   :  { %v2819_v14 = vpop.f32.mrf.mxu0  ;;  %v5525_v46 = vpop.f32.mrf.mxu1 }
 0x394   :  { %v3290_v11 = vpack.c.bf16 %v3218_v56, %v3217_v24  ;;  %v3216_v47 = vmax.f32 %v2936_v55, 0.0  ;;  %v7094_v50 = vadd.f32 %v2819_v14, %v2467_v5  ;;  %v2957_v59 = vadd.f32 %v5525_v46, %v6766_v18 }
 0x395   :  { %v2821_v2 = vpop.f32.mrf.mxu0  ;;  %v2948_v61 = vpop.f32.mrf.mxu1  ;;  %v2483_v55 = vadd.f32 %v6982_v15, %v7022_v42 }
 0x396   :  { %v3289_v36 = vpack.c.bf16 %v3216_v47, %v3215_v8  ;;  %v2949_v39 = vadd.f32 %v2948_v61, %v6754_v0  ;;  %v3221_v30 = vmax.f32 %v2957_v59, 0.0 }
 0x397   :  { %v2822_v34 = vpop.f32.mrf.mxu0  ;;  %v5526_v1 = vpop.f32.mrf.mxu1 }
 0x398   :  { %v7100_v53 = vadd.f32 %v2822_v34, %v2470_v60  ;;  %v2960_v9 = vadd.f32 %v5526_v1, %v6772_v31  ;;  %5615 = vmatprep.mubr.bf16.mxu0 %v3289_v36  ;;  %v3219_v21 = vmax.f32 %v2949_v39, 0.0  ;;  %v2486_v60 = vadd.f32 %v6982_v15, %v7028_v35 }
 0x399   :  { %v2824_v51 = vpop.f32.mrf.mxu0  ;;  %v2951_v20 = vpop.f32.mrf.mxu1  ;;  %5616 = vmatmul.mubr.bf16.gmra.mxu0 %v3290_v11 }
 0x39a   :  { %v3222_v49 = vmax.f32 %v2960_v9, 0.0  ;;  %v2952_v18 = vadd.f32 %v2951_v20, %v6760_v10  ;;  %v2491_v20 = vadd.f32 %v6982_v15, %v7034_v48 }
 0x39b   :  { %v2827_v12 = vpop.f32.mrf.mxu0  ;;  %v5529_v4 = vpop.f32.mrf.mxu1 }
 0x39c   :  { %v3292_v26 = vpack.c.bf16 %v3222_v49, %v3221_v30  ;;  %v3220_v0 = vmax.f32 %v2952_v18, 0.0  ;;  %v7106_v57 = vadd.f32 %v2827_v12, %v2475_v3  ;;  %v2973_v52 = vadd.f32 %v5529_v4, %v6790_v58 }
 0x39d   :  { %v2829_v32 = vpop.f32.mrf.mxu0  ;;  %v2964_v31 = vpop.f32.mrf.mxu1 }
 0x39e   :  { %v3291_v13 = vpack.c.bf16 %v3220_v0, %v3219_v21  ;;  %v2965_v28 = vadd.f32 %v2964_v31, %v6778_v38  ;;  %v3225_v14 = vmax.f32 %v2973_v52, 0.0  ;;  %v7905_v52 = vld [vmem:[#allocation16_spill] sm:$0xff] }
 0x39f   :  { %v2830_v6 = vpop.f32.mrf.mxu0  ;;  %v5530_v33 = vpop.f32.mrf.mxu1 }
 0x3a0   :  { %v7112_v10 = vadd.f32 %v2830_v6, %v2478_v44  ;;  %v2976_v5 = vadd.f32 %v5530_v33, %v6796_v7  ;;  %5619 = vmatprep.mubr.bf16.mxu0 %v3291_v13  ;;  %v3223_v11 = vmax.f32 %v2965_v28, 0.0 }
 0x3a1   :  { %v2832_v24 = vpop.f32.mrf.mxu0  ;;  %v2967_v56 = vpop.f32.mrf.mxu1  ;;  %5620 = vmatmul.mubr.bf16.gmra.mxu0 %v3292_v26  ;;  %v2494_v26 = vadd.f32 %v6982_v15, %v7040_v45 }
 0x3a2   :  { %v3226_v17 = vmax.f32 %v2976_v5, 0.0  ;;  %v2968_v58 = vadd.f32 %v2967_v56, %v6784_v27  ;;  %v7906_v24 = vld [vmem:[#allocation15_spill] sm:$0xff] }
 0x3a3   :  { %v2835_v46 = vpop.f32.mrf.mxu0  ;;  %v5533_v8 = vpop.f32.mrf.mxu1 }
 0x3a4   :  { %v3294_v47 = vpack.c.bf16 %v3226_v17, %v3225_v14  ;;  %v3224_v38 = vmax.f32 %v2968_v58, 0.0  ;;  %v7118_v2 = vadd.f32 %v2835_v46, %v2483_v55  ;;  %v2989_v59 = vadd.f32 %v5533_v8, %v6814_v40  ;;  %v7907_v17 = vld [vmem:[#allocation19_spill] sm:$0xff]  ;;  %v7908_v8 = vld [vmem:[#allocation17_spill] sm:$0xff] }
 0x3a5   :  { %v2837_v61 = vpop.f32.mrf.mxu0  ;;  %v2980_v7 = vpop.f32.mrf.mxu1 }
 0x3a6   :  { %v3293_v36 = vpack.c.bf16 %v3224_v38, %v3223_v11  ;;  %v2981_v1 = vadd.f32 %v2980_v7, %v6802_v16  ;;  %v3229_v3 = vmax.f32 %v2989_v59, 0.0  ;;  %v7910_v59 = vld [vmem:[#allocation18_spill] sm:$0xff] }
 0x3a7   :  { %v2838_v42 = vpop.f32.mrf.mxu0  ;;  %v5534_v34 = vpop.f32.mrf.mxu1 }
 0x3a8   :  { %v7124_v27 = vadd.f32 %v2838_v42, %v2486_v60  ;;  %v2992_v39 = vadd.f32 %v5534_v34, %v6820_v54  ;;  %5623 = vmatprep.mubr.bf16.mxu0 %v3293_v36  ;;  %v3227_v18 = vmax.f32 %v2981_v1, 0.0 }
 0x3a9   :  { %v2840_v9 = vpop.f32.mrf.mxu0  ;;  %v2983_v51 = vpop.f32.mrf.mxu1  ;;  %5624 = vmatmul.mubr.bf16.gmra.mxu0 %v3294_v47  ;;  %v7909_v47 = vld [vmem:[#allocation20_spill] sm:$0xff] }
 0x3aa   :  { %v3230_v35 = vmax.f32 %v2992_v39, 0.0  ;;  %v2984_v40 = vadd.f32 %v2983_v51, %v6808_v29  ;;  %v7911_v51 = vld [vmem:[#allocation23_spill] sm:$0xff] }
 0x3ab   :  { %v2843_v30 = vpop.f32.mrf.mxu0  ;;  %v5537_v49 = vpop.f32.mrf.mxu1 }
 0x3ac   :  { %v3296_v12 = vpack.c.bf16 %v3230_v35, %v3229_v3  ;;  %v3228_v16 = vmax.f32 %v2984_v40, 0.0  ;;  %v7130_v4 = vadd.f32 %v2843_v30, %v2491_v20  ;;  %v3005_v0 = vadd.f32 %v5537_v49, %v6838_v25  ;;  %v7912_v40 = vld [vmem:[#allocation21_spill] sm:$0xff]  ;;  %v7913_v49 = vld [vmem:[#allocation24_spill] sm:$0xff] }
 0x3ad   :  { %v2845_v21 = vpop.f32.mrf.mxu0  ;;  %v2996_v54 = vpop.f32.mrf.mxu1 }
 0x3ae   :  { %v3295_v32 = vpack.c.bf16 %v3228_v16, %v3227_v18  ;;  %v2997_v44 = vadd.f32 %v2996_v54, %v6826_v62  ;;  %v3233_v28 = vmax.f32 %v3005_v0, 0.0  ;;  %v7914_v54 = vld [vmem:[#allocation22_spill] sm:$0xff] }
 0x3af   :  { %v2846_v48 = vpop.f32.mrf.mxu0  ;;  %v5538_v31 = vpop.f32.mrf.mxu1 }
 0x3b0   :  { %v7136_v29 = vadd.f32 %v2846_v48, %v2494_v26  ;;  %v3008_v13 = vadd.f32 %v5538_v31, %v7905_v52  ;;  %5627 = vmatprep.mubr.bf16.mxu0 %v3295_v32  ;;  %v3231_v45 = vmax.f32 %v2997_v44, 0.0  ;;  %v7915_v52 = vld [vmem:[#allocation27_spill] sm:$0xff] }
 0x3b1   :  { %v2999_v6 = vpop.f32.mrf.mxu1  ;;  %5628 = vmatmul.mubr.bf16.gmra.mxu0 %v3296_v12  ;;  %v2848_v33 = vpop.f32.mrf.mxu0 }
 0x3b2   :  { %v3234_v5 = vmax.f32 %v3008_v13, 0.0  ;;  %v3000_v56 = vadd.f32 %v2999_v6, %v7906_v24  ;;  %v7917_v24 = vld [vmem:[#allocation28_spill] sm:$0xff] }
 0x3b3   :  { %v5541_v15 = vpop.f32.mrf.mxu1 }
 0x3b4   :  { %v3298_v25 = vpack.c.bf16 %v3234_v5, %v3233_v28  ;;  %v3232_v55 = vmax.f32 %v3000_v56, 0.0  ;;  %v3021_v58 = vadd.f32 %v5541_v15, %v7907_v17  ;;  %v7916_v28 = vld [vmem:[#allocation25_spill] sm:$0xff] }
 0x3b5   :  { %v3012_v14 = vpop.f32.mrf.mxu1 }
 0x3b6   :  { %v3297_v62 = vpack.c.bf16 %v3232_v55, %v3231_v45  ;;  %v3013_v11 = vadd.f32 %v3012_v14, %v7908_v8  ;;  %v3237_v7 = vmax.f32 %v3021_v58, 0.0  ;;  %v7918_v55 = vld [vmem:[#allocation26_spill] sm:$0xff] }
 0x3b7   :  { %v5542_v46 = vpop.f32.mrf.mxu1 }
 0x3b8   :  { %v3024_v38 = vadd.f32 %v5542_v46, %v7909_v47  ;;  %5631 = vmatprep.mubr.bf16.mxu0 %v3297_v62  ;;  %v3235_v34 = vmax.f32 %v3013_v11, 0.0  ;;  %v7919_v11 = vld [vmem:[#allocation31_spill] sm:$0xff] }
 0x3b9   :  { %v3015_v61 = vpop.f32.mrf.mxu1  ;;  %5632 = vmatmul.mubr.bf16.gmra.mxu0 %v3298_v25 }
 0x3ba   :  { %v3238_v60 = vmax.f32 %v3024_v38, 0.0  ;;  %v3016_v36 = vadd.f32 %v3015_v61, %v7910_v59  ;;  %v7921_v59 = vld [vmem:[#allocation32_spill] sm:$0xff] }
 0x3bb   :  { %v5545_v42 = vpop.f32.mrf.mxu1 }
 0x3bc   :  { %v3300_v1 = vpack.c.bf16 %v3238_v60, %v3237_v7  ;;  %v3236_v39 = vmax.f32 %v3016_v36, 0.0  ;;  %v3037_v20 = vadd.f32 %v5545_v42, %v7911_v51  ;;  %v7920_v7 = vld [vmem:[#allocation29_spill] sm:$0xff] }
 0x3bd   :  { %v3028_v9 = vpop.f32.mrf.mxu1 }
 0x3be   :  { %v3299_v3 = vpack.c.bf16 %v3236_v39, %v3235_v34  ;;  %v3029_v30 = vadd.f32 %v3028_v9, %v7912_v40  ;;  %v3241_v16 = vmax.f32 %v3037_v20, 0.0  ;;  %v7922_v39 = vld [vmem:[#allocation30_spill] sm:$0xff] }
 0x3bf   :  { %v5546_v35 = vpop.f32.mrf.mxu1 }
 0x3c0   :  { %v3040_v18 = vadd.f32 %v5546_v35, %v7913_v49  ;;  %5635 = vmatprep.mubr.bf16.mxu0 %v3299_v3  ;;  %v3239_v32 = vmax.f32 %v3029_v30, 0.0  ;;  %v7923_v30 = vld [vmem:[#allocation35_spill] sm:$0xff] }
 0x3c1   :  { %v3031_v12 = vpop.f32.mrf.mxu1  ;;  %5636 = vmatmul.mubr.bf16.gmra.mxu0 %v3300_v1 }
 0x3c2   :  { %v3242_v21 = vmax.f32 %v3040_v18, 0.0  ;;  %v3032_v26 = vadd.f32 %v3031_v12, %v7914_v54  ;;  %v7925_v54 = vld [vmem:[#allocation36_spill] sm:$0xff] }
 0x3c3   :  { %v5549_v0 = vpop.f32.mrf.mxu1 }
 0x3c4   :  { %v3302_v48 = vpack.c.bf16 %v3242_v21, %v3241_v16  ;;  %v3240_v31 = vmax.f32 %v3032_v26, 0.0  ;;  %v3053_v13 = vadd.f32 %v5549_v0, %v7915_v52  ;;  %v7924_v16 = vld [vmem:[#allocation33_spill] sm:$0xff] }
 0x3c5   :  { %v3044_v44 = vpop.f32.mrf.mxu1 }
 0x3c6   :  { %v3301_v6 = vpack.c.bf16 %v3240_v31, %v3239_v32  ;;  %v3045_v5 = vadd.f32 %v3044_v44, %v7916_v28  ;;  %v3245_v45 = vmax.f32 %v3053_v13, 0.0  ;;  %v7926_v31 = vld [vmem:[#allocation34_spill] sm:$0xff] }
 0x3c7   :  { %v5550_v33 = vpop.f32.mrf.mxu1 }
 0x3c8   :  { %v3056_v56 = vadd.f32 %v5550_v33, %v7917_v24  ;;  %5639 = vmatprep.mubr.bf16.mxu0 %v3301_v6  ;;  %v3243_v58 = vmax.f32 %v3045_v5, 0.0  ;;  %v7927_v5 = vld [vmem:[#allocation39_spill] sm:$0xff] }
 0x3c9   :  { %v3047_v15 = vpop.f32.mrf.mxu1  ;;  %5640 = vmatmul.mubr.bf16.gmra.mxu0 %v3302_v48 }
 0x3ca   :  { %v3246_v25 = vmax.f32 %v3056_v56, 0.0  ;;  %v3048_v14 = vadd.f32 %v3047_v15, %v7918_v55  ;;  %v7929_v55 = vld [vmem:[#allocation40_spill] sm:$0xff] }
 0x3cb   :  { %v5553_v17 = vpop.f32.mrf.mxu1 }
 0x3cc   :  { %v3304_v62 = vpack.c.bf16 %v3246_v25, %v3245_v45  ;;  %v3244_v46 = vmax.f32 %v3048_v14, 0.0  ;;  %v3069_v47 = vadd.f32 %v5553_v17, %v7919_v11  ;;  %v7928_v45 = vld [vmem:[#allocation37_spill] sm:$0xff] }
 0x3cd   :  { %v3060_v8 = vpop.f32.mrf.mxu1 }
 0x3ce   :  { %v3303_v38 = vpack.c.bf16 %v3244_v46, %v3243_v58  ;;  %v3061_v60 = vadd.f32 %v3060_v8, %v7920_v7  ;;  %v3249_v34 = vmax.f32 %v3069_v47, 0.0  ;;  %v7930_v46 = vld [vmem:[#allocation38_spill] sm:$0xff] }
 0x3cf   :  { %v5554_v61 = vpop.f32.mrf.mxu1 }
 0x3d0   :  { %v3072_v36 = vadd.f32 %v5554_v61, %v7921_v59  ;;  %5643 = vmatprep.mubr.bf16.mxu0 %v3303_v38  ;;  %v3247_v20 = vmax.f32 %v3061_v60, 0.0  ;;  %v7931_v60 = vld [vmem:[#allocation43_spill] sm:$0xff] }
 0x3d1   :  { %v3063_v42 = vpop.f32.mrf.mxu1  ;;  %5644 = vmatmul.mubr.bf16.gmra.mxu0 %v3304_v62 }
 0x3d2   :  { %v3250_v1 = vmax.f32 %v3072_v36, 0.0  ;;  %v3064_v9 = vadd.f32 %v3063_v42, %v7922_v39  ;;  %v7933_v39 = vld [vmem:[#allocation44_spill] sm:$0xff] }
 0x3d3   :  { %v5557_v51 = vpop.f32.mrf.mxu1 }
 0x3d4   :  { %v3306_v3 = vpack.c.bf16 %v3250_v1, %v3249_v34  ;;  %v3248_v35 = vmax.f32 %v3064_v9, 0.0  ;;  %v3085_v49 = vadd.f32 %v5557_v51, %v7923_v30  ;;  %v7932_v34 = vld [vmem:[#allocation41_spill] sm:$0xff] }
 0x3d5   :  { %v3076_v40 = vpop.f32.mrf.mxu1 }
 0x3d6   :  { %v3305_v18 = vpack.c.bf16 %v3248_v35, %v3247_v20  ;;  %v3077_v21 = vadd.f32 %v3076_v40, %v7924_v16  ;;  %v3253_v32 = vmax.f32 %v3085_v49, 0.0  ;;  %v7934_v35 = vld [vmem:[#allocation42_spill] sm:$0xff] }
 0x3d7   :  { %v5558_v12 = vpop.f32.mrf.mxu1 }
 0x3d8   :  { %v3088_v26 = vadd.f32 %v5558_v12, %v7925_v54  ;;  %5647 = vmatprep.mubr.bf16.mxu0 %v3305_v18  ;;  %v3251_v13 = vmax.f32 %v3077_v21, 0.0  ;;  %v7935_v21 = vld [vmem:[#allocation47_spill] sm:$0xff] }
 0x3d9   :  { %v3079_v0 = vpop.f32.mrf.mxu1  ;;  %5648 = vmatmul.mubr.bf16.gmra.mxu0 %v3306_v3 }
 0x3da   :  { %v3254_v48 = vmax.f32 %v3088_v26, 0.0  ;;  %v3080_v44 = vadd.f32 %v3079_v0, %v7926_v31  ;;  %v7937_v31 = vld [vmem:[#allocation48_spill] sm:$0xff] }
 0x3db   :  { %v5561_v52 = vpop.f32.mrf.mxu1 }
 0x3dc   :  { %v3308_v6 = vpack.c.bf16 %v3254_v48, %v3253_v32  ;;  %v3252_v33 = vmax.f32 %v3080_v44, 0.0  ;;  %v3101_v24 = vadd.f32 %v5561_v52, %v7927_v5  ;;  %v7936_v32 = vld [vmem:[#allocation45_spill] sm:$0xff] }
 0x3dd   :  { %v3092_v28 = vpop.f32.mrf.mxu1 }
 0x3de   :  { %v3307_v56 = vpack.c.bf16 %v3252_v33, %v3251_v13  ;;  %v3093_v25 = vadd.f32 %v3092_v28, %v7928_v45  ;;  %v3257_v58 = vmax.f32 %v3101_v24, 0.0  ;;  %v7938_v33 = vld [vmem:[#allocation46_spill] sm:$0xff] }
 0x3df   :  { %v5562_v15 = vpop.f32.mrf.mxu1 }
 0x3e0   :  { %v3104_v14 = vadd.f32 %v5562_v15, %v7929_v55  ;;  %5651 = vmatprep.mubr.bf16.mxu0 %v3307_v56  ;;  %v3255_v47 = vmax.f32 %v3093_v25, 0.0 }
 0x3e1   :  { %v3095_v17 = vpop.f32.mrf.mxu1  ;;  %5652 = vmatmul.mubr.bf16.gmra.mxu0 %v3308_v6 }
 0x3e2   :  { %v3258_v62 = vmax.f32 %v3104_v14, 0.0  ;;  %v3096_v8 = vadd.f32 %v3095_v17, %v7930_v46  ;;  %v7939_v17 = vld [vmem:[#allocation49_spill] sm:$0xff] }
 0x3e3   :  { %v5565_v11 = vpop.f32.mrf.mxu1 }
 0x3e4   :  { %v3310_v38 = vpack.c.bf16 %v3258_v62, %v3257_v58  ;;  %v3256_v61 = vmax.f32 %v3096_v8, 0.0  ;;  %v3117_v59 = vadd.f32 %v5565_v11, %v7931_v60 }
 0x3e5   :  { %v3108_v7 = vpop.f32.mrf.mxu1 }
 0x3e6   :  { %v3309_v36 = vpack.c.bf16 %v3256_v61, %v3255_v47  ;;  %v3109_v1 = vadd.f32 %v3108_v7, %v7932_v34  ;;  %v3261_v20 = vmax.f32 %v3117_v59, 0.0 }
 0x3e7   :  { %v5566_v42 = vpop.f32.mrf.mxu1 }
 0x3e8   :  { %v3120_v9 = vadd.f32 %v5566_v42, %v7933_v39  ;;  %5655 = vmatprep.mubr.bf16.mxu0 %v3309_v36  ;;  %v3259_v49 = vmax.f32 %v3109_v1, 0.0 }
 0x3e9   :  { %v3111_v51 = vpop.f32.mrf.mxu1  ;;  %5656 = vmatmul.mubr.bf16.gmra.mxu0 %v3310_v38 }
 0x3ea   :  { %v3262_v3 = vmax.f32 %v3120_v9, 0.0  ;;  %v3112_v40 = vadd.f32 %v3111_v51, %v7934_v35 }
 0x3eb   :  { %v5569_v30 = vpop.f32.mrf.mxu1 }
 0x3ec   :  { %v3312_v18 = vpack.c.bf16 %v3262_v3, %v3261_v20  ;;  %v3260_v12 = vmax.f32 %v3112_v40, 0.0  ;;  %v3133_v54 = vadd.f32 %v5569_v30, %v7935_v21 }
 0x3ed   :  { %v3124_v16 = vpop.f32.mrf.mxu1 }
 0x3ee   :  { %v3311_v26 = vpack.c.bf16 %v3260_v12, %v3259_v49  ;;  %v3125_v48 = vadd.f32 %v3124_v16, %v7936_v32  ;;  %v3265_v13 = vmax.f32 %v3133_v54, 0.0 }
 0x3ef   :  { %v5570_v0 = vpop.f32.mrf.mxu1 }
 0x3f0   :  { %v3136_v44 = vadd.f32 %v5570_v0, %v7937_v31  ;;  %5659 = vmatprep.mubr.bf16.mxu0 %v3311_v26  ;;  %v3263_v24 = vmax.f32 %v3125_v48, 0.0 }
 0x3f1   :  { %v3127_v52 = vpop.f32.mrf.mxu1  ;;  %5660 = vmatmul.mubr.bf16.gmra.mxu0 %v3312_v18 }
 0x3f2   :  { %v3266_v6 = vmax.f32 %v3136_v44, 0.0  ;;  %v3128_v28 = vadd.f32 %v3127_v52, %v7938_v33 }
 0x3f3   :  { %v5573_v5 = vpop.f32.mrf.mxu1 }
 0x3f4   :  { %v3314_v56 = vpack.c.bf16 %v3266_v6, %v3265_v13  ;;  %v3264_v15 = vmax.f32 %v3128_v28, 0.0  ;;  %v3149_v25 = vadd.f32 %v5573_v5, %v7058_v43 }
 0x3f5   :  { %v3140_v45 = vpop.f32.mrf.mxu1 }
 0x3f6   :  { %v3313_v55 = vpack.c.bf16 %v3264_v15, %v3263_v24  ;;  %v3141_v58 = vadd.f32 %v3140_v45, %v7939_v17  ;;  %v3269_v8 = vmax.f32 %v3149_v25, 0.0 }
 0x3f7   :  { %v5574_v14 = vpop.f32.mrf.mxu1 }
 0x3f8   :  { %v3152_v62 = vadd.f32 %v5574_v14, %v7064_v23  ;;  %5663 = vmatprep.mubr.bf16.mxu0 %v3313_v55  ;;  %v3267_v61 = vmax.f32 %v3141_v58, 0.0 }
 0x3f9   :  { %v3143_v46 = vpop.f32.mrf.mxu1  ;;  %5664 = vmatmul.mubr.bf16.gmra.mxu0 %v3314_v56 }
 0x3fa   :  { %v3270_v11 = vmax.f32 %v3152_v62, 0.0  ;;  %v3144_v47 = vadd.f32 %v3143_v46, %v7052_v22 }
 0x3fb   :  { %v5577_v38 = vpop.f32.mrf.mxu1 }
 0x3fc   :  { %v3316_v7 = vpack.c.bf16 %v3270_v11, %v3269_v8  ;;  %v3268_v60 = vmax.f32 %v3144_v47, 0.0  ;;  %v3165_v43 = vadd.f32 %v5577_v38, %v7082_v41 }
 0x3fd   :  { %v3156_v59 = vpop.f32.mrf.mxu1 }
 0x3fe   :  { %v3315_v36 = vpack.c.bf16 %v3268_v60, %v3267_v61  ;;  %v3157_v34 = vadd.f32 %v3156_v59, %v7070_v63  ;;  %v3273_v39 = vmax.f32 %v3165_v43, 0.0  ;;  %v7940_v61 = vmov 0  }
 0x3ff   :  { %v5578_v42 = vpop.f32.mrf.mxu1 }
 0x400   :  { %v3168_v23 = vadd.f32 %v5578_v42, %v7088_v37  ;;  %5667 = vmatprep.mubr.bf16.mxu0 %v3315_v36  ;;  %v3271_v20 = vmax.f32 %v3157_v34, 0.0 }
 0x401   :  { %v3159_v1 = vpop.f32.mrf.mxu1  ;;  %5668 = vmatmul.mubr.bf16.gmra.mxu0 %v3316_v7 }
 0x402   :  { %v3274_v9 = vmax.f32 %v3168_v23, 0.0  ;;  %v3160_v22 = vadd.f32 %v3159_v1, %v7076_v19 }
 0x403   :  { %v5581_v51 = vpop.f32.mrf.mxu1 }
 0x404   :  { %v3318_v3 = vpack.c.bf16 %v3274_v9, %v3273_v39  ;;  %v3272_v35 = vmax.f32 %v3160_v22, 0.0  ;;  %v3181_v41 = vadd.f32 %v5581_v51, %v7106_v57 }
 0x405   :  { %v3172_v40 = vpop.f32.mrf.mxu1 }
 0x406   :  { %v3317_v30 = vpack.c.bf16 %v3272_v35, %v3271_v20  ;;  %v3173_v63 = vadd.f32 %v3172_v40, %v7094_v50  ;;  %v3277_v12 = vmax.f32 %v3181_v41, 0.0 }
 0x407   :  { %v5582_v49 = vpop.f32.mrf.mxu1 }
 0x408   :  { %v3184_v37 = vadd.f32 %v5582_v49, %v7112_v10  ;;  %5671 = vmatprep.mubr.bf16.mxu0 %v3317_v30  ;;  %v3275_v54 = vmax.f32 %v3173_v63, 0.0 }
 0x409   :  { %v3175_v18 = vpop.f32.mrf.mxu1  ;;  %5672 = vmatmul.mubr.bf16.gmra.mxu0 %v3318_v3 }
 0x40a   :  { %v3278_v16 = vmax.f32 %v3184_v37, 0.0  ;;  %v3176_v19 = vadd.f32 %v3175_v18, %v7100_v53 }
 0x40b   :  { %v5585_v21 = vpop.f32.mrf.mxu1 }
 0x40c   :  { %v3320_v26 = vpack.c.bf16 %v3278_v16, %v3277_v12  ;;  %v3276_v0 = vmax.f32 %v3176_v19, 0.0  ;;  %v3197_v57 = vadd.f32 %v5585_v21, %v7130_v4  ;;  %v6145_v4 = vld [vmem:[#allocation2 + $0xc] ss:$20 sps:$4 sm:$0xff]  }
 0x40d   :  { %v3188_v32 = vpop.f32.mrf.mxu1 }
 0x40e   :  { %v3319_v48 = vpack.c.bf16 %v3276_v0, %v3275_v54  ;;  %v3189_v50 = vadd.f32 %v3188_v32, %v7118_v2  ;;  %v3281_v52 = vmax.f32 %v3197_v57, 0.0 }
 0x40f   :  { %v5586_v31 = vpop.f32.mrf.mxu1 }
 0x410   :  { %v3200_v10 = vadd.f32 %v5586_v31, %v7136_v29  ;;  %5675 = vmatprep.mubr.bf16.mxu0 %v3319_v48  ;;  %v3279_v6 = vmax.f32 %v3189_v50, 0.0 }
 0x411   :  { %v3191_v44 = vpop.f32.mrf.mxu1  ;;  %5676 = vmatmul.mubr.bf16.gmra.mxu0 %v3320_v26 }
 0x412   :  { %v3282_v13 = vmax.f32 %v3200_v10, 0.0  ;;  %v3192_v53 = vadd.f32 %v3191_v44, %v7124_v27 }
 0x414   :  { %v3322_v33 = vpack.c.bf16 %v3282_v13, %v3281_v52  ;;  %v3280_v28 = vmax.f32 %v3192_v53, 0.0 }
 0x416   :  { %v3321_v5 = vpack.c.bf16 %v3280_v28, %v3279_v6 }
 0x418   :  { %5679 = vmatprep.mubr.bf16.mxu0 %v3321_v5 }
 0x419   :  { %5680 = vmatmul.mubr.bf16.gmra.mxu0 %v3322_v33 }
 0x41a   :  { %4172 = vmatprep.mubr.bf16.mxu0 %v6145_v4 }
 0x441   :  { %v5605_v24 = vpop.f32.mrf.mxu0 }
 0x443   :  { %v3421_v56 = vpop.f32.mrf.mxu0 }
 0x445   :  { %v5606_v2 = vpop.f32.mrf.mxu0 }
 0x446   :  { %v3741_v35 = vpack.c.bf16 %v5606_v2, %v5605_v24  ;;  %v6146_v2 = vld [vmem:[#allocation2] ss:$20 sps:$4 sm:$0xff]  }
 0x447   :  { %v3424_v15 = vpop.f32.mrf.mxu0 }
 0x448   :  { %v3740_v30 = vpack.c.bf16 %v3424_v15, %v3421_v56  ;;  %v6147_v15 = vld [vmem:[#allocation2 + $0x2c] ss:$20 sps:$4 sm:$0xff]  }
 0x449   :  { %v5609_v29 = vpop.f32.mrf.mxu0 }
 0x44b   :  { %v3437_v45 = vpop.f32.mrf.mxu0 }
 0x44d   :  { %v5610_v25 = vpop.f32.mrf.mxu0 }
 0x44e   :  { %v3743_v39 = vpack.c.bf16 %v5610_v25, %v5609_v29 }
 0x44f   :  { %v3440_v55 = vpop.f32.mrf.mxu0 }
 0x450   :  { %v3742_v51 = vpack.c.bf16 %v3440_v55, %v3437_v45 }
 0x451   :  { %v5613_v14 = vpop.f32.mrf.mxu0 }
 0x453   :  { %v3453_v17 = vpop.f32.mrf.mxu0 }
 0x455   :  { %v5614_v58 = vpop.f32.mrf.mxu0 }
 0x456   :  { %v3745_v43 = vpack.c.bf16 %v5614_v58, %v5613_v14  ;;  %v6148_v58 = vld [vmem:[#allocation2 + $0x28] ss:$20 sps:$4 sm:$0xff]  }
 0x457   :  { %v3456_v27 = vpop.f32.mrf.mxu0 }
 0x458   :  { %v3744_v34 = vpack.c.bf16 %v3456_v27, %v3453_v17  ;;  %v6149_v27 = vld [vmem:[#allocation2 + $0x54] ss:$20 sps:$4 sm:$0xff]  }
 0x459   :  { %v5617_v62 = vpop.f32.mrf.mxu0 }
 0x45b   :  { %v3469_v46 = vpop.f32.mrf.mxu0 }
 0x45d   :  { %v5618_v8 = vpop.f32.mrf.mxu0 }
 0x45e   :  { %v3747_v11 = vpack.c.bf16 %v5618_v8, %v5617_v62 }
 0x45f   :  { %v3472_v47 = vpop.f32.mrf.mxu0 }
 0x460   :  { %3788 = vmatpush1.bf16.msra.mxu1 %v3747_v11  ;;  %v3746_v7 = vpack.c.bf16 %v3472_v47, %v3469_v46 }
 0x461   :  { %v7188_v38 = vpop.f32.mrf.mxu0  ;;  %3789 = vmatprep.subr.bf16.mxu1 %v7940_v61 }
 0x463   :  { %v7191_v60 = vpop.f32.mrf.mxu0 }
 0x464   :  { %3790 = vmatpush1.bf16.msra.mxu1 %v3746_v7  ;;  %v6150_v7 = vld [vmem:[#allocation2 + $0x50] ss:$20 sps:$4 sm:$0xff]  }
 0x465   :  { %v7193_v59 = vpop.f32.mrf.mxu0  ;;  %3791 = vmatprep.subr.bf16.mxu1 %v7940_v61 }
 0x466   :  { %v3749_v53 = vpack.c.bf16 %v7193_v59, %v7188_v38 }
 0x467   :  { %v7196_v36 = vpop.f32.mrf.mxu0 }
 0x468   :  { %3792 = vmatpush1.bf16.msra.mxu1 %v3745_v43  ;;  %v3748_v28 = vpack.c.bf16 %v7196_v36, %v7191_v60  ;;  %v6151_v60 = vld [vmem:[#allocation2 + $0x7c] ss:$20 sps:$4 sm:$0xff]  }
 0x469   :  { %v5625_v42 = vpop.f32.mrf.mxu0  ;;  %3793 = vmatprep.subr.bf16.mxu1 %v7940_v61 }
 0x46b   :  { %v3501_v23 = vpop.f32.mrf.mxu0 }
 0x46c   :  { %3794 = vmatpush1.bf16.msra.mxu1 %v3744_v34 }
 0x46d   :  { %v5626_v1 = vpop.f32.mrf.mxu0  ;;  %3795 = vmatprep.subr.bf16.mxu1 %v7940_v61 }
 0x46e   :  { %v3751_v31 = vpack.c.bf16 %v5626_v1, %v5625_v42  ;;  %v6152_v1 = vld [vmem:[#allocation2 + $0x78] ss:$20 sps:$4 sm:$0xff]  }
 0x46f   :  { %v3504_v9 = vpop.f32.mrf.mxu0 }
 0x470   :  { %3796 = vmatpush1.bf16.msra.mxu1 %v3743_v39  ;;  %v3750_v44 = vpack.c.bf16 %v3504_v9, %v3501_v23  ;;  %v6153_v39 = vld [vmem:[#allocation2 + $0xa4] ss:$20 sps:$4 sm:$0xff]  }
 0x471   :  { %v5629_v22 = vpop.f32.mrf.mxu0  ;;  %3797 = vmatprep.subr.bf16.mxu1 %v7940_v61 }
 0x473   :  { %v3517_v20 = vpop.f32.mrf.mxu0 }
 0x474   :  { %3798 = vmatpush1.bf16.msra.mxu1 %v3742_v51 }
 0x475   :  { %v5630_v3 = vpop.f32.mrf.mxu0  ;;  %3799 = vmatprep.subr.bf16.mxu1 %v7940_v61 }
 0x476   :  { %v3753_v54 = vpack.c.bf16 %v5630_v3, %v5629_v22 }
 0x477   :  { %v3520_v40 = vpop.f32.mrf.mxu0 }
 0x478   :  { %3800 = vmatpush1.bf16.msra.mxu1 %v3741_v35  ;;  %v3752_v32 = vpack.c.bf16 %v3520_v40, %v3517_v20  ;;  %v6154_v40 = vld [vmem:[#allocation2 + $0xa0] ss:$20 sps:$4 sm:$0xff]  }
 0x479   :  { %v5633_v41 = vpop.f32.mrf.mxu0  ;;  %3801 = vmatprep.subr.bf16.mxu1 %v7940_v61 }
 0x47b   :  { %v3533_v49 = vpop.f32.mrf.mxu0 }
 0x47c   :  { %3802 = vmatpush1.bf16.msra.mxu1 %v3740_v30 }
 0x47d   :  { %v5634_v63 = vpop.f32.mrf.mxu0  ;;  %3803 = vmatprep.subr.bf16.mxu1 %v7940_v61 }
 0x47e   :  { %v3755_v37 = vpack.c.bf16 %v5634_v63, %v5633_v41  ;;  %v6155_v41 = vld [vmem:[#allocation2 + $0xcc] ss:$20 sps:$4 sm:$0xff]  }
 0x47f   :  { %v3536_v18 = vpop.f32.mrf.mxu0 }
 0x480   :  { %3804 = vmatpush2.bf16.msra.mxu1 %v3755_v37  ;;  %v3754_v16 = vpack.c.bf16 %v3536_v18, %v3533_v49 }
 0x481   :  { %v7204_v12 = vpop.f32.mrf.mxu0  ;;  %3805 = vmatprep.subr.bf16.mxu1 %v7940_v61 }
 0x483   :  { %v7207_v19 = vpop.f32.mrf.mxu0 }
 0x484   :  { %3806 = vmatpush2.bf16.msra.mxu1 %v3754_v16  ;;  %v6156_v16 = vld [vmem:[#allocation2 + $0xc8] ss:$20 sps:$4 sm:$0xff]  }
 0x485   :  { %v7209_v21 = vpop.f32.mrf.mxu0  ;;  %3807 = vmatprep.subr.bf16.mxu1 %v7940_v61 }
 0x486   :  { %v3757_v34 = vpack.c.bf16 %v7209_v21, %v7204_v12 }
 0x487   :  { %v7212_v26 = vpop.f32.mrf.mxu0 }
 0x488   :  { %3808 = vmatpush2.bf16.msra.mxu1 %v3753_v54  ;;  %v3756_v22 = vpack.c.bf16 %v7212_v26, %v7207_v19  ;;  %v6157_v19 = vld [vmem:[#allocation2 + $0xf4] ss:$20 sps:$4 sm:$0xff]  }
 0x489   :  { %v5641_v0 = vpop.f32.mrf.mxu0  ;;  %3809 = vmatprep.subr.bf16.mxu1 %v7940_v61 }
 0x48b   :  { %v3565_v57 = vpop.f32.mrf.mxu0 }
 0x48c   :  { %3810 = vmatpush2.bf16.msra.mxu1 %v3752_v32 }
 0x48d   :  { %v5642_v48 = vpop.f32.mrf.mxu0  ;;  %3811 = vmatprep.subr.bf16.mxu1 %v7940_v61 }
 0x48e   :  { %v3759_v47 = vpack.c.bf16 %v5642_v48, %v5641_v0  ;;  %v6158_v48 = vld [vmem:[#allocation2 + $0xf0] ss:$20 sps:$4 sm:$0xff]  }
 0x48f   :  { %v3568_v50 = vpop.f32.mrf.mxu0 }
 0x490   :  { %3812 = vmatpush2.bf16.msra.mxu1 %v3751_v31  ;;  %v3758_v43 = vpack.c.bf16 %v3568_v50, %v3565_v57  ;;  %v6159_v31 = vld [vmem:[#allocation2 + $0x11c] ss:$20 sps:$4 sm:$0xff]  }
 0x491   :  { %v5645_v10 = vpop.f32.mrf.mxu0  ;;  %3813 = vmatprep.subr.bf16.mxu1 %v7940_v61 }
 0x493   :  { %v3581_v52 = vpop.f32.mrf.mxu0 }
 0x494   :  { %3814 = vmatpush2.bf16.msra.mxu1 %v3750_v44 }
 0x495   :  { %v5646_v13 = vpop.f32.mrf.mxu0  ;;  %3815 = vmatprep.subr.bf16.mxu1 %v7940_v61 }
 0x496   :  { %v3761_v14 = vpack.c.bf16 %v5646_v13, %v5645_v10 }
 0x497   :  { %v3584_v6 = vpop.f32.mrf.mxu0 }
 0x498   :  { %3816 = vmatpush2.bf16.msra.mxu1 %v3749_v53  ;;  %v3760_v46 = vpack.c.bf16 %v3584_v6, %v3581_v52  ;;  %v6160_v6 = vld [vmem:[#allocation2 + $0x118] ss:$20 sps:$4 sm:$0xff]  }
 0x499   :  { %v5649_v33 = vpop.f32.mrf.mxu0  ;;  %3817 = vmatprep.subr.bf16.mxu1 %v7940_v61 }
 0x49b   :  { %v3597_v5 = vpop.f32.mrf.mxu0 }
 0x49c   :  { %3818 = vmatpush2.bf16.msra.mxu1 %v3748_v28 }
 0x49d   :  { %v5650_v4 = vpop.f32.mrf.mxu0 }
 0x49e   :  { %v3763_v24 = vpack.c.bf16 %v5650_v4, %v5649_v33  ;;  %v6161_v33 = vld [vmem:[#allocation2 + $0x144] ss:$20 sps:$4 sm:$0xff]  }
 0x49f   :  { %v3600_v56 = vpop.f32.mrf.mxu0  ;;  %3820 = vmatmul.mubr.bf16.vlgmr.msra.gmra.mxu1 %v6146_v2 }
 0x4a0   :  { %4141 = vmatpush1.bf16.msra.mxu0 %v3763_v24  ;;  %3827 = vmatprep.mubr.bf16.mxu1 %v6147_v15  ;;  %v3762_v45 = vpack.c.bf16 %v3600_v56, %v3597_v5  ;;  %v6162_v15 = vld [vmem:[#allocation2 + $0x140] ss:$20 sps:$4 sm:$0xff]  }
 0x4a1   :  { %v7223_v29 = vpop.f32.mrf.mxu0  ;;  %4142 = vmatprep.subr.bf16.mxu0 %v7940_v61 }
 0x4a3   :  { %v7226_v25 = vpop.f32.mrf.mxu0 }
 0x4a4   :  { %4143 = vmatpush1.bf16.msra.mxu0 %v3762_v45 }
 0x4a5   :  { %v7228_v55 = vpop.f32.mrf.mxu0  ;;  %4144 = vmatprep.subr.bf16.mxu0 %v7940_v61 }
 0x4a6   :  { %v3765_v13 = vpack.c.bf16 %v7228_v55, %v7223_v29  ;;  %v6163_v29 = vld [vmem:[#allocation2 + $0x8] ss:$20 sps:$4 sm:$0xff]  }
 0x4a7   :  { %v7231_v17 = vpop.f32.mrf.mxu0  ;;  %3828 = vmatmul.mubr.bf16.gmra.mxu1 %v6148_v58  ;;  %v6165_v55 = vld [vmem:[#allocation2 + $0x34] ss:$20 sps:$4 sm:$0xff]  }
 0x4a8   :  { %4145 = vmatpush1.bf16.msra.mxu0 %v3761_v14  ;;  %3835 = vmatprep.mubr.bf16.mxu1 %v6149_v27  ;;  %v3764_v5 = vpack.c.bf16 %v7231_v17, %v7226_v25  ;;  %v6166_v14 = vld [vmem:[#allocation2 + $0x168] ss:$20 sps:$4 sm:$0xff]   ;;  %v6167_v17 = vld [vmem:[#allocation2 + $0x30] ss:$20 sps:$4 sm:$0xff]  }
 0x4a9   :  { %v7233_v62 = vpop.f32.mrf.mxu0  ;;  %4146 = vmatprep.subr.bf16.mxu0 %v7940_v61  ;;  %v6168_v27 = vld [vmem:[#allocation2 + $0x194] ss:$20 sps:$4 sm:$0xff]  }
 0x4ab   :  { %v7236_v8 = vpop.f32.mrf.mxu0 }
 0x4ac   :  { %4147 = vmatpush1.bf16.msra.mxu0 %v3760_v46 }
 0x4ad   :  { %v5658_v11 = vpop.f32.mrf.mxu0  ;;  %4148 = vmatprep.subr.bf16.mxu0 %v7940_v61 }
 0x4ae   :  { %v3767_v32 = vpack.c.bf16 %v5658_v11, %v7233_v62  ;;  %v6169_v62 = vld [vmem:[#allocation2 + $0x5c] ss:$20 sps:$4 sm:$0xff]   ;;  %v6171_v11 = vld [vmem:[#allocation2 + $0x58] ss:$20 sps:$4 sm:$0xff]  }
 0x4af   :  { %v7239_v38 = vpop.f32.mrf.mxu0  ;;  %3836 = vmatmul.mubr.bf16.gmra.mxu1 %v6150_v7  ;;  %v6173_v7 = vld [vmem:[#allocation2 + $0x84] ss:$20 sps:$4 sm:$0xff]  }
 0x4b0   :  { %4149 = vmatpush1.bf16.msra.mxu0 %v3759_v47  ;;  %3843 = vmatprep.mubr.bf16.mxu1 %v6151_v60  ;;  %v3766_v10 = vpack.c.bf16 %v7239_v38, %v7236_v8  ;;  %v6170_v8 = vld [vmem:[#allocation2 + $0x190] ss:$20 sps:$4 sm:$0xff]  }
 0x4b1   :  { %v5661_v59 = vpop.f32.mrf.mxu0  ;;  %4150 = vmatprep.subr.bf16.mxu0 %v7940_v61  ;;  %v6172_v38 = vld [vmem:[#allocation2 + $0x1bc] ss:$20 sps:$4 sm:$0xff]  }
 0x4b3   :  { %v3645_v36 = vpop.f32.mrf.mxu0 }
 0x4b4   :  { %4151 = vmatpush1.bf16.msra.mxu0 %v3758_v43  ;;  %v6175_v43 = vld [vmem:[#allocation2 + $0x80] ss:$20 sps:$4 sm:$0xff]  }
 0x4b5   :  { %v5662_v42 = vpop.f32.mrf.mxu0  ;;  %4152 = vmatprep.subr.bf16.mxu0 %v7940_v61 }
 0x4b6   :  { %v3769_v18 = vpack.c.bf16 %v5662_v42, %v5661_v59  ;;  %v6174_v59 = vld [vmem:[#allocation2 + $0x1b8] ss:$20 sps:$4 sm:$0xff]  }
 0x4b7   :  { %v3648_v23 = vpop.f32.mrf.mxu0  ;;  %3844 = vmatmul.mubr.bf16.gmra.mxu1 %v6152_v1  ;;  %v6176_v42 = vld [vmem:[#allocation2 + $0x1e4] ss:$20 sps:$4 sm:$0xff]   ;;  %v6179_v1 = vld [vmem:[#allocation2 + $0xa8] ss:$20 sps:$4 sm:$0xff]  }
 0x4b8   :  { %4153 = vmatpush1.bf16.msra.mxu0 %v3757_v34  ;;  %3851 = vmatprep.mubr.bf16.mxu1 %v6153_v39  ;;  %v3768_v54 = vpack.c.bf16 %v3648_v23, %v3645_v36  ;;  %v6177_v34 = vld [vmem:[#allocation2 + $0xac] ss:$20 sps:$4 sm:$0xff]  }
 0x4b9   :  { %v5665_v9 = vpop.f32.mrf.mxu0  ;;  %4154 = vmatprep.subr.bf16.mxu0 %v7940_v61  ;;  %v6178_v23 = vld [vmem:[#allocation2 + $0x1e0] ss:$20 sps:$4 sm:$0xff]  }
 0x4ba   :  { %v6180_v39 = vld [vmem:[#allocation2 + $0x20c] ss:$20 sps:$4 sm:$0xff]  }
 0x4bb   :  { %v3661_v51 = vpop.f32.mrf.mxu0 }
 0x4bc   :  { %4155 = vmatpush1.bf16.msra.mxu0 %v3756_v22  ;;  %v6182_v22 = vld [vmem:[#allocation2 + $0x208] ss:$20 sps:$4 sm:$0xff]  }
 0x4bd   :  { %v5666_v20 = vpop.f32.mrf.mxu0  ;;  %4156 = vmatprep.subr.bf16.mxu0 %v7940_v61 }
 0x4be   :  { %v3771_v3 = vpack.c.bf16 %v5666_v20, %v5665_v9  ;;  %v6181_v9 = vld [vmem:[#allocation2 + $0xd4] ss:$20 sps:$4 sm:$0xff]  }
 0x4bf   :  { %v3664_v35 = vpop.f32.mrf.mxu0  ;;  %3852 = vmatmul.mubr.bf16.gmra.mxu1 %v6154_v40  ;;  %v6184_v20 = vld [vmem:[#allocation2 + $0x234] ss:$20 sps:$4 sm:$0xff]   ;;  %v6187_v40 = vld [vmem:[#allocation2 + $0xf8] ss:$20 sps:$4 sm:$0xff]  }
 0x4c0   :  { %4157 = vmatpush2.bf16.msra.mxu0 %v3771_v3  ;;  %3859 = vmatprep.mubr.bf16.mxu1 %v6155_v41  ;;  %v3770_v49 = vpack.c.bf16 %v3664_v35, %v3661_v51  ;;  %v6183_v51 = vld [vmem:[#allocation2 + $0xd0] ss:$20 sps:$4 sm:$0xff]  }
 0x4c1   :  { %v7249_v30 = vpop.f32.mrf.mxu0  ;;  %4158 = vmatprep.subr.bf16.mxu0 %v7940_v61  ;;  %v6185_v3 = vld [vmem:[#allocation2 + $0xfc] ss:$20 sps:$4 sm:$0xff]  }
 0x4c2   :  { %v6186_v35 = vld [vmem:[#allocation2 + $0x230] ss:$20 sps:$4 sm:$0xff]  }
 0x4c3   :  { %v7252_v63 = vpop.f32.mrf.mxu0  ;;  %v6188_v41 = vld [vmem:[#allocation2 + $0x25c] ss:$20 sps:$4 sm:$0xff]  }
 0x4c4   :  { %4159 = vmatpush2.bf16.msra.mxu0 %v3770_v49  ;;  %v6190_v49 = vld [vmem:[#allocation2 + $0x258] ss:$20 sps:$4 sm:$0xff]  }
 0x4c5   :  { %v7254_v37 = vpop.f32.mrf.mxu0  ;;  %4160 = vmatprep.subr.bf16.mxu0 %v7940_v61 }
 0x4c6   :  { %v3773_v60 = vpack.c.bf16 %v7254_v37, %v7249_v30  ;;  %v6189_v30 = vld [vmem:[#allocation2 + $0x124] ss:$20 sps:$4 sm:$0xff]  }
 0x4c7   :  { %v7257_v12 = vpop.f32.mrf.mxu0  ;;  %3860 = vmatmul.mubr.bf16.gmra.mxu1 %v6156_v16  ;;  %v6192_v37 = vld [vmem:[#allocation2 + $0x284] ss:$20 sps:$4 sm:$0xff]   ;;  %v6195_v16 = vld [vmem:[#allocation2 + $0x148] ss:$20 sps:$4 sm:$0xff]  }
 0x4c8   :  { %4161 = vmatpush2.bf16.msra.mxu0 %v3769_v18  ;;  %3867 = vmatprep.mubr.bf16.mxu1 %v6157_v19  ;;  %v3772_v36 = vpack.c.bf16 %v7257_v12, %v7252_v63  ;;  %v6191_v63 = vld [vmem:[#allocation2 + $0x120] ss:$20 sps:$4 sm:$0xff]  }
 0x4c9   :  { %v7259_v21 = vpop.f32.mrf.mxu0  ;;  %4162 = vmatprep.subr.bf16.mxu0 %v7940_v61  ;;  %v6193_v18 = vld [vmem:[#allocation2 + $0x14c] ss:$20 sps:$4 sm:$0xff]  }
 0x4ca   :  { %v6194_v12 = vld [vmem:[#allocation2 + $0x280] ss:$20 sps:$4 sm:$0xff]  }
 0x4cb   :  { %v7262_v26 = vpop.f32.mrf.mxu0  ;;  %v6196_v19 = vld [vmem:[#allocation2 + $0x2ac] ss:$20 sps:$4 sm:$0xff]  }
 0x4cc   :  { %4163 = vmatpush2.bf16.msra.mxu0 %v3768_v54  ;;  %v6198_v54 = vld [vmem:[#allocation2 + $0x2a8] ss:$20 sps:$4 sm:$0xff]  }
 0x4cd   :  { %v7264_v0 = vpop.f32.mrf.mxu0  ;;  %4164 = vmatprep.subr.bf16.mxu0 %v7940_v61 }
 0x4ce   :  { %v3775_v46 = vpack.c.bf16 %v7264_v0, %v7259_v21  ;;  %v6197_v21 = vld [vmem:[#allocation2 + $0x174] ss:$20 sps:$4 sm:$0xff]  }
 0x4cf   :  { %v7268_v57 = vpop.f32.mrf.mxu0  ;;  %3868 = vmatmul.mubr.bf16.gmra.mxu1 %v6158_v48  ;;  %v6200_v0 = vld [vmem:[#allocation2 + $0x2d4] ss:$20 sps:$4 sm:$0xff]   ;;  %v6203_v48 = vld [vmem:[#allocation2 + $0x198] ss:$20 sps:$4 sm:$0xff]  }
 0x4d0   :  { %4165 = vmatpush2.bf16.msra.mxu0 %v3767_v32  ;;  %3875 = vmatprep.mubr.bf16.mxu1 %v6159_v31  ;;  %v3774_v47 = vpack.c.bf16 %v7268_v57, %v7262_v26  ;;  %v6199_v26 = vld [vmem:[#allocation2 + $0x170] ss:$20 sps:$4 sm:$0xff]  }
 0x4d1   :  { %v5677_v50 = vpop.f32.mrf.mxu0  ;;  %4166 = vmatprep.subr.bf16.mxu0 %v7940_v61  ;;  %v6201_v32 = vld [vmem:[#allocation2 + $0x19c] ss:$20 sps:$4 sm:$0xff]  }
 0x4d2   :  { %v6202_v57 = vld [vmem:[#allocation2 + $0x2d0] ss:$20 sps:$4 sm:$0xff]  }
 0x4d3   :  { %v3709_v44 = vpop.f32.mrf.mxu0  ;;  %v6204_v31 = vld [vmem:[#allocation2 + $0x2fc] ss:$20 sps:$4 sm:$0xff]  }
 0x4d4   :  { %4167 = vmatpush2.bf16.msra.mxu0 %v3766_v10  ;;  %v6206_v10 = vld [vmem:[#allocation2 + $0x2f8] ss:$20 sps:$4 sm:$0xff]  }
 0x4d5   :  { %v5678_v52 = vpop.f32.mrf.mxu0  ;;  %4168 = vmatprep.subr.bf16.mxu0 %v7940_v61 }
 0x4d6   :  { %v3777_v25 = vpack.c.bf16 %v5678_v52, %v5677_v50  ;;  %v6205_v50 = vld [vmem:[#allocation2 + $0x1c4] ss:$20 sps:$4 sm:$0xff]  }
 0x4d7   :  { %v3712_v53 = vpop.f32.mrf.mxu0  ;;  %3876 = vmatmul.mubr.bf16.gmra.mxu1 %v6160_v6  ;;  %v6208_v52 = vld [vmem:[#allocation2 + $0x324] ss:$20 sps:$4 sm:$0xff]   ;;  %v6211_v6 = vld [vmem:[#allocation2 + $0x1e8] ss:$20 sps:$4 sm:$0xff]  }
 0x4d8   :  { %4169 = vmatpush2.bf16.msra.mxu0 %v3765_v13  ;;  %3883 = vmatprep.mubr.bf16.mxu1 %v6161_v33  ;;  %v3776_v58 = vpack.c.bf16 %v3712_v53, %v3709_v44  ;;  %v6207_v44 = vld [vmem:[#allocation2 + $0x1c0] ss:$20 sps:$4 sm:$0xff]  }
 0x4d9   :  { %v5681_v28 = vpop.f32.mrf.mxu0  ;;  %4170 = vmatprep.subr.bf16.mxu0 %v7940_v61  ;;  %v6164_v61 = vld [vmem:[#allocation2 + $0x16c] ss:$20 sps:$4 sm:$0xff]  }
 0x4da   :  { %v6209_v13 = vld [vmem:[#allocation2 + $0x1ec] ss:$20 sps:$4 sm:$0xff]  }
 0x4db   :  { %v3725_v4 = vpop.f32.mrf.mxu0  ;;  %v6210_v53 = vld [vmem:[#allocation2 + $0x320] ss:$20 sps:$4 sm:$0xff]  }
 0x4dc   :  { %4171 = vmatpush2.bf16.msra.mxu0 %v3764_v5  ;;  %v6212_v33 = vld [vmem:[#allocation2 + $0x34c] ss:$20 sps:$4 sm:$0xff]   ;;  %v6214_v5 = vld [vmem:[#allocation2 + $0x348] ss:$20 sps:$4 sm:$0xff]  }
 0x4dd   :  { %v5682_v24 = vpop.f32.mrf.mxu0 }
 0x4de   :  { %v3779_v56 = vpack.c.bf16 %v5682_v24, %v5681_v28  ;;  %v6213_v28 = vld [vmem:[#allocation2 + $0x214] ss:$20 sps:$4 sm:$0xff]  }
 0x4df   :  { %v3728_v2 = vpop.f32.mrf.mxu0  ;;  %3884 = vmatmul.mubr.bf16.gmra.mxu1 %v6162_v15  ;;  %4173 = vmatmul.mubr.bf16.vlgmr.msra.gmra.mxu0 %v6163_v29  ;;  %v6216_v24 = vld [vmem:[#allocation2 + $0x374] ss:$20 sps:$4 sm:$0xff]   ;;  %v6219_v15 = vld [vmem:[#allocation2 + $0x238] ss:$20 sps:$4 sm:$0xff]   ;;  %v6220_v29 = vld [vmem:[#allocation2 + $0x39c] ss:$20 sps:$4 sm:$0xff]  }
 0x4e0   :  { %v3778_v45 = vpack.c.bf16 %v3728_v2, %v3725_v4  ;;  %5683 = vmatprep.subr.bf16.mxu0 %v3779_v56  ;;  %5779 = vmatprep.subr.bf16.mxu1 %v3779_v56  ;;  %v6215_v4 = vld [vmem:[#allocation2 + $0x210] ss:$20 sps:$4 sm:$0xff]  }
 0x4e1   :  { %5684 = vmatpush3.bf16.msra.mxu0 %v3779_v56  ;;  %5787 = vmatpush3.bf16.msra.mxu1 %v3779_v56  ;;  %v6217_v56 = vld [vmem:[#allocation2 + $0x23c] ss:$20 sps:$4 sm:$0xff]  }
 0x4e2   :  { %5685 = vmatprep.subr.bf16.mxu0 %v3778_v45  ;;  %5780 = vmatprep.subr.bf16.mxu1 %v3778_v45  ;;  %v6218_v2 = vld [vmem:[#allocation2 + $0x370] ss:$20 sps:$4 sm:$0xff]  }
 0x4e3   :  { %3891 = vmatprep.mubr.bf16.mxu1 %v6164_v61  ;;  %4180 = vmatprep.mubr.bf16.mxu0 %v6165_v55  ;;  %v6222_v61 = vld [vmem:[#allocation2 + $0x398] ss:$20 sps:$4 sm:$0xff]   ;;  %v6223_v55 = vld [vmem:[#allocation2 + $0x260] ss:$20 sps:$4 sm:$0xff]  }
 0x4e5   :  { %5686 = vmatpush3.bf16.msra.mxu0 %v3778_v45  ;;  %5788 = vmatpush3.bf16.msra.mxu1 %v3778_v45  ;;  %v6221_v45 = vld [vmem:[#allocation2 + $0x264] ss:$20 sps:$4 sm:$0xff]  }
 0x4e6   :  { %5687 = vmatprep.subr.bf16.mxu0 %v3777_v25  ;;  %5781 = vmatprep.subr.bf16.mxu1 %v3777_v25 }
 0x4e7   :  { %3892 = vmatmul.mubr.bf16.gmra.mxu1 %v6166_v14  ;;  %4181 = vmatmul.mubr.bf16.gmra.mxu0 %v6167_v17  ;;  %v6225_v14 = vld [vmem:[#allocation2 + $0x28c] ss:$20 sps:$4 sm:$0xff]  }
 0x4e8   :  { %3899 = vmatprep.mubr.bf16.mxu1 %v6168_v27  ;;  %4188 = vmatprep.mubr.bf16.mxu0 %v6169_v62  ;;  %v6227_v27 = vld [vmem:[#allocation2 + $0x288] ss:$20 sps:$4 sm:$0xff]   ;;  %v6228_v62 = vld [vmem:[#allocation2 + $0x3ec] ss:$20 sps:$4 sm:$0xff]  }
 0x4e9   :  { %5688 = vmatpush3.bf16.msra.mxu0 %v3777_v25  ;;  %5789 = vmatpush3.bf16.msra.mxu1 %v3777_v25  ;;  %v6224_v25 = vld [vmem:[#allocation2 + $0x3c4] ss:$20 sps:$4 sm:$0xff]  }
 0x4ea   :  { %5689 = vmatprep.subr.bf16.mxu0 %v3776_v58  ;;  %5782 = vmatprep.subr.bf16.mxu1 %v3776_v58 }
 0x4ed   :  { %5690 = vmatpush3.bf16.msra.mxu0 %v3776_v58  ;;  %5790 = vmatpush3.bf16.msra.mxu1 %v3776_v58  ;;  %v6226_v58 = vld [vmem:[#allocation2 + $0x3c0] ss:$20 sps:$4 sm:$0xff]  }
 0x4ee   :  { %5691 = vmatprep.subr.bf16.mxu0 %v3775_v46  ;;  %5783 = vmatprep.subr.bf16.mxu1 %v3775_v46 }
 0x4ef   :  { %3900 = vmatmul.mubr.bf16.gmra.mxu1 %v6170_v8  ;;  %4189 = vmatmul.mubr.bf16.gmra.mxu0 %v6171_v11 }
 0x4f0   :  { %3907 = vmatprep.mubr.bf16.mxu1 %v6172_v38  ;;  %4196 = vmatprep.mubr.bf16.mxu0 %v6173_v7  ;;  %v6230_v7 = vld [vmem:[#allocation2 + $0x3e8] ss:$20 sps:$4 sm:$0xff]  }
 0x4f1   :  { %5692 = vmatpush3.bf16.msra.mxu0 %v3775_v46  ;;  %5791 = vmatpush3.bf16.msra.mxu1 %v3775_v46  ;;  %v6229_v46 = vld [vmem:[#allocation2 + $0x2b4] ss:$20 sps:$4 sm:$0xff]  }
 0x4f2   :  { %5693 = vmatprep.subr.bf16.mxu0 %v3774_v47  ;;  %5784 = vmatprep.subr.bf16.mxu1 %v3774_v47 }
 0x4f5   :  { %5694 = vmatpush3.bf16.msra.mxu0 %v3774_v47  ;;  %5792 = vmatpush3.bf16.msra.mxu1 %v3774_v47 }
 0x4f6   :  { %5695 = vmatprep.subr.bf16.mxu0 %v3773_v60  ;;  %5785 = vmatprep.subr.bf16.mxu1 %v3773_v60 }
 0x4f7   :  { %3908 = vmatmul.mubr.bf16.gmra.mxu1 %v6174_v59  ;;  %4197 = vmatmul.mubr.bf16.gmra.mxu0 %v6175_v43  ;;  %v6232_v59 = vld [vmem:[#allocation2 + $0x414] ss:$20 sps:$4 sm:$0xff]   ;;  %v6233_v43 = vld [vmem:[#allocation2 + $0x2dc] ss:$20 sps:$4 sm:$0xff]  }
 0x4f8   :  { %3915 = vmatprep.mubr.bf16.mxu1 %v6176_v42  ;;  %4204 = vmatprep.mubr.bf16.mxu0 %v6177_v34 }
 0x4f9   :  { %5696 = vmatpush3.bf16.msra.mxu0 %v3773_v60  ;;  %5793 = vmatpush3.bf16.msra.mxu1 %v3773_v60  ;;  %v6231_v60 = vld [vmem:[#allocation2 + $0x2b0] ss:$20 sps:$4 sm:$0xff]  }
 0x4fa   :  { %5697 = vmatprep.subr.bf16.mxu0 %v3772_v36  ;;  %5786 = vmatprep.subr.bf16.mxu1 %v3772_v36 }
 0x4fd   :  { %5698 = vmatpush3.bf16.msra.mxu0 %v3772_v36  ;;  %5794 = vmatpush3.bf16.msra.mxu1 %v3772_v36 }
 0x4ff   :  { %3916 = vmatmul.mubr.bf16.gmra.mxu1 %v6178_v23  ;;  %4205 = vmatmul.mubr.bf16.gmra.mxu0 %v6179_v1  ;;  %v6234_v1 = vld [vmem:[#allocation2 + $0x410] ss:$20 sps:$4 sm:$0xff]  }
 0x500   :  { %3923 = vmatprep.mubr.bf16.mxu1 %v6180_v39  ;;  %4212 = vmatprep.mubr.bf16.mxu0 %v6181_v9  ;;  %v6235_v39 = vld [vmem:[#allocation2 + $0x2d8] ss:$20 sps:$4 sm:$0xff]   ;;  %v6236_v9 = vld [vmem:[#allocation2 + $0x43c] ss:$20 sps:$4 sm:$0xff]  }
 0x507   :  { %3924 = vmatmul.mubr.bf16.gmra.mxu1 %v6182_v22  ;;  %4213 = vmatmul.mubr.bf16.gmra.mxu0 %v6183_v51  ;;  %v6237_v22 = vld [vmem:[#allocation2 + $0x304] ss:$20 sps:$4 sm:$0xff]  }
 0x508   :  { %3931 = vmatprep.mubr.bf16.mxu1 %v6184_v20  ;;  %4220 = vmatprep.mubr.bf16.mxu0 %v6185_v3 }
 0x50f   :  { %3932 = vmatmul.mubr.bf16.gmra.mxu1 %v6186_v35  ;;  %4221 = vmatmul.mubr.bf16.gmra.mxu0 %v6187_v40  ;;  %v6238_v40 = vld [vmem:[#allocation2 + $0x438] ss:$20 sps:$4 sm:$0xff]  }
 0x510   :  { %3939 = vmatprep.mubr.bf16.mxu1 %v6188_v41  ;;  %4228 = vmatprep.mubr.bf16.mxu0 %v6189_v30  ;;  %v6239_v41 = vld [vmem:[#allocation2 + $0x300] ss:$20 sps:$4 sm:$0xff]   ;;  %v6240_v30 = vld [vmem:[#allocation2 + $0x464] ss:$20 sps:$4 sm:$0xff]  }
 0x517   :  { %3940 = vmatmul.mubr.bf16.gmra.mxu1 %v6190_v49  ;;  %4229 = vmatmul.mubr.bf16.gmra.mxu0 %v6191_v63  ;;  %v6241_v49 = vld [vmem:[#allocation2 + $0x32c] ss:$20 sps:$4 sm:$0xff]  }
 0x518   :  { %3947 = vmatprep.mubr.bf16.mxu1 %v6192_v37  ;;  %4236 = vmatprep.mubr.bf16.mxu0 %v6193_v18 }
 0x51f   :  { %3948 = vmatmul.mubr.bf16.gmra.mxu1 %v6194_v12  ;;  %4237 = vmatmul.mubr.bf16.gmra.mxu0 %v6195_v16  ;;  %v6242_v16 = vld [vmem:[#allocation2 + $0x460] ss:$20 sps:$4 sm:$0xff]  }
 0x520   :  { %3955 = vmatprep.mubr.bf16.mxu1 %v6196_v19  ;;  %4244 = vmatprep.mubr.bf16.mxu0 %v6197_v21  ;;  %v6243_v19 = vld [vmem:[#allocation2 + $0x328] ss:$20 sps:$4 sm:$0xff]   ;;  %v6244_v21 = vld [vmem:[#allocation2 + $0x48c] ss:$20 sps:$4 sm:$0xff]  }
 0x527   :  { %3956 = vmatmul.mubr.bf16.gmra.mxu1 %v6198_v54  ;;  %4245 = vmatmul.mubr.bf16.gmra.mxu0 %v6199_v26  ;;  %v6245_v54 = vld [vmem:[#allocation2 + $0x354] ss:$20 sps:$4 sm:$0xff]  }
 0x528   :  { %3963 = vmatprep.mubr.bf16.mxu1 %v6200_v0  ;;  %4252 = vmatprep.mubr.bf16.mxu0 %v6201_v32 }
 0x52f   :  { %3964 = vmatmul.mubr.bf16.gmra.mxu1 %v6202_v57  ;;  %4253 = vmatmul.mubr.bf16.gmra.mxu0 %v6203_v48  ;;  %v6246_v48 = vld [vmem:[#allocation2 + $0x488] ss:$20 sps:$4 sm:$0xff]  }
 0x530   :  { %3971 = vmatprep.mubr.bf16.mxu1 %v6204_v31  ;;  %4260 = vmatprep.mubr.bf16.mxu0 %v6205_v50  ;;  %v6247_v31 = vld [vmem:[#allocation2 + $0x350] ss:$20 sps:$4 sm:$0xff]   ;;  %v6248_v50 = vld [vmem:[#allocation2 + $0x4b4] ss:$20 sps:$4 sm:$0xff]  }
 0x537   :  { %3972 = vmatmul.mubr.bf16.gmra.mxu1 %v6206_v10  ;;  %4261 = vmatmul.mubr.bf16.gmra.mxu0 %v6207_v44  ;;  %v6249_v10 = vld [vmem:[#allocation2 + $0x37c] ss:$20 sps:$4 sm:$0xff]  }
 0x538   :  { %3979 = vmatprep.mubr.bf16.mxu1 %v6208_v52  ;;  %4268 = vmatprep.mubr.bf16.mxu0 %v6209_v13 }
 0x53f   :  { %3980 = vmatmul.mubr.bf16.gmra.mxu1 %v6210_v53  ;;  %4269 = vmatmul.mubr.bf16.gmra.mxu0 %v6211_v6  ;;  %v6250_v6 = vld [vmem:[#allocation2 + $0x4b0] ss:$20 sps:$4 sm:$0xff]  }
 0x540   :  { %3987 = vmatprep.mubr.bf16.mxu1 %v6212_v33  ;;  %4276 = vmatprep.mubr.bf16.mxu0 %v6213_v28  ;;  %v6251_v33 = vld [vmem:[#allocation2 + $0x378] ss:$20 sps:$4 sm:$0xff]   ;;  %v6252_v28 = vld [vmem:[#allocation2 + $0x4dc] ss:$20 sps:$4 sm:$0xff]  }
 0x547   :  { %3988 = vmatmul.mubr.bf16.gmra.mxu1 %v6214_v5  ;;  %4277 = vmatmul.mubr.bf16.gmra.mxu0 %v6215_v4  ;;  %v6253_v5 = vld [vmem:[#allocation2 + $0x3a4] ss:$20 sps:$4 sm:$0xff]  }
 0x548   :  { %3995 = vmatprep.mubr.bf16.mxu1 %v6216_v24  ;;  %4284 = vmatprep.mubr.bf16.mxu0 %v6217_v56 }
 0x54f   :  { %3996 = vmatmul.mubr.bf16.gmra.mxu1 %v6218_v2  ;;  %4285 = vmatmul.mubr.bf16.gmra.mxu0 %v6219_v15  ;;  %v6254_v15 = vld [vmem:[#allocation2 + $0x4d8] ss:$20 sps:$4 sm:$0xff]  }
 0x550   :  { %4003 = vmatprep.mubr.bf16.mxu1 %v6220_v29  ;;  %4292 = vmatprep.mubr.bf16.mxu0 %v6221_v45  ;;  %v6255_v29 = vld [vmem:[#allocation2 + $0x3a0] ss:$20 sps:$4 sm:$0xff]   ;;  %v6256_v45 = vld [vmem:[#allocation2 + $0x504] ss:$20 sps:$4 sm:$0xff]  }
 0x557   :  { %4004 = vmatmul.mubr.bf16.gmra.mxu1 %v6222_v61  ;;  %4293 = vmatmul.mubr.bf16.gmra.mxu0 %v6223_v55  ;;  %v6257_v61 = vld [vmem:[#allocation2 + $0x3cc] ss:$20 sps:$4 sm:$0xff]  }
 0x558   :  { %4011 = vmatprep.mubr.bf16.mxu1 %v6224_v25  ;;  %4300 = vmatprep.mubr.bf16.mxu0 %v6225_v14  ;;  %v7320_v25 = vld [vmem:[%s7865_s5] ss:$0 sm:$0xff] }
 0x55f   :  { %v7287_v17 = vpop.f32.mrf.mxu1  ;;  %4012 = vmatmul.mubr.bf16.gmra.mxu1 %v6226_v58  ;;  %4301 = vmatmul.mubr.bf16.gmra.mxu0 %v6227_v27 }
 0x560   :  { %4019 = vmatprep.mubr.bf16.mxu1 %v6228_v62  ;;  %4308 = vmatprep.mubr.bf16.mxu0 %v6229_v46  ;;  %v3822_v27 = vadd.f32 %v7320_v25, %v7287_v17  ;;  %v6258_v46 = vld [vmem:[#allocation2 + $0x500] ss:$20 sps:$4 sm:$0xff]  }
 0x561   :  { %v3823_v8 = vpop.f32.mrf.mxu1 }
 0x563   :  { %v7289_v11 = vpop.f32.mrf.mxu1 }
 0x565   :  { %v3826_v47 = vpop.f32.mrf.mxu1 }
 0x566   :  { %v6259_v47 = vld [vmem:[#allocation2 + $0x3c8] ss:$20 sps:$4 sm:$0xff]  }
 0x567   :  { %v7291_v38 = vpop.f32.mrf.mxu1  ;;  %4020 = vmatmul.mubr.bf16.gmra.mxu1 %v6230_v7  ;;  %4309 = vmatmul.mubr.bf16.gmra.mxu0 %v6231_v60  ;;  %v6260_v60 = vld [vmem:[#allocation2 + $0x52c] ss:$20 sps:$4 sm:$0xff]  }
 0x568   :  { %4027 = vmatprep.mubr.bf16.mxu1 %v6232_v59  ;;  %4316 = vmatprep.mubr.bf16.mxu0 %v6233_v43  ;;  %v6261_v59 = vld [vmem:[#allocation2 + $0x3f4] ss:$20 sps:$4 sm:$0xff]  }
 0x569   :  { %v3831_v36 = vpop.f32.mrf.mxu1 }
 0x56b   :  { %v7293_v42 = vpop.f32.mrf.mxu1 }
 0x56d   :  { %v3834_v34 = vpop.f32.mrf.mxu1 }
 0x56e   :  { %v3825_v34 = vadd.f32 %v7320_v25, %v7289_v11  ;;  %v6264_v11 = vld [vmem:[#allocation2 + $0x554] ss:$20 sps:$4 sm:$0xff]  }
 0x56f   :  { %v7295_v23 = vpop.f32.mrf.mxu1  ;;  %4028 = vmatmul.mubr.bf16.gmra.mxu1 %v6234_v1  ;;  %4317 = vmatmul.mubr.bf16.gmra.mxu0 %v6235_v39 }
 0x570   :  { %4035 = vmatprep.mubr.bf16.mxu1 %v6236_v9  ;;  %4324 = vmatprep.mubr.bf16.mxu0 %v6237_v22 }
 0x571   :  { %v3839_v51 = vpop.f32.mrf.mxu1 }
 0x572   :  { %v3830_v51 = vadd.f32 %v7320_v25, %v7291_v38 }
 0x573   :  { %v7297_v20 = vpop.f32.mrf.mxu1 }
 0x575   :  { %v3842_v3 = vpop.f32.mrf.mxu1 }
 0x577   :  { %v7299_v35 = vpop.f32.mrf.mxu1  ;;  %4036 = vmatmul.mubr.bf16.gmra.mxu1 %v6238_v40  ;;  %4325 = vmatmul.mubr.bf16.gmra.mxu0 %v6239_v41  ;;  %v6262_v40 = vld [vmem:[#allocation2 + $0x528] ss:$20 sps:$4 sm:$0xff]  }
 0x578   :  { %4043 = vmatprep.mubr.bf16.mxu1 %v6240_v30  ;;  %4332 = vmatprep.mubr.bf16.mxu0 %v6241_v49  ;;  %v6263_v30 = vld [vmem:[#allocation2 + $0x3f0] ss:$20 sps:$4 sm:$0xff]  }
 0x579   :  { %v3847_v63 = vpop.f32.mrf.mxu1 }
 0x57a   :  { %v6265_v63 = vld [vmem:[#allocation2 + $0x41c] ss:$20 sps:$4 sm:$0xff]  }
 0x57b   :  { %v7301_v37 = vpop.f32.mrf.mxu1 }
 0x57d   :  { %v3850_v18 = vpop.f32.mrf.mxu1 }
 0x57f   :  { %v7303_v12 = vpop.f32.mrf.mxu1  ;;  %4044 = vmatmul.mubr.bf16.gmra.mxu1 %v6242_v16  ;;  %4333 = vmatmul.mubr.bf16.gmra.mxu0 %v6243_v19  ;;  %v3833_v19 = vadd.f32 %v7320_v25, %v7293_v42  ;;  %v6268_v42 = vld [vmem:[#allocation2 + $0x57c] ss:$20 sps:$4 sm:$0xff]  }
 0x580   :  { %4051 = vmatprep.mubr.bf16.mxu1 %v6244_v21  ;;  %4340 = vmatprep.mubr.bf16.mxu0 %v6245_v54 }
 0x581   :  { %v3855_v26 = vpop.f32.mrf.mxu1 }
 0x583   :  { %v7305_v0 = vpop.f32.mrf.mxu1 }
 0x585   :  { %v3858_v32 = vpop.f32.mrf.mxu1 }
 0x587   :  { %v7307_v57 = vpop.f32.mrf.mxu1  ;;  %4052 = vmatmul.mubr.bf16.gmra.mxu1 %v6246_v48  ;;  %4341 = vmatmul.mubr.bf16.gmra.mxu0 %v6247_v31  ;;  %v3838_v48 = vadd.f32 %v7320_v25, %v7295_v23 }
 0x588   :  { %4059 = vmatprep.mubr.bf16.mxu1 %v6248_v50  ;;  %4348 = vmatprep.mubr.bf16.mxu0 %v6249_v10  ;;  %v6266_v50 = vld [vmem:[#allocation2 + $0x550] ss:$20 sps:$4 sm:$0xff]  }
 0x589   :  { %v3863_v44 = vpop.f32.mrf.mxu1 }
 0x58a   :  { %v6267_v44 = vld [vmem:[#allocation2 + $0x418] ss:$20 sps:$4 sm:$0xff]  }
 0x58b   :  { %v7309_v52 = vpop.f32.mrf.mxu1 }
 0x58d   :  { %v3866_v13 = vpop.f32.mrf.mxu1 }
 0x58f   :  { %v7311_v53 = vpop.f32.mrf.mxu1  ;;  %4060 = vmatmul.mubr.bf16.gmra.mxu1 %v6250_v6  ;;  %4349 = vmatmul.mubr.bf16.gmra.mxu0 %v6251_v33  ;;  %v6269_v6 = vld [vmem:[#allocation2 + $0x444] ss:$20 sps:$4 sm:$0xff]  }
 0x590   :  { %4067 = vmatprep.mubr.bf16.mxu1 %v6252_v28  ;;  %4356 = vmatprep.mubr.bf16.mxu0 %v6253_v5  ;;  %v3841_v5 = vadd.f32 %v7320_v25, %v7297_v20  ;;  %v6272_v20 = vld [vmem:[#allocation2 + $0x5a4] ss:$20 sps:$4 sm:$0xff]  }
 0x591   :  { %v3871_v4 = vpop.f32.mrf.mxu1 }
 0x593   :  { %v7313_v24 = vpop.f32.mrf.mxu1 }
 0x595   :  { %v3874_v56 = vpop.f32.mrf.mxu1 }
 0x597   :  { %v7315_v2 = vpop.f32.mrf.mxu1  ;;  %4068 = vmatmul.mubr.bf16.gmra.mxu1 %v6254_v15  ;;  %4357 = vmatmul.mubr.bf16.gmra.mxu0 %v6255_v29 }
 0x598   :  { %4075 = vmatprep.mubr.bf16.mxu1 %v6256_v45  ;;  %4364 = vmatprep.mubr.bf16.mxu0 %v6257_v61  ;;  %v3846_v45 = vadd.f32 %v7320_v25, %v7299_v35 }
 0x599   :  { %v3879_v55 = vpop.f32.mrf.mxu1 }
 0x59a   :  { %v6270_v55 = vld [vmem:[#allocation2 + $0x578] ss:$20 sps:$4 sm:$0xff]  }
 0x59b   :  { %v7322_v14 = vpop.f32.mrf.mxu1 }
 0x59d   :  { %v3882_v58 = vpop.f32.mrf.mxu1 }
 0x59f   :  { %v7326_v62 = vpop.f32.mrf.mxu1  ;;  %4076 = vmatmul.mubr.bf16.gmra.mxu1 %v6258_v46  ;;  %v4174_v8 = vpop.f32.mrf.mxu0  ;;  %4365 = vmatmul.mubr.bf16.gmra.mxu0 %v6259_v47 }
 0x5a0   :  { %v7328_v7 = vadd.f32 %v4174_v8, %v3822_v27  ;;  %4083 = vmatprep.mubr.bf16.mxu1 %v6260_v60  ;;  %4372 = vmatprep.mubr.bf16.mxu0 %v6261_v59  ;;  %v6271_v27 = vld [vmem:[#allocation2 + $0x440] ss:$20 sps:$4 sm:$0xff]   ;;  %v3849_v59 = vadd.f32 %v7320_v25, %v7301_v37 }
 0x5a1   :  { %v3887_v43 = vpop.f32.mrf.mxu1  ;;  %v4176_v36 = vpop.f32.mrf.mxu0  ;;  %v6273_v8 = vld [vmem:[#allocation2 + $0x46c] ss:$20 sps:$4 sm:$0xff]  }
 0x5a2   :  { %7941 = vst [vmem:[#allocation16_spill] sm:$0xff] %v7328_v7  ;;  %v6276_v37 = vld [vmem:[#allocation2 + $0x5cc] ss:$20 sps:$4 sm:$0xff]  }
 0x5a3   :  { %v7332_v1 = vpop.f32.mrf.mxu1  ;;  %v4177_v17 = vpop.f32.mrf.mxu0 }
 0x5a4   :  { %v7334_v39 = vadd.f32 %v4177_v17, %v3825_v34 }
 0x5a5   :  { %v3890_v9 = vpop.f32.mrf.mxu1  ;;  %v4179_v22 = vpop.f32.mrf.mxu0 }
 0x5a6   :  { %7942 = vst [vmem:[#allocation15_spill] sm:$0xff] %v7334_v39  ;;  %v3854_v9 = vadd.f32 %v7320_v25, %v7303_v12 }
 0x5a7   :  { %v7338_v3 = vpop.f32.mrf.mxu1  ;;  %4084 = vmatmul.mubr.bf16.gmra.mxu1 %v6262_v40  ;;  %v4182_v41 = vpop.f32.mrf.mxu0  ;;  %4373 = vmatmul.mubr.bf16.gmra.mxu0 %v6263_v30 }
 0x5a8   :  { %v7340_v49 = vadd.f32 %v4182_v41, %v3830_v51  ;;  %4091 = vmatprep.mubr.bf16.mxu1 %v6264_v11  ;;  %4380 = vmatprep.mubr.bf16.mxu0 %v6265_v63  ;;  %v6274_v51 = vld [vmem:[#allocation2 + $0x5a0] ss:$20 sps:$4 sm:$0xff]   ;;  %v6275_v41 = vld [vmem:[#allocation2 + $0x468] ss:$20 sps:$4 sm:$0xff]  }
 0x5a9   :  { %v3895_v18 = vpop.f32.mrf.mxu1  ;;  %v4184_v16 = vpop.f32.mrf.mxu0  ;;  %v6277_v11 = vld [vmem:[#allocation2 + $0x494] ss:$20 sps:$4 sm:$0xff]  }
 0x5aa   :  { %7943 = vst [vmem:[#allocation19_spill] sm:$0xff] %v7340_v49  ;;  %v3857_v16 = vadd.f32 %v7320_v25, %v7305_v0  ;;  %v6280_v0 = vld [vmem:[#allocation2 + $0x5f4] ss:$20 sps:$4 sm:$0xff]  }
 0x5ab   :  { %v7344_v21 = vpop.f32.mrf.mxu1  ;;  %v4185_v38 = vpop.f32.mrf.mxu0 }
 0x5ac   :  { %v7346_v54 = vadd.f32 %v4185_v38, %v3833_v19 }
 0x5ad   :  { %v3898_v26 = vpop.f32.mrf.mxu1  ;;  %v4187_v32 = vpop.f32.mrf.mxu0 }
 0x5ae   :  { %7944 = vst [vmem:[#allocation17_spill] sm:$0xff] %v7346_v54 }
 0x5af   :  { %v7350_v31 = vpop.f32.mrf.mxu1  ;;  %4092 = vmatmul.mubr.bf16.gmra.mxu1 %v6266_v50  ;;  %v4190_v10 = vpop.f32.mrf.mxu0  ;;  %4381 = vmatmul.mubr.bf16.gmra.mxu0 %v6267_v44 }
 0x5b0   :  { %v7352_v13 = vadd.f32 %v4190_v10, %v3838_v48  ;;  %4099 = vmatprep.mubr.bf16.mxu1 %v6268_v42  ;;  %4388 = vmatprep.mubr.bf16.mxu0 %v6269_v6  ;;  %v3862_v48 = vadd.f32 %v7320_v25, %v7307_v57  ;;  %v6278_v10 = vld [vmem:[#allocation2 + $0x5c8] ss:$20 sps:$4 sm:$0xff]   ;;  %v6279_v42 = vld [vmem:[#allocation2 + $0x490] ss:$20 sps:$4 sm:$0xff]  }
 0x5b1   :  { %v3903_v33 = vpop.f32.mrf.mxu1  ;;  %v4192_v28 = vpop.f32.mrf.mxu0 }
 0x5b2   :  { %7945 = vst [vmem:[#allocation20_spill] sm:$0xff] %v7352_v13  ;;  %v6281_v33 = vld [vmem:[#allocation2 + $0x4bc] ss:$20 sps:$4 sm:$0xff]  }
 0x5b3   :  { %v7356_v4 = vpop.f32.mrf.mxu1  ;;  %v4193_v23 = vpop.f32.mrf.mxu0 }
 0x5b4   :  { %v7358_v56 = vadd.f32 %v4193_v23, %v3841_v5  ;;  %v3865_v23 = vadd.f32 %v7320_v25, %v7309_v52  ;;  %v6284_v52 = vld [vmem:[#allocation2 + $0x61c] ss:$20 sps:$4 sm:$0xff]  }
 0x5b5   :  { %v3906_v15 = vpop.f32.mrf.mxu1  ;;  %v4195_v29 = vpop.f32.mrf.mxu0 }
 0x5b6   :  { %7946 = vst [vmem:[#allocation18_spill] sm:$0xff] %v7358_v56 }
 0x5b7   :  { %v7362_v61 = vpop.f32.mrf.mxu1  ;;  %4100 = vmatmul.mubr.bf16.gmra.mxu1 %v6270_v55  ;;  %v4198_v58 = vpop.f32.mrf.mxu0  ;;  %4389 = vmatmul.mubr.bf16.gmra.mxu0 %v6271_v27 }
 0x5b8   :  { %v7364_v46 = vadd.f32 %v4198_v58, %v3846_v45  ;;  %4107 = vmatprep.mubr.bf16.mxu1 %v6272_v20  ;;  %4396 = vmatprep.mubr.bf16.mxu0 %v6273_v8  ;;  %v3870_v58 = vadd.f32 %v7320_v25, %v7311_v53  ;;  %v6282_v20 = vld [vmem:[#allocation2 + $0x5f0] ss:$20 sps:$4 sm:$0xff]  }
 0x5b9   :  { %v3911_v47 = vpop.f32.mrf.mxu1  ;;  %v4200_v60 = vpop.f32.mrf.mxu0 }
 0x5ba   :  { %7947 = vst [vmem:[#allocation23_spill] sm:$0xff] %v7364_v46  ;;  %v6283_v47 = vld [vmem:[#allocation2 + $0x4b8] ss:$20 sps:$4 sm:$0xff]  }
 0x5bb   :  { %v7368_v43 = vpop.f32.mrf.mxu1  ;;  %v4201_v35 = vpop.f32.mrf.mxu0 }
 0x5bc   :  { %v7370_v36 = vadd.f32 %v4201_v35, %v3849_v59  ;;  %v6285_v59 = vld [vmem:[#allocation2 + $0x4e4] ss:$20 sps:$4 sm:$0xff]  }
 0x5bd   :  { %v3914_v34 = vpop.f32.mrf.mxu1  ;;  %v4203_v17 = vpop.f32.mrf.mxu0 }
 0x5be   :  { %7948 = vst [vmem:[#allocation21_spill] sm:$0xff] %v7370_v36  ;;  %v3873_v17 = vadd.f32 %v7320_v25, %v7313_v24  ;;  %v6288_v24 = vld [vmem:[#allocation2 + $0x50c] ss:$20 sps:$4 sm:$0xff]  }
 0x5bf   :  { %v7374_v22 = vpop.f32.mrf.mxu1  ;;  %4108 = vmatmul.mubr.bf16.gmra.mxu1 %v6274_v51  ;;  %v4206_v40 = vpop.f32.mrf.mxu0  ;;  %4397 = vmatmul.mubr.bf16.gmra.mxu0 %v6275_v41 }
 0x5c0   :  { %v7376_v30 = vadd.f32 %v4206_v40, %v3854_v9  ;;  %4115 = vmatprep.mubr.bf16.mxu1 %v6276_v37  ;;  %4404 = vmatprep.mubr.bf16.mxu0 %v6277_v11  ;;  %v3878_v37 = vadd.f32 %v7320_v25, %v7315_v2 }
 0x5c1   :  { %v3919_v63 = vpop.f32.mrf.mxu1  ;;  %v4208_v18 = vpop.f32.mrf.mxu0 }
 0x5c2   :  { %v6286_v63 = vld [vmem:[#allocation2 + $0x618] ss:$20 sps:$4 sm:$0xff]  }
 0x5c3   :  { %v7380_v19 = vpop.f32.mrf.mxu1  ;;  %v4209_v12 = vpop.f32.mrf.mxu0 }
 0x5c4   :  { %v7382_v38 = vadd.f32 %v4209_v12, %v3857_v16  ;;  %v6287_v16 = vld [vmem:[#allocation2 + $0x4e0] ss:$20 sps:$4 sm:$0xff]  }
 0x5c5   :  { %v3922_v26 = vpop.f32.mrf.mxu1  ;;  %v4211_v32 = vpop.f32.mrf.mxu0 }
 0x5c6   :  { %v6289_v26 = vld [vmem:[#allocation2 + $0xb0] ss:$20 sps:$4 sm:$0xff]  }
 0x5c7   :  { %v7386_v50 = vpop.f32.mrf.mxu1  ;;  %4116 = vmatmul.mubr.bf16.gmra.mxu1 %v6278_v10  ;;  %v4214_v44 = vpop.f32.mrf.mxu0  ;;  %4405 = vmatmul.mubr.bf16.gmra.mxu0 %v6279_v42  ;;  %v3881_v10 = vadd.f32 %v7320_v25, %v7322_v14  ;;  %v6292_v14 = vld [vmem:[#allocation2 + $0x534] ss:$20 sps:$4 sm:$0xff]  }
 0x5c8   :  { %v7388_v6 = vadd.f32 %v4214_v44, %v3862_v48  ;;  %4123 = vmatprep.mubr.bf16.mxu1 %v6280_v0  ;;  %4412 = vmatprep.mubr.bf16.mxu0 %v6281_v33 }
 0x5c9   :  { %v3927_v28 = vpop.f32.mrf.mxu1  ;;  %v4216_v5 = vpop.f32.mrf.mxu0 }
 0x5ca   :  { %v3886_v28 = vadd.f32 %v7320_v25, %v7326_v62 }
 0x5cb   :  { %v7392_v15 = vpop.f32.mrf.mxu1  ;;  %v4217_v57 = vpop.f32.mrf.mxu0 }
 0x5cc   :  { %v7394_v29 = vadd.f32 %v4217_v57, %v3865_v23  ;;  %v6290_v57 = vld [vmem:[#allocation2 + $0x508] ss:$20 sps:$4 sm:$0xff]  }
 0x5cd   :  { %v3930_v45 = vpop.f32.mrf.mxu1  ;;  %v4219_v55 = vpop.f32.mrf.mxu0 }
 0x5ce   :  { %v6291_v45 = vld [vmem:[#allocation2 + $0xd8] ss:$20 sps:$4 sm:$0xff]  }
 0x5cf   :  { %v7398_v27 = vpop.f32.mrf.mxu1  ;;  %4124 = vmatmul.mubr.bf16.gmra.mxu1 %v6282_v20  ;;  %v4222_v8 = vpop.f32.mrf.mxu0  ;;  %4413 = vmatmul.mubr.bf16.gmra.mxu0 %v6283_v47  ;;  %v3889_v47 = vadd.f32 %v7320_v25, %v7332_v1  ;;  %v6296_v1 = vld [vmem:[#allocation2 + $0x55c] ss:$20 sps:$4 sm:$0xff]  }
 0x5d0   :  { %v7400_v60 = vadd.f32 %v4222_v8, %v3870_v58  ;;  %4131 = vmatprep.mubr.bf16.mxu1 %v6284_v52  ;;  %4420 = vmatprep.mubr.bf16.mxu0 %v6285_v59  ;;  %v6293_v58 = vld [vmem:[#allocation2 + $0x100] ss:$20 sps:$4 sm:$0xff]  }
 0x5d1   :  { %v3935_v35 = vpop.f32.mrf.mxu1  ;;  %v4224_v34 = vpop.f32.mrf.mxu0 }
 0x5d3   :  { %v7404_v9 = vpop.f32.mrf.mxu1  ;;  %v4225_v53 = vpop.f32.mrf.mxu0 }
 0x5d4   :  { %v7406_v51 = vadd.f32 %v4225_v53, %v3873_v17  ;;  %v3894_v17 = vadd.f32 %v7320_v25, %v7338_v3 }
 0x5d5   :  { %v3938_v40 = vpop.f32.mrf.mxu1  ;;  %v4227_v41 = vpop.f32.mrf.mxu0 }
 0x5d6   :  { %v6294_v41 = vld [vmem:[#allocation2 + $0x530] ss:$20 sps:$4 sm:$0xff]  }
 0x5d7   :  { %v7410_v11 = vpop.f32.mrf.mxu1  ;;  %4132 = vmatmul.mubr.bf16.gmra.mxu1 %v6286_v63  ;;  %v4230_v18 = vpop.f32.mrf.mxu0  ;;  %4421 = vmatmul.mubr.bf16.gmra.mxu0 %v6287_v16 }
 0x5d8   :  { %v7412_v12 = vadd.f32 %v4230_v18, %v3878_v37  ;;  %4428 = vmatprep.mubr.bf16.mxu0 %v6288_v24  ;;  %5707 = vmatprep.mubr.bf16.mxu1 %v6289_v26  ;;  %v6295_v37 = vld [vmem:[#allocation2 + $0x128] ss:$20 sps:$4 sm:$0xff]   ;;  %v6297_v18 = vld [vmem:[#allocation2 + $0x150] ss:$20 sps:$4 sm:$0xff]   ;;  %v3897_v26 = vadd.f32 %v7320_v25, %v7344_v21 }
 0x5d9   :  { %v3943_v32 = vpop.f32.mrf.mxu1  ;;  %v4232_v48 = vpop.f32.mrf.mxu0  ;;  %v6300_v21 = vld [vmem:[#allocation2 + $0x584] ss:$20 sps:$4 sm:$0xff]  }
 0x5db   :  { %v7416_v44 = vpop.f32.mrf.mxu1  ;;  %v4233_v2 = vpop.f32.mrf.mxu0 }
 0x5dc   :  { %v7418_v42 = vadd.f32 %v4233_v2, %v3881_v10 }
 0x5dd   :  { %v3946_v0 = vpop.f32.mrf.mxu1  ;;  %v4235_v33 = vpop.f32.mrf.mxu0 }
 0x5de   :  { %v3902_v0 = vadd.f32 %v7320_v25, %v7350_v31 }
 0x5df   :  { %v7422_v5 = vpop.f32.mrf.mxu1  ;;  %v4238_v23 = vpop.f32.mrf.mxu0  ;;  %4429 = vmatmul.mubr.bf16.gmra.mxu0 %v6290_v57  ;;  %5708 = vmatmul.mubr.bf16.vlgmr.msra.gmra.mxu1 %v6291_v45  ;;  %v6299_v57 = vld [vmem:[#allocation2 + $0x178] ss:$20 sps:$4 sm:$0xff]  }
 0x5e0   :  { %v7424_v55 = vadd.f32 %v4238_v23, %v3886_v28  ;;  %4436 = vmatprep.mubr.bf16.mxu0 %v6292_v14  ;;  %5711 = vmatprep.mubr.bf16.mxu1 %v6293_v58  ;;  %v6298_v23 = vld [vmem:[#allocation2 + $0x558] ss:$20 sps:$4 sm:$0xff]   ;;  %v6301_v14 = vld [vmem:[#allocation2 + $0x1a0] ss:$20 sps:$4 sm:$0xff]  }
 0x5e1   :  { %v3951_v20 = vpop.f32.mrf.mxu1  ;;  %v4240_v8 = vpop.f32.mrf.mxu0 }
 0x5e2   :  { %v3905_v8 = vadd.f32 %v7320_v25, %v7356_v4  ;;  %v6304_v4 = vld [vmem:[#allocation2 + $0x5ac] ss:$20 sps:$4 sm:$0xff]  }
 0x5e3   :  { %v7428_v52 = vpop.f32.mrf.mxu1  ;;  %v4241_v62 = vpop.f32.mrf.mxu0 }
 0x5e4   :  { %v7430_v59 = vadd.f32 %v4241_v62, %v3889_v47 }
 0x5e5   :  { %v3954_v35 = vpop.f32.mrf.mxu1  ;;  %v4243_v34 = vpop.f32.mrf.mxu0 }
 0x5e7   :  { %v7434_v53 = vpop.f32.mrf.mxu1  ;;  %v4246_v40 = vpop.f32.mrf.mxu0  ;;  %4437 = vmatmul.mubr.bf16.gmra.mxu0 %v6294_v41  ;;  %5712 = vmatmul.mubr.bf16.gmra.mxu1 %v6295_v37  ;;  %v6302_v37 = vld [vmem:[#allocation2 + $0x580] ss:$20 sps:$4 sm:$0xff]  }
 0x5e8   :  { %v7436_v63 = vadd.f32 %v4246_v40, %v3894_v17  ;;  %4444 = vmatprep.mubr.bf16.mxu0 %v6296_v1  ;;  %5715 = vmatprep.mubr.bf16.mxu1 %v6297_v18  ;;  %v3910_v17 = vadd.f32 %v7320_v25, %v7362_v61  ;;  %v6303_v1 = vld [vmem:[#allocation2 + $0x1c8] ss:$20 sps:$4 sm:$0xff]  }
 0x5e9   :  { %v3959_v16 = vpop.f32.mrf.mxu1  ;;  %v4248_v24 = vpop.f32.mrf.mxu0 }
 0x5ea   :  { %v6305_v16 = vld [vmem:[#allocation2 + $0x1f0] ss:$20 sps:$4 sm:$0xff]  }
 0x5eb   :  { %v7440_v32 = vpop.f32.mrf.mxu1  ;;  %v4249_v3 = vpop.f32.mrf.mxu0 }
 0x5ec   :  { %v7442_v48 = vadd.f32 %v4249_v3, %v3897_v26  ;;  %v3913_v3 = vadd.f32 %v7320_v25, %v7368_v43  ;;  %v6308_v43 = vld [vmem:[#allocation2 + $0x5d4] ss:$20 sps:$4 sm:$0xff]  }
 0x5ed   :  { %v3962_v10 = vpop.f32.mrf.mxu1  ;;  %v4251_v2 = vpop.f32.mrf.mxu0 }
 0x5ef   :  { %v7446_v33 = vpop.f32.mrf.mxu1  ;;  %v4254_v28 = vpop.f32.mrf.mxu0  ;;  %4445 = vmatmul.mubr.bf16.gmra.mxu0 %v6298_v23  ;;  %5716 = vmatmul.mubr.bf16.gmra.mxu1 %v6299_v57  ;;  %v3918_v23 = vadd.f32 %v7320_v25, %v7374_v22 }
 0x5f0   :  { %v7448_v45 = vadd.f32 %v4254_v28, %v3902_v0  ;;  %4452 = vmatprep.mubr.bf16.mxu0 %v6300_v21  ;;  %5719 = vmatprep.mubr.bf16.mxu1 %v6301_v14  ;;  %v6306_v14 = vld [vmem:[#allocation2 + $0x5a8] ss:$20 sps:$4 sm:$0xff]  }
 0x5f1   :  { %v3967_v58 = vpop.f32.mrf.mxu1  ;;  %v4256_v20 = vpop.f32.mrf.mxu0 }
 0x5f2   :  { %v6307_v58 = vld [vmem:[#allocation2 + $0x218] ss:$20 sps:$4 sm:$0xff]  }
 0x5f3   :  { %v7452_v47 = vpop.f32.mrf.mxu1  ;;  %v4257_v31 = vpop.f32.mrf.mxu0 }
 0x5f4   :  { %v7454_v62 = vadd.f32 %v4257_v31, %v3905_v8  ;;  %v6309_v8 = vld [vmem:[#allocation2 + $0x240] ss:$20 sps:$4 sm:$0xff]  }
 0x5f5   :  { %v3970_v35 = vpop.f32.mrf.mxu1  ;;  %v4259_v34 = vpop.f32.mrf.mxu0 }
 0x5f6   :  { %v3921_v34 = vadd.f32 %v7320_v25, %v7380_v19  ;;  %v6312_v19 = vld [vmem:[#allocation2 + $0x5fc] ss:$20 sps:$4 sm:$0xff]  }
 0x5f7   :  { %v7458_v40 = vpop.f32.mrf.mxu1  ;;  %v4262_v41 = vpop.f32.mrf.mxu0  ;;  %4453 = vmatmul.mubr.bf16.gmra.mxu0 %v6302_v37  ;;  %5720 = vmatmul.mubr.bf16.gmra.mxu1 %v6303_v1 }
 0x5f8   :  { %v7460_v18 = vadd.f32 %v4262_v41, %v3910_v17  ;;  %4460 = vmatprep.mubr.bf16.mxu0 %v6304_v4  ;;  %5723 = vmatprep.mubr.bf16.mxu1 %v6305_v16  ;;  %v3926_v4 = vadd.f32 %v7320_v25, %v7386_v50  ;;  %v3974_v13 = vadd.f32 %v7320_v25, %v7458_v40 }
 0x5f9   :  { %v3975_v24 = vpop.f32.mrf.mxu1  ;;  %v4264_v26 = vpop.f32.mrf.mxu0 }
 0x5fa   :  { %v6310_v26 = vld [vmem:[#allocation2 + $0x5d0] ss:$20 sps:$4 sm:$0xff]  }
 0x5fb   :  { %v7464_v10 = vpop.f32.mrf.mxu1  ;;  %v4265_v61 = vpop.f32.mrf.mxu0 }
 0x5fc   :  { %v7466_v2 = vadd.f32 %v4265_v61, %v3913_v3  ;;  %v6311_v3 = vld [vmem:[#allocation2 + $0x268] ss:$20 sps:$4 sm:$0xff]  }
 0x5fd   :  { %v3978_v0 = vpop.f32.mrf.mxu1  ;;  %v4267_v28 = vpop.f32.mrf.mxu0 }
 0x5fe   :  { %v6313_v0 = vld [vmem:[#allocation2 + $0x290] ss:$20 sps:$4 sm:$0xff]  }
 0x5ff   :  { %v7470_v57 = vpop.f32.mrf.mxu1  ;;  %v4270_v21 = vpop.f32.mrf.mxu0  ;;  %4461 = vmatmul.mubr.bf16.gmra.mxu0 %v6306_v14  ;;  %5724 = vmatmul.mubr.bf16.gmra.mxu1 %v6307_v58 }
 0x600   :  { %v7472_v20 = vadd.f32 %v4270_v21, %v3918_v23  ;;  %4468 = vmatprep.mubr.bf16.mxu0 %v6308_v43  ;;  %5727 = vmatprep.mubr.bf16.mxu1 %v6309_v8  ;;  %v3929_v21 = vadd.f32 %v7320_v25, %v7392_v15  ;;  %v6316_v15 = vld [vmem:[#allocation2 + $0x624] ss:$20 sps:$4 sm:$0xff]   ;;  %v3982_v39 = vadd.f32 %v7320_v25, %v7470_v57 }
 0x601   :  { %v3983_v31 = vpop.f32.mrf.mxu1  ;;  %v4272_v35 = vpop.f32.mrf.mxu0 }
 0x602   :  { %v3934_v31 = vadd.f32 %v7320_v25, %v7398_v27 }
 0x603   :  { %v7476_v17 = vpop.f32.mrf.mxu1  ;;  %v4273_v22 = vpop.f32.mrf.mxu0 }
 0x604   :  { %v7478_v41 = vadd.f32 %v4273_v22, %v3921_v34  ;;  %v6314_v22 = vld [vmem:[#allocation2 + $0x5f8] ss:$20 sps:$4 sm:$0xff]  }
 0x605   :  { %v3986_v37 = vpop.f32.mrf.mxu1  ;;  %v4275_v1 = vpop.f32.mrf.mxu0 }
 0x606   :  { %v6315_v37 = vld [vmem:[#allocation2 + $0x2b8] ss:$20 sps:$4 sm:$0xff]  }
 0x607   :  { %v7482_v16 = vpop.f32.mrf.mxu1  ;;  %v4278_v24 = vpop.f32.mrf.mxu0  ;;  %4469 = vmatmul.mubr.bf16.gmra.mxu0 %v6310_v26  ;;  %5728 = vmatmul.mubr.bf16.gmra.mxu1 %v6311_v3  ;;  %v3937_v3 = vadd.f32 %v7320_v25, %v7404_v9  ;;  %v6320_v9 = vld [vmem:[#allocation2 + $0x10] ss:$20 sps:$4 sm:$0xff]  }
 0x608   :  { %v7484_v61 = vadd.f32 %v4278_v24, %v3926_v4  ;;  %4476 = vmatprep.mubr.bf16.mxu0 %v6312_v19  ;;  %5731 = vmatprep.mubr.bf16.mxu1 %v6313_v0  ;;  %v6317_v4 = vld [vmem:[#allocation2 + $0x2e0] ss:$20 sps:$4 sm:$0xff]   ;;  %v3990_v7 = vadd.f32 %v7320_v25, %v7482_v16 }
 0x609   :  { %v3991_v28 = vpop.f32.mrf.mxu1  ;;  %v4280_v23 = vpop.f32.mrf.mxu0 }
 0x60b   :  { %v7488_v14 = vpop.f32.mrf.mxu1  ;;  %v4281_v50 = vpop.f32.mrf.mxu0 }
 0x60c   :  { %v7490_v58 = vadd.f32 %v4281_v50, %v3929_v21  ;;  %v3942_v21 = vadd.f32 %v7320_v25, %v7410_v11 }
 0x60d   :  { %v3994_v43 = vpop.f32.mrf.mxu1  ;;  %v4283_v8 = vpop.f32.mrf.mxu0 }
 0x60e   :  { %v6318_v8 = vld [vmem:[#allocation2 + $0x620] ss:$20 sps:$4 sm:$0xff]  }
 0x60f   :  { %v7494_v35 = vpop.f32.mrf.mxu1  ;;  %v4286_v34 = vpop.f32.mrf.mxu0  ;;  %4477 = vmatmul.mubr.bf16.gmra.mxu0 %v6314_v22  ;;  %5732 = vmatmul.mubr.bf16.gmra.mxu1 %v6315_v37  ;;  %v6321_v22 = vld [vmem:[#allocation2 + $0x330] ss:$20 sps:$4 sm:$0xff]  }
 0x610   :  { %v7496_v1 = vadd.f32 %v4286_v34, %v3934_v31  ;;  %4484 = vmatprep.mubr.bf16.mxu0 %v6316_v15  ;;  %5735 = vmatprep.mubr.bf16.mxu1 %v6317_v4  ;;  %v6319_v31 = vld [vmem:[#allocation2 + $0x308] ss:$20 sps:$4 sm:$0xff]   ;;  %v3945_v4 = vadd.f32 %v7320_v25, %v7416_v44  ;;  %v6324_v44 = vld [vmem:[#allocation2 + $0x60] ss:$20 sps:$4 sm:$0xff]  }
 0x611   :  { %v3999_v24 = vpop.f32.mrf.mxu1  ;;  %v4288_v26 = vpop.f32.mrf.mxu0 }
 0x613   :  { %v7500_v19 = vpop.f32.mrf.mxu1  ;;  %v4289_v27 = vpop.f32.mrf.mxu0 }
 0x614   :  { %v7502_v0 = vadd.f32 %v4289_v27, %v3937_v3 }
 0x615   :  { %v4002_v28 = vpop.f32.mrf.mxu1  ;;  %v4291_v23 = vpop.f32.mrf.mxu0 }
 0x616   :  { %v3950_v28 = vadd.f32 %v7320_v25, %v7422_v5 }
 0x617   :  { %v7506_v50 = vpop.f32.mrf.mxu1  ;;  %v4294_v43 = vpop.f32.mrf.mxu0  ;;  %4485 = vmatmul.mubr.bf16.gmra.mxu0 %v6318_v8  ;;  %5736 = vmatmul.mubr.bf16.gmra.mxu1 %v6319_v31  ;;  %v6323_v8 = vld [vmem:[#allocation2 + $0x358] ss:$20 sps:$4 sm:$0xff]  }
 0x618   :  { %v7508_v34 = vadd.f32 %v4294_v43, %v3942_v21  ;;  %5699 = vmatprep.mubr.bf16.mxu0 %v6320_v9  ;;  %5739 = vmatprep.mubr.bf16.mxu1 %v6321_v22  ;;  %v6322_v43 = vld [vmem:[#allocation2 + $0x38] ss:$20 sps:$4 sm:$0xff]   ;;  %v6325_v9 = vld [vmem:[#allocation2 + $0x380] ss:$20 sps:$4 sm:$0xff]  }
 0x619   :  { %v4007_v37 = vpop.f32.mrf.mxu1  ;;  %v4296_v15 = vpop.f32.mrf.mxu0 }
 0x61a   :  { %v3953_v15 = vadd.f32 %v7320_v25, %v7428_v52  ;;  %v6328_v52 = vld [vmem:[#allocation2 + $0x3d0] ss:$20 sps:$4 sm:$0xff]  }
 0x61b   :  { %v7512_v24 = vpop.f32.mrf.mxu1  ;;  %v4297_v11 = vpop.f32.mrf.mxu0 }
 0x61c   :  { %v7514_v26 = vadd.f32 %v4297_v11, %v3945_v4 }
 0x61d   :  { %v4010_v3 = vpop.f32.mrf.mxu1  ;;  %v4299_v27 = vpop.f32.mrf.mxu0 }
 0x61f   :  { %v7518_v23 = vpop.f32.mrf.mxu1  ;;  %v4302_v21 = vpop.f32.mrf.mxu0  ;;  %5700 = vmatmul.mubr.bf16.vlgmr.msra.gmra.mxu0 %v6322_v43  ;;  %5740 = vmatmul.mubr.bf16.gmra.mxu1 %v6323_v8  ;;  %v6326_v8 = vld [vmem:[#allocation2 + $0x88] ss:$20 sps:$4 sm:$0xff]  }
 0x620   :  { %v7520_v31 = vadd.f32 %v4302_v21, %v3950_v28  ;;  %5703 = vmatprep.mubr.bf16.mxu0 %v6324_v44  ;;  %5743 = vmatprep.mubr.bf16.mxu1 %v6325_v9  ;;  %v3958_v28 = vadd.f32 %v7320_v25, %v7434_v53  ;;  %v6327_v44 = vld [vmem:[#allocation2 + $0x3a8] ss:$20 sps:$4 sm:$0xff]  }
 0x621   :  { %v4015_v22 = vpop.f32.mrf.mxu1  ;;  %v4304_v37 = vpop.f32.mrf.mxu0 }
 0x623   :  { %v7524_v4 = vpop.f32.mrf.mxu1  ;;  %v4305_v5 = vpop.f32.mrf.mxu0 }
 0x624   :  { %v7526_v11 = vadd.f32 %v4305_v5, %v3953_v15  ;;  %v3961_v15 = vadd.f32 %v7320_v25, %v7440_v32 }
 0x625   :  { %v4018_v3 = vpop.f32.mrf.mxu1  ;;  %v4307_v27 = vpop.f32.mrf.mxu0 }
 0x627   :  { %v7530_v21 = vpop.f32.mrf.mxu1  ;;  %v4310_v43 = vpop.f32.mrf.mxu0  ;;  %5704 = vmatmul.mubr.bf16.gmra.mxu0 %v6326_v8  ;;  %5744 = vmatmul.mubr.bf16.gmra.mxu1 %v6327_v44  ;;  %v3966_v8 = vadd.f32 %v7320_v25, %v7446_v33 }
 0x628   :  { %v7532_v9 = vadd.f32 %v4310_v43, %v3958_v28  ;;  %5747 = vmatprep.mubr.bf16.mxu1 %v6328_v52  ;;  %v6329_v43 = vld [vmem:[#allocation2 + $0x3f8] ss:$20 sps:$4 sm:$0xff]  }
 0x629   :  { %v4023_v22 = vpop.f32.mrf.mxu1  ;;  %v4312_v37 = vpop.f32.mrf.mxu0 }
 0x62a   :  { %v6330_v22 = vld [vmem:[#allocation2 + $0x420] ss:$20 sps:$4 sm:$0xff]  }
 0x62b   :  { %v7536_v5 = vpop.f32.mrf.mxu1  ;;  %v4313_v3 = vpop.f32.mrf.mxu0 }
 0x62c   :  { %v7538_v53 = vadd.f32 %v4313_v3, %v3961_v15  ;;  %v3969_v15 = vadd.f32 %v7320_v25, %v7452_v47 }
 0x62d   :  { %v4026_v27 = vpop.f32.mrf.mxu1  ;;  %v4315_v56 = vpop.f32.mrf.mxu0 }
 0x62f   :  { %v7542_v44 = vpop.f32.mrf.mxu1  ;;  %v4318_v28 = vpop.f32.mrf.mxu0  ;;  %5748 = vmatmul.mubr.bf16.gmra.mxu1 %v6329_v43 }
 0x630   :  { %v7544_v52 = vadd.f32 %v4318_v28, %v3966_v8  ;;  %5751 = vmatprep.mubr.bf16.mxu1 %v6330_v22  ;;  %v6331_v28 = vld [vmem:[#allocation2 + $0x448] ss:$20 sps:$4 sm:$0xff]  }
 0x631   :  { %v4031_v32 = vpop.f32.mrf.mxu1  ;;  %v4320_v37 = vpop.f32.mrf.mxu0 }
 0x632   :  { %v6332_v32 = vld [vmem:[#allocation2 + $0x470] ss:$20 sps:$4 sm:$0xff]  }
 0x633   :  { %v7548_v3 = vpop.f32.mrf.mxu1  ;;  %v4321_v56 = vpop.f32.mrf.mxu0 }
 0x634   :  { %v7550_v27 = vadd.f32 %v4321_v56, %v3969_v15  ;;  %v3977_v15 = vadd.f32 %v7320_v25, %v7464_v10 }
 0x635   :  { %v4034_v33 = vpop.f32.mrf.mxu1  ;;  %v4323_v36 = vpop.f32.mrf.mxu0 }
 0x637   :  { %v7554_v43 = vpop.f32.mrf.mxu1  ;;  %v4326_v8 = vpop.f32.mrf.mxu0  ;;  %5752 = vmatmul.mubr.bf16.gmra.mxu1 %v6331_v28 }
 0x638   :  { %v7556_v22 = vadd.f32 %v4326_v8, %v3974_v13  ;;  %5755 = vmatprep.mubr.bf16.mxu1 %v6332_v32  ;;  %v6333_v8 = vld [vmem:[#allocation2 + $0x498] ss:$20 sps:$4 sm:$0xff]  }
 0x639   :  { %v4039_v47 = vpop.f32.mrf.mxu1  ;;  %v4328_v37 = vpop.f32.mrf.mxu0 }
 0x63a   :  { %v6334_v47 = vld [vmem:[#allocation2 + $0x4c0] ss:$20 sps:$4 sm:$0xff]  }
 0x63b   :  { %v7560_v56 = vpop.f32.mrf.mxu1  ;;  %v4329_v36 = vpop.f32.mrf.mxu0 }
 0x63c   :  { %v7562_v33 = vadd.f32 %v4329_v36, %v3977_v15  ;;  %v3985_v15 = vadd.f32 %v7320_v25, %v7476_v17 }
 0x63d   :  { %v4042_v40 = vpop.f32.mrf.mxu1  ;;  %v4331_v46 = vpop.f32.mrf.mxu0 }
 0x63f   :  { %v7566_v28 = vpop.f32.mrf.mxu1  ;;  %v4334_v13 = vpop.f32.mrf.mxu0  ;;  %5756 = vmatmul.mubr.bf16.gmra.mxu1 %v6333_v8 }
 0x640   :  { %v7568_v32 = vadd.f32 %v4334_v13, %v3982_v39  ;;  %5759 = vmatprep.mubr.bf16.mxu1 %v6334_v47  ;;  %v6335_v13 = vld [vmem:[#allocation2 + $0x4e8] ss:$20 sps:$4 sm:$0xff]  }
 0x641   :  { %v4047_v10 = vpop.f32.mrf.mxu1  ;;  %v4336_v37 = vpop.f32.mrf.mxu0 }
 0x642   :  { %7949 = vst [vmem:[#allocation24_spill] sm:$0xff] %v7568_v32  ;;  %v6336_v10 = vld [vmem:[#allocation2 + $0x510] ss:$20 sps:$4 sm:$0xff]   ;;  %v3998_v32 = vadd.f32 %v7320_v25, %v7494_v35 }
 0x643   :  { %v7572_v36 = vpop.f32.mrf.mxu1  ;;  %v4337_v46 = vpop.f32.mrf.mxu0 }
 0x644   :  { %v7574_v40 = vadd.f32 %v4337_v46, %v3985_v15  ;;  %v3993_v15 = vadd.f32 %v7320_v25, %v7488_v14 }
 0x645   :  { %v4050_v57 = vpop.f32.mrf.mxu1  ;;  %v4339_v54 = vpop.f32.mrf.mxu0 }
 0x646   :  { %7950 = vst [vmem:[#allocation22_spill] sm:$0xff] %v7574_v40 }
 0x647   :  { %v7578_v8 = vpop.f32.mrf.mxu1  ;;  %v4342_v39 = vpop.f32.mrf.mxu0  ;;  %5760 = vmatmul.mubr.bf16.gmra.mxu1 %v6335_v13 }
 0x648   :  { %v7580_v47 = vadd.f32 %v4342_v39, %v3990_v7  ;;  %5763 = vmatprep.mubr.bf16.mxu1 %v6336_v10  ;;  %v6337_v39 = vld [vmem:[#allocation2 + $0x538] ss:$20 sps:$4 sm:$0xff]  }
 0x649   :  { %v4055_v17 = vpop.f32.mrf.mxu1  ;;  %v4344_v37 = vpop.f32.mrf.mxu0 }
 0x64a   :  { %7951 = vst [vmem:[#allocation27_spill] sm:$0xff] %v7580_v47  ;;  %v6338_v17 = vld [vmem:[#allocation2 + $0x560] ss:$20 sps:$4 sm:$0xff]   ;;  %v4006_v47 = vadd.f32 %v7320_v25, %v7506_v50 }
 0x64b   :  { %v7584_v46 = vpop.f32.mrf.mxu1  ;;  %v4345_v54 = vpop.f32.mrf.mxu0 }
 0x64c   :  { %v7586_v57 = vadd.f32 %v4345_v54, %v3993_v15  ;;  %v4001_v15 = vadd.f32 %v7320_v25, %v7500_v19 }
 0x64d   :  { %v4058_v16 = vpop.f32.mrf.mxu1  ;;  %v4347_v40 = vpop.f32.mrf.mxu0 }
 0x64e   :  { %7952 = vst [vmem:[#allocation25_spill] sm:$0xff] %v7586_v57 }
 0x64f   :  { %v7590_v13 = vpop.f32.mrf.mxu1  ;;  %v4350_v7 = vpop.f32.mrf.mxu0  ;;  %5764 = vmatmul.mubr.bf16.gmra.mxu1 %v6337_v39 }
 0x650   :  { %v7592_v10 = vadd.f32 %v4350_v7, %v3998_v32  ;;  %5767 = vmatprep.mubr.bf16.mxu1 %v6338_v17  ;;  %v6339_v7 = vld [vmem:[#allocation2 + $0x588] ss:$20 sps:$4 sm:$0xff]  }
 0x651   :  { %v4063_v14 = vpop.f32.mrf.mxu1  ;;  %v4352_v37 = vpop.f32.mrf.mxu0 }
 0x652   :  { %7953 = vst [vmem:[#allocation28_spill] sm:$0xff] %v7592_v10  ;;  %v6340_v14 = vld [vmem:[#allocation2 + $0x5b0] ss:$20 sps:$4 sm:$0xff]   ;;  %v4014_v10 = vadd.f32 %v7320_v25, %v7518_v23 }
 0x653   :  { %v7596_v54 = vpop.f32.mrf.mxu1  ;;  %v4353_v40 = vpop.f32.mrf.mxu0 }
 0x654   :  { %v7598_v16 = vadd.f32 %v4353_v40, %v4001_v15  ;;  %v4009_v15 = vadd.f32 %v7320_v25, %v7512_v24 }
 0x655   :  { %v4066_v35 = vpop.f32.mrf.mxu1  ;;  %v4355_v57 = vpop.f32.mrf.mxu0 }
 0x656   :  { %7954 = vst [vmem:[#allocation26_spill] sm:$0xff] %v7598_v16 }
 0x657   :  { %v7602_v39 = vpop.f32.mrf.mxu1  ;;  %v4358_v32 = vpop.f32.mrf.mxu0  ;;  %5768 = vmatmul.mubr.bf16.gmra.mxu1 %v6339_v7 }
 0x658   :  { %v7604_v17 = vadd.f32 %v4358_v32, %v4006_v47  ;;  %5771 = vmatprep.mubr.bf16.mxu1 %v6340_v14  ;;  %v6341_v32 = vld [vmem:[#allocation2 + $0x5d8] ss:$20 sps:$4 sm:$0xff]  }
 0x659   :  { %v4071_v19 = vpop.f32.mrf.mxu1  ;;  %v4360_v37 = vpop.f32.mrf.mxu0 }
 0x65a   :  { %7955 = vst [vmem:[#allocation31_spill] sm:$0xff] %v7604_v17  ;;  %v6342_v19 = vld [vmem:[#allocation2 + $0x600] ss:$20 sps:$4 sm:$0xff]   ;;  %v4022_v17 = vadd.f32 %v7320_v25, %v7530_v21  ;;  %v4030_v21 = vadd.f32 %v7320_v25, %v7542_v44  ;;  %v4038_v44 = vadd.f32 %v7320_v25, %v7554_v43  ;;  %v4046_v43 = vadd.f32 %v7320_v25, %v7566_v28 }
 0x65b   :  { %v7608_v40 = vpop.f32.mrf.mxu1  ;;  %v4361_v57 = vpop.f32.mrf.mxu0  ;;  %v4054_v28 = vadd.f32 %v7320_v25, %v7578_v8  ;;  %v4062_v8 = vadd.f32 %v7320_v25, %v7590_v13  ;;  %v4070_v13 = vadd.f32 %v7320_v25, %v7602_v39 }
 0x65c   :  { %v7610_v35 = vadd.f32 %v4361_v57, %v4009_v15  ;;  %v4017_v15 = vadd.f32 %v7320_v25, %v7524_v4  ;;  %v4025_v4 = vadd.f32 %v7320_v25, %v7536_v5  ;;  %v4033_v5 = vadd.f32 %v7320_v25, %v7548_v3 }
 0x65d   :  { %v4074_v50 = vpop.f32.mrf.mxu1  ;;  %v4363_v16 = vpop.f32.mrf.mxu0  ;;  %v4041_v3 = vadd.f32 %v7320_v25, %v7560_v56  ;;  %v4049_v56 = vadd.f32 %v7320_v25, %v7572_v36  ;;  %v4057_v36 = vadd.f32 %v7320_v25, %v7584_v46  ;;  %v4065_v46 = vadd.f32 %v7320_v25, %v7596_v54 }
 0x65e   :  { %7956 = vst [vmem:[#allocation29_spill] sm:$0xff] %v7610_v35  ;;  %v4073_v54 = vadd.f32 %v7320_v25, %v7608_v40 }
 0x65f   :  { %v7614_v7 = vpop.f32.mrf.mxu1  ;;  %v4366_v47 = vpop.f32.mrf.mxu0  ;;  %5772 = vmatmul.mubr.bf16.gmra.mxu1 %v6341_v32 }
 0x660   :  { %v7616_v14 = vadd.f32 %v4366_v47, %v4014_v10  ;;  %5775 = vmatprep.mubr.bf16.mxu1 %v6342_v19  ;;  %v6343_v47 = vld [vmem:[#allocation2 + $0x628] ss:$20 sps:$4 sm:$0xff]   ;;  %v4078_v39 = vadd.f32 %v7320_v25, %v7614_v7 }
 0x661   :  { %v4079_v24 = vpop.f32.mrf.mxu1  ;;  %v4368_v37 = vpop.f32.mrf.mxu0 }
 0x662   :  { %7957 = vst [vmem:[#allocation32_spill] sm:$0xff] %v7616_v14 }
 0x663   :  { %v7620_v57 = vpop.f32.mrf.mxu1  ;;  %v4369_v16 = vpop.f32.mrf.mxu0 }
 0x664   :  { %v7622_v50 = vadd.f32 %v4369_v16, %v4017_v15  ;;  %v4081_v40 = vadd.f32 %v7320_v25, %v7620_v57 }
 0x665   :  { %v4082_v23 = vpop.f32.mrf.mxu1  ;;  %v4371_v35 = vpop.f32.mrf.mxu0 }
 0x666   :  { %7958 = vst [vmem:[#allocation30_spill] sm:$0xff] %v7622_v50 }
 0x667   :  { %v7626_v32 = vpop.f32.mrf.mxu1  ;;  %v4374_v10 = vpop.f32.mrf.mxu0  ;;  %5776 = vmatmul.mubr.bf16.gmra.mxu1 %v6343_v47 }
 0x668   :  { %v7628_v19 = vadd.f32 %v4374_v10, %v4022_v17 }
 0x669   :  { %v4087_v24 = vpop.f32.mrf.mxu1  ;;  %v4376_v37 = vpop.f32.mrf.mxu0 }
 0x66a   :  { %7959 = vst [vmem:[#allocation35_spill] sm:$0xff] %v7628_v19 }
 0x66b   :  { %v7632_v14 = vpop.f32.mrf.mxu1  ;;  %v4377_v15 = vpop.f32.mrf.mxu0 }
 0x66c   :  { %v7634_v16 = vadd.f32 %v4377_v15, %v4025_v4 }
 0x66d   :  { %v4090_v35 = vpop.f32.mrf.mxu1  ;;  %v4379_v23 = vpop.f32.mrf.mxu0 }
 0x66e   :  { %7960 = vst [vmem:[#allocation33_spill] sm:$0xff] %v7634_v16 }
 0x66f   :  { %v7638_v50 = vpop.f32.mrf.mxu1  ;;  %v4382_v47 = vpop.f32.mrf.mxu0 }
 0x670   :  { %v7640_v17 = vadd.f32 %v4382_v47, %v4030_v21 }
 0x671   :  { %v4095_v10 = vpop.f32.mrf.mxu1  ;;  %v4384_v24 = vpop.f32.mrf.mxu0 }
 0x672   :  { %7961 = vst [vmem:[#allocation36_spill] sm:$0xff] %v7640_v17 }
 0x673   :  { %v7644_v37 = vpop.f32.mrf.mxu1  ;;  %v4385_v19 = vpop.f32.mrf.mxu0 }
 0x674   :  { %v7646_v4 = vadd.f32 %v4385_v19, %v4033_v5 }
 0x675   :  { %v4098_v15 = vpop.f32.mrf.mxu1  ;;  %v4387_v35 = vpop.f32.mrf.mxu0 }
 0x676   :  { %7962 = vst [vmem:[#allocation34_spill] sm:$0xff] %v7646_v4 }
 0x677   :  { %v7650_v23 = vpop.f32.mrf.mxu1  ;;  %v4390_v16 = vpop.f32.mrf.mxu0 }
 0x678   :  { %v7652_v21 = vadd.f32 %v4390_v16, %v4038_v44 }
 0x679   :  { %v4103_v47 = vpop.f32.mrf.mxu1  ;;  %v4392_v10 = vpop.f32.mrf.mxu0 }
 0x67a   :  { %7963 = vst [vmem:[#allocation39_spill] sm:$0xff] %v7652_v21 }
 0x67b   :  { %v7656_v24 = vpop.f32.mrf.mxu1  ;;  %v4393_v17 = vpop.f32.mrf.mxu0 }
 0x67c   :  { %v7658_v19 = vadd.f32 %v4393_v17, %v4041_v3 }
 0x67d   :  { %v4106_v5 = vpop.f32.mrf.mxu1  ;;  %v4395_v15 = vpop.f32.mrf.mxu0 }
 0x67e   :  { %7964 = vst [vmem:[#allocation37_spill] sm:$0xff] %v7658_v19 }
 0x67f   :  { %v7662_v35 = vpop.f32.mrf.mxu1  ;;  %v4398_v4 = vpop.f32.mrf.mxu0 }
 0x680   :  { %v7664_v16 = vadd.f32 %v4398_v4, %v4046_v43 }
 0x681   :  { %v4111_v44 = vpop.f32.mrf.mxu1  ;;  %v4400_v47 = vpop.f32.mrf.mxu0 }
 0x682   :  { %7965 = vst [vmem:[#allocation40_spill] sm:$0xff] %v7664_v16 }
 0x683   :  { %v7668_v10 = vpop.f32.mrf.mxu1  ;;  %v4401_v21 = vpop.f32.mrf.mxu0 }
 0x684   :  { %v7670_v17 = vadd.f32 %v4401_v21, %v4049_v56 }
 0x685   :  { %v4114_v3 = vpop.f32.mrf.mxu1  ;;  %v4403_v5 = vpop.f32.mrf.mxu0 }
 0x686   :  { %7966 = vst [vmem:[#allocation38_spill] sm:$0xff] %v7670_v17 }
 0x687   :  { %v7674_v15 = vpop.f32.mrf.mxu1  ;;  %v4406_v19 = vpop.f32.mrf.mxu0 }
 0x688   :  { %v7676_v4 = vadd.f32 %v4406_v19, %v4054_v28 }
 0x689   :  { %v4119_v43 = vpop.f32.mrf.mxu1  ;;  %v4408_v44 = vpop.f32.mrf.mxu0 }
 0x68a   :  { %7967 = vst [vmem:[#allocation43_spill] sm:$0xff] %v7676_v4 }
 0x68b   :  { %v7680_v47 = vpop.f32.mrf.mxu1  ;;  %v4409_v16 = vpop.f32.mrf.mxu0 }
 0x68c   :  { %v7682_v21 = vadd.f32 %v4409_v16, %v4057_v36 }
 0x68d   :  { %v4122_v56 = vpop.f32.mrf.mxu1  ;;  %v4411_v3 = vpop.f32.mrf.mxu0 }
 0x68e   :  { %7968 = vst [vmem:[#allocation41_spill] sm:$0xff] %v7682_v21 }
 0x68f   :  { %v7686_v5 = vpop.f32.mrf.mxu1  ;;  %v4414_v17 = vpop.f32.mrf.mxu0 }
 0x690   :  { %v7688_v19 = vadd.f32 %v4414_v17, %v4062_v8 }
 0x691   :  { %v4127_v28 = vpop.f32.mrf.mxu1  ;;  %v4416_v43 = vpop.f32.mrf.mxu0 }
 0x692   :  { %7969 = vst [vmem:[#allocation44_spill] sm:$0xff] %v7688_v19 }
 0x693   :  { %v7692_v44 = vpop.f32.mrf.mxu1  ;;  %v4417_v4 = vpop.f32.mrf.mxu0 }
 0x694   :  { %v7694_v16 = vadd.f32 %v4417_v4, %v4065_v46 }
 0x695   :  { %v4130_v36 = vpop.f32.mrf.mxu1  ;;  %v4419_v56 = vpop.f32.mrf.mxu0 }
 0x696   :  { %7970 = vst [vmem:[#allocation42_spill] sm:$0xff] %v7694_v16 }
 0x697   :  { %v7698_v3 = vpop.f32.mrf.mxu1  ;;  %v4422_v21 = vpop.f32.mrf.mxu0 }
 0x698   :  { %v7700_v17 = vadd.f32 %v4422_v21, %v4070_v13 }
 0x699   :  { %v4135_v8 = vpop.f32.mrf.mxu1  ;;  %v4424_v28 = vpop.f32.mrf.mxu0 }
 0x69b   :  { %v7704_v43 = vpop.f32.mrf.mxu1  ;;  %v4425_v19 = vpop.f32.mrf.mxu0 }
 0x69c   :  { %v7706_v4 = vadd.f32 %v4425_v19, %v4073_v54 }
 0x69d   :  { %v4138_v46 = vpop.f32.mrf.mxu1  ;;  %v4427_v36 = vpop.f32.mrf.mxu0 }
 0x69f   :  { %v4430_v56 = vpop.f32.mrf.mxu0  ;;  %v5709_v16 = vpop.f32.mrf.mxu1 }
 0x6a0   :  { %v7710_v49 = vadd.f32 %v4430_v56, %v4078_v39  ;;  %v4568_v21 = vadd.f32 %v5709_v16, %v7388_v6  ;;  %v4086_v6 = vadd.f32 %v7320_v25, %v7626_v32 }
 0x6a1   :  { %v4432_v13 = vpop.f32.mrf.mxu0  ;;  %v4559_v8 = vpop.f32.mrf.mxu1 }
 0x6a2   :  { %4856 = vst [vmem:[#allocation10 + $0x50] sm:$0xff] %v4568_v21  ;;  %v4560_v19 = vadd.f32 %v4559_v8, %v7376_v30 }
 0x6a3   :  { %v4433_v28 = vpop.f32.mrf.mxu0  ;;  %v5710_v54 = vpop.f32.mrf.mxu1 }
 0x6a4   :  { %4854 = vst [vmem:[#allocation10 + $0x40] sm:$0xff] %v4560_v19  ;;  %v7716_v46 = vadd.f32 %v4433_v28, %v4081_v40  ;;  %v4571_v7 = vadd.f32 %v5710_v54, %v7394_v29  ;;  %v4089_v29 = vadd.f32 %v7320_v25, %v7632_v14 }
 0x6a5   :  { %v4435_v36 = vpop.f32.mrf.mxu0  ;;  %v4562_v39 = vpop.f32.mrf.mxu1 }
 0x6a6   :  { %4857 = vst [vmem:[#allocation10 + $0x58] sm:$0xff] %v4571_v7  ;;  %v4563_v16 = vadd.f32 %v4562_v39, %v7382_v38 }
 0x6a7   :  { %v4438_v56 = vpop.f32.mrf.mxu0  ;;  %v5713_v57 = vpop.f32.mrf.mxu1 }
 0x6a8   :  { %4855 = vst [vmem:[#allocation10 + $0x48] sm:$0xff] %v4563_v16  ;;  %v7722_v21 = vadd.f32 %v4438_v56, %v4086_v6  ;;  %v4584_v30 = vadd.f32 %v5713_v57, %v7412_v12  ;;  %v4094_v12 = vadd.f32 %v7320_v25, %v7638_v50 }
 0x6a9   :  { %v4440_v13 = vpop.f32.mrf.mxu0  ;;  %v4575_v8 = vpop.f32.mrf.mxu1 }
 0x6aa   :  { %4860 = vst [vmem:[#allocation10 + $0x70] sm:$0xff] %v4584_v30  ;;  %v4576_v40 = vadd.f32 %v4575_v8, %v7400_v60 }
 0x6ab   :  { %v4441_v19 = vpop.f32.mrf.mxu0  ;;  %v5714_v32 = vpop.f32.mrf.mxu1 }
 0x6ac   :  { %4858 = vst [vmem:[#allocation10 + $0x60] sm:$0xff] %v4576_v40  ;;  %v7728_v28 = vadd.f32 %v4441_v19, %v4089_v29  ;;  %v4587_v38 = vadd.f32 %v5714_v32, %v7418_v42  ;;  %v7740_v42 = vld [vmem:[%s7865_s5] ss:$0 sm:$0xff]  ;;  %s6462_s5 = smov [#allocation10]  }
 0x6ad   :  { %v4443_v54 = vpop.f32.mrf.mxu0  ;;  %v4578_v7 = vpop.f32.mrf.mxu1  ;;  %v4097_v25 = vadd.f32 %v7740_v42, %v7644_v37  ;;  %v4102_v29 = vadd.f32 %v7740_v42, %v7650_v23  ;;  %s4931_s24 = sshll.u32 %s6462_s5, 4  ;;  %s4932_s24 = int_to_ptr.vmem [resolvable:$true] %s4931_s24 }
 0x6ae   :  { %4861 = vst [vmem:[#allocation10 + $0x78] sm:$0xff] %v4587_v38  ;;  %v4579_v36 = vadd.f32 %v4578_v7, %v7406_v51  ;;  %s6425_s25 = scalar_lea.vmem %s4932_s24, 10240  ;;  %p6430_p7 = scmp.lt.s32.totalorder %s4932_s24, %s4932_s24 }
 0x6af   :  { %v4446_v39 = vpop.f32.mrf.mxu0  ;;  %v5717_v14 = vpop.f32.mrf.mxu1  ;;  %p6426_p6 = scmp.ne.s32.totalorder %s4932_s24, %s6425_s25  ;;  %p6431_p8 = scmp.lt.s32.totalorder %s6425_s25, %s6425_s25 }
 0x6b0   :  { %4859 = vst [vmem:[#allocation10 + $0x68] sm:$0xff] %v4579_v36  ;;  %v7734_v6 = vadd.f32 %v4446_v39, %v4094_v12  ;;  %v4600_v60 = vadd.f32 %v5717_v14, %v7436_v63 }
 0x6b1   :  { %v4448_v16 = vpop.f32.mrf.mxu0  ;;  %v4591_v56 = vpop.f32.mrf.mxu1  ;;  %p6432_p9 = por %p6431_p8, %p6430_p7 }
 0x6b2   :  { %4864 = vst [vmem:[#allocation10 + $0x90] sm:$0xff] %v4600_v60  ;;  %v4592_v51 = vadd.f32 %v4591_v56, %v7424_v55 }
 0x6b3   :  { %v4449_v50 = vpop.f32.mrf.mxu0  ;;  %v5718_v57 = vpop.f32.mrf.mxu1  ;;  %p6433_p10 = pnand %p6432_p9, %p6426_p6 }
 0x6b4   :  { %4862 = vst [vmem:[#allocation10 + $0x80] sm:$0xff] %v4592_v51  ;;  %v7745_v30 = vadd.f32 %v4449_v50, %v4097_v25  ;;  %v4603_v63 = vadd.f32 %v5718_v57, %v7442_v48  ;;  %v4105_v48 = vadd.f32 %v7740_v42, %v7656_v24 }
 0x6b5   :  { %v4451_v13 = vpop.f32.mrf.mxu0  ;;  %v4594_v8 = vpop.f32.mrf.mxu1 }
 0x6b6   :  { %4865 = vst [vmem:[#allocation10 + $0x98] sm:$0xff] %v4603_v63  ;;  %v4595_v40 = vadd.f32 %v4594_v8, %v7430_v59 }
 0x6b7   :  { %v4454_v19 = vpop.f32.mrf.mxu0  ;;  %v5721_v37 = vpop.f32.mrf.mxu1 }
 0x6b8   :  { %4863 = vst [vmem:[#allocation10 + $0x88] sm:$0xff] %v4595_v40  ;;  %v7751_v32 = vadd.f32 %v4454_v19, %v4102_v29  ;;  %v4616_v55 = vadd.f32 %v5721_v37, %v7460_v18  ;;  %v4110_v18 = vadd.f32 %v7740_v42, %v7662_v35 }
 0x6b9   :  { %v4456_v38 = vpop.f32.mrf.mxu0  ;;  %v4607_v54 = vpop.f32.mrf.mxu1 }
 0x6ba   :  { %4868 = vst [vmem:[#allocation10 + $0xb0] sm:$0xff] %v4616_v55  ;;  %v4608_v7 = vadd.f32 %v4607_v54, %v7448_v45 }
 0x6bb   :  { %v4457_v12 = vpop.f32.mrf.mxu0  ;;  %v5722_v23 = vpop.f32.mrf.mxu1 }
 0x6bc   :  { %4866 = vst [vmem:[#allocation10 + $0xa0] sm:$0xff] %v4608_v7  ;;  %v7757_v36 = vadd.f32 %v4457_v12, %v4105_v48  ;;  %v4619_v59 = vadd.f32 %v5722_v23, %v7466_v2  ;;  %v4113_v2 = vadd.f32 %v7740_v42, %v7668_v10 }
 0x6bd   :  { %v4459_v39 = vpop.f32.mrf.mxu0  ;;  %v4610_v14 = vpop.f32.mrf.mxu1 }
 0x6be   :  { %4869 = vst [vmem:[#allocation10 + $0xb8] sm:$0xff] %v4619_v59  ;;  %v4611_v60 = vadd.f32 %v4610_v14, %v7454_v62 }
 0x6bf   :  { %v4462_v16 = vpop.f32.mrf.mxu0  ;;  %v5725_v24 = vpop.f32.mrf.mxu1 }
 0x6c0   :  { %4867 = vst [vmem:[#allocation10 + $0xa8] sm:$0xff] %v4611_v60  ;;  %v7763_v56 = vadd.f32 %v4462_v16, %v4110_v18  ;;  %v4632_v45 = vadd.f32 %v5725_v24, %v7484_v61  ;;  %v4118_v61 = vadd.f32 %v7740_v42, %v7674_v15 }
 0x6c1   :  { %v4464_v25 = vpop.f32.mrf.mxu0  ;;  %v4623_v51 = vpop.f32.mrf.mxu1 }
 0x6c2   :  { %4872 = vst [vmem:[#allocation10 + $0xd0] sm:$0xff] %v4632_v45  ;;  %v4624_v50 = vadd.f32 %v4623_v51, %v7472_v20 }
 0x6c3   :  { %v4465_v57 = vpop.f32.mrf.mxu0  ;;  %v5726_v35 = vpop.f32.mrf.mxu1 }
 0x6c4   :  { %4870 = vst [vmem:[#allocation10 + $0xc0] sm:$0xff] %v4624_v50  ;;  %v7769_v63 = vadd.f32 %v4465_v57, %v4113_v2  ;;  %v4635_v62 = vadd.f32 %v5726_v35, %v7490_v58  ;;  %v4121_v58 = vadd.f32 %v7740_v42, %v7680_v47 }
 0x6c5   :  { %v4467_v13 = vpop.f32.mrf.mxu0  ;;  %v4626_v8 = vpop.f32.mrf.mxu1 }
 0x6c6   :  { %4873 = vst [vmem:[#allocation10 + $0xd8] sm:$0xff] %v4635_v62  ;;  %v4627_v29 = vadd.f32 %v4626_v8, %v7478_v41 }
 0x6c7   :  { %v4470_v40 = vpop.f32.mrf.mxu0  ;;  %v5729_v10 = vpop.f32.mrf.mxu1 }
 0x6c8   :  { %4871 = vst [vmem:[#allocation10 + $0xc8] sm:$0xff] %v4627_v29  ;;  %v7775_v19 = vadd.f32 %v4470_v40, %v4118_v61  ;;  %v4648_v20 = vadd.f32 %v5729_v10, %v7508_v34  ;;  %v4126_v34 = vadd.f32 %v7740_v42, %v7686_v5 }
 0x6c9   :  { %v4472_v37 = vpop.f32.mrf.mxu0  ;;  %v4639_v55 = vpop.f32.mrf.mxu1 }
 0x6ca   :  { %4876 = vst [vmem:[#allocation10 + $0xf0] sm:$0xff] %v4648_v20  ;;  %v4640_v38 = vadd.f32 %v4639_v55, %v7496_v1  ;;  %v7971_v20 = vld [vmem:[#allocation19_spill] sm:$0xff] }
 0x6cb   :  { %v4473_v54 = vpop.f32.mrf.mxu0  ;;  %v5730_v15 = vpop.f32.mrf.mxu1 }
 0x6cc   :  { %4874 = vst [vmem:[#allocation10 + $0xe0] sm:$0xff] %v4640_v38  ;;  %v7781_v48 = vadd.f32 %v4473_v54, %v4121_v58  ;;  %v4651_v41 = vadd.f32 %v5730_v15, %v7514_v26  ;;  %v4129_v26 = vadd.f32 %v7740_v42, %v7692_v44  ;;  %v7973_v58 = vld [vmem:[#allocation16_spill] sm:$0xff] }
 0x6cd   :  { %v4475_v7 = vpop.f32.mrf.mxu0  ;;  %v4642_v12 = vpop.f32.mrf.mxu1  ;;  %v7974_v54 = vld [vmem:[#allocation24_spill] sm:$0xff] }
 0x6ce   :  { %4877 = vst [vmem:[#allocation10 + $0xf8] sm:$0xff] %v4651_v41  ;;  %v4643_v23 = vadd.f32 %v4642_v12, %v7502_v0  ;;  %v7976_v12 = vld [vmem:[#allocation25_spill] sm:$0xff] }
 0x6cf   :  { %v4478_v59 = vpop.f32.mrf.mxu0  ;;  %v5733_v47 = vpop.f32.mrf.mxu1 }
 0x6d0   :  { %4875 = vst [vmem:[#allocation10 + $0xe8] sm:$0xff] %v4643_v23  ;;  %v7787_v39 = vadd.f32 %v4478_v59, %v4126_v34  ;;  %v4664_v1 = vadd.f32 %v5733_v47, %v7532_v9  ;;  %v4134_v9 = vadd.f32 %v7740_v42, %v7698_v3  ;;  %v7977_v47 = vld [vmem:[#allocation15_spill] sm:$0xff] }
 0x6d1   :  { %v4480_v14 = vpop.f32.mrf.mxu0  ;;  %v4655_v18 = vpop.f32.mrf.mxu1 }
 0x6d2   :  { %4880 = vst [vmem:[#allocation10 + $0x110] sm:$0xff] %v4664_v1  ;;  %v4656_v60 = vadd.f32 %v4655_v18, %v7520_v31  ;;  %v7978_v14 = vld [vmem:[#allocation22_spill] sm:$0xff] }
 0x6d3   :  { %v4481_v16 = vpop.f32.mrf.mxu0  ;;  %v5734_v5 = vpop.f32.mrf.mxu1 }
 0x6d4   :  { %4878 = vst [vmem:[#allocation10 + $0x100] sm:$0xff] %v4656_v60  ;;  %v7793_v24 = vadd.f32 %v4481_v16, %v4129_v26  ;;  %v4667_v0 = vadd.f32 %v5734_v5, %v7538_v53  ;;  %v4137_v53 = vadd.f32 %v7740_v42, %v7704_v43  ;;  %v7972_v42 = vld [vmem:[#allocation27_spill] sm:$0xff] }
 0x6d5   :  { %v4483_v45 = vpop.f32.mrf.mxu0  ;;  %v4658_v25 = vpop.f32.mrf.mxu1  ;;  %v7979_v16 = vld [vmem:[#allocation23_spill] sm:$0xff] }
 0x6d6   :  { %4881 = vst [vmem:[#allocation10 + $0x118] sm:$0xff] %v4667_v0  ;;  %v4659_v51 = vadd.f32 %v4658_v25, %v7526_v11  ;;  %v7980_v0 = vld [vmem:[#allocation31_spill] sm:$0xff] }
 0x6d7   :  { %v4486_v2 = vpop.f32.mrf.mxu0  ;;  %v5737_v44 = vpop.f32.mrf.mxu1 }
 0x6d8   :  { %4879 = vst [vmem:[#allocation10 + $0x108] sm:$0xff] %v4659_v51  ;;  %v7799_v50 = vadd.f32 %v4486_v2, %v4134_v9  ;;  %v4680_v31 = vadd.f32 %v5737_v44, %v7556_v22  ;;  %v7981_v51 = vld [vmem:[#allocation20_spill] sm:$0xff] }
 0x6d9   :  { %v4488_v57 = vpop.f32.mrf.mxu0  ;;  %v4671_v35 = vpop.f32.mrf.mxu1  ;;  %v7982_v44 = vld [vmem:[#allocation28_spill] sm:$0xff] }
 0x6da   :  { %4884 = vst [vmem:[#allocation10 + $0x130] sm:$0xff] %v4680_v31  ;;  %v4672_v62 = vadd.f32 %v4671_v35, %v7544_v52 }
 0x6db   :  { %v4489_v13 = vpop.f32.mrf.mxu0  ;;  %v5738_v3 = vpop.f32.mrf.mxu1 }
 0x6dc   :  { %4882 = vst [vmem:[#allocation10 + $0x120] sm:$0xff] %v4672_v62  ;;  %v7805_v8 = vadd.f32 %v4489_v13, %v4137_v53  ;;  %v4683_v11 = vadd.f32 %v5738_v3, %v7562_v33  ;;  %v7983_v53 = vld [vmem:[#allocation21_spill] sm:$0xff] }
 0x6dd   :  { %v4491_v61 = vpop.f32.mrf.mxu0  ;;  %v4674_v29 = vpop.f32.mrf.mxu1  ;;  %v7984_v13 = vld [vmem:[#allocation29_spill] sm:$0xff] }
 0x6de   :  { %4885 = vst [vmem:[#allocation10 + $0x138] sm:$0xff] %v4683_v11  ;;  %v4675_v22 = vadd.f32 %v4674_v29, %v7550_v27  ;;  %v7975_v27 = vld [vmem:[#allocation17_spill] sm:$0xff]  ;;  %v7985_v29 = vld [vmem:[#allocation18_spill] sm:$0xff] }
 0x6df   :  { %v5701_v40 = vpop.f32.mrf.mxu0  ;;  %v5741_v10 = vpop.f32.mrf.mxu1 }
 0x6e0   :  { %4883 = vst [vmem:[#allocation10 + $0x128] sm:$0xff] %v4675_v22  ;;  %v4536_v43 = vadd.f32 %v5701_v40, %v7971_v20  ;;  %v4696_v37 = vadd.f32 %v5741_v10, %v7972_v42  ;;  %v7986_v40 = vld [vmem:[#allocation26_spill] sm:$0xff] }
 0x6e1   :  { %v4527_v52 = vpop.f32.mrf.mxu0  ;;  %v4687_v55 = vpop.f32.mrf.mxu1 }
 0x6e2   :  { %4848 = vst [vmem:[#allocation10 + $0x10] sm:$0xff] %v4536_v43  ;;  %4888 = vst [vmem:[#allocation10 + $0x150] sm:$0xff] %v4696_v37  ;;  %v4528_v38 = vadd.f32 %v4527_v52, %v7973_v58  ;;  %v4688_v33 = vadd.f32 %v4687_v55, %v7974_v54  ;;  %v7987_v43 = vld [vmem:[#allocation35_spill] sm:$0xff]  ;;  %v7988_v52 = vld [vmem:[#allocation32_spill] sm:$0xff] }
 0x6e3   :  { %v5702_v15 = vpop.f32.mrf.mxu0  ;;  %v5742_v41 = vpop.f32.mrf.mxu1 }
 0x6e4   :  { %4846 = vst [vmem:[#allocation10] sm:$0xff] %v4528_v38  ;;  %4886 = vst [vmem:[#allocation10 + $0x140] sm:$0xff] %v4688_v33  ;;  %v4539_v7 = vadd.f32 %v5702_v15, %v7975_v27  ;;  %v4699_v34 = vadd.f32 %v5742_v41, %v7976_v12  ;;  %v7989_v38 = vld [vmem:[#allocation33_spill] sm:$0xff]  ;;  %v7990_v15 = vld [vmem:[#allocation30_spill] sm:$0xff] }
 0x6e5   :  { %v4530_v23 = vpop.f32.mrf.mxu0  ;;  %v4690_v59 = vpop.f32.mrf.mxu1 }
 0x6e6   :  { %4849 = vst [vmem:[#allocation10 + $0x18] sm:$0xff] %v4539_v7  ;;  %4889 = vst [vmem:[#allocation10 + $0x158] sm:$0xff] %v4699_v34  ;;  %v4531_v1 = vadd.f32 %v4530_v23, %v7977_v47  ;;  %v4691_v18 = vadd.f32 %v4690_v59, %v7978_v14  ;;  %v7991_v7 = vld [vmem:[#allocation39_spill] sm:$0xff]  ;;  %v7992_v23 = vld [vmem:[#allocation36_spill] sm:$0xff] }
 0x6e7   :  { %v5705_v26 = vpop.f32.mrf.mxu0  ;;  %v5745_v60 = vpop.f32.mrf.mxu1 }
 0x6e8   :  { %4847 = vst [vmem:[#allocation10 + $0x8] sm:$0xff] %v4531_v1  ;;  %4887 = vst [vmem:[#allocation10 + $0x148] sm:$0xff] %v4691_v18  ;;  %v4552_v5 = vadd.f32 %v5705_v26, %v7979_v16  ;;  %v4712_v45 = vadd.f32 %v5745_v60, %v7980_v0  ;;  %v7993_v1 = vld [vmem:[#allocation37_spill] sm:$0xff]  ;;  %v7994_v26 = vld [vmem:[#allocation34_spill] sm:$0xff] }
 0x6e9   :  { %v4543_v25 = vpop.f32.mrf.mxu0  ;;  %v4703_v9 = vpop.f32.mrf.mxu1 }
 0x6ea   :  { %4852 = vst [vmem:[#allocation10 + $0x30] sm:$0xff] %v4552_v5  ;;  %4892 = vst [vmem:[#allocation10 + $0x170] sm:$0xff] %v4712_v45  ;;  %v4544_v2 = vadd.f32 %v4543_v25, %v7981_v51  ;;  %v4704_v31 = vadd.f32 %v4703_v9, %v7982_v44  ;;  %v7995_v5 = vld [vmem:[#allocation43_spill] sm:$0xff]  ;;  %v7996_v25 = vld [vmem:[#allocation40_spill] sm:$0xff] }
 0x6eb   :  { %v5706_v57 = vpop.f32.mrf.mxu0  ;;  %v5746_v35 = vpop.f32.mrf.mxu1 }
 0x6ec   :  { %4850 = vst [vmem:[#allocation10 + $0x20] sm:$0xff] %v4544_v2  ;;  %4890 = vst [vmem:[#allocation10 + $0x160] sm:$0xff] %v4704_v31  ;;  %v4555_v62 = vadd.f32 %v5706_v57, %v7983_v53  ;;  %v4715_v3 = vadd.f32 %v5746_v35, %v7984_v13  ;;  %v7997_v2 = vld [vmem:[#allocation41_spill] sm:$0xff]  ;;  %v7998_v57 = vld [vmem:[#allocation38_spill] sm:$0xff] }
 0x6ed   :  { %v4546_v11 = vpop.f32.mrf.mxu0  ;;  %v4706_v61 = vpop.f32.mrf.mxu1 }
 0x6ee   :  { %4853 = vst [vmem:[#allocation10 + $0x38] sm:$0xff] %v4555_v62  ;;  %4893 = vst [vmem:[#allocation10 + $0x178] sm:$0xff] %v4715_v3  ;;  %v4547_v22 = vadd.f32 %v4546_v11, %v7985_v29  ;;  %v4707_v10 = vadd.f32 %v4706_v61, %v7986_v40  ;;  %v7999_v3 = vld [vmem:[#allocation44_spill] sm:$0xff]  ;;  %v8000_v40 = vld [vmem:[#allocation42_spill] sm:$0xff] }
 0x6ef   :  { %v5749_v20 = vpop.f32.mrf.mxu1 }
 0x6f0   :  { %4851 = vst [vmem:[#allocation10 + $0x28] sm:$0xff] %v4547_v22  ;;  %4891 = vst [vmem:[#allocation10 + $0x168] sm:$0xff] %v4707_v10  ;;  %v4728_v42 = vadd.f32 %v5749_v20, %v7987_v43 }
 0x6f1   :  { %v4719_v37 = vpop.f32.mrf.mxu1 }
 0x6f2   :  { %4896 = vst [vmem:[#allocation10 + $0x190] sm:$0xff] %v4728_v42  ;;  %v4720_v55 = vadd.f32 %v4719_v37, %v7988_v52 }
 0x6f3   :  { %v5750_v58 = vpop.f32.mrf.mxu1 }
 0x6f4   :  { %4894 = vst [vmem:[#allocation10 + $0x180] sm:$0xff] %v4720_v55  ;;  %v4731_v54 = vadd.f32 %v5750_v58, %v7989_v38 }
 0x6f5   :  { %v4722_v33 = vpop.f32.mrf.mxu1 }
 0x6f6   :  { %4897 = vst [vmem:[#allocation10 + $0x198] sm:$0xff] %v4731_v54  ;;  %v4723_v41 = vadd.f32 %v4722_v33, %v7990_v15 }
 0x6f7   :  { %v5753_v27 = vpop.f32.mrf.mxu1 }
 0x6f8   :  { %4895 = vst [vmem:[#allocation10 + $0x188] sm:$0xff] %v4723_v41  ;;  %v4744_v12 = vadd.f32 %v5753_v27, %v7991_v7 }
 0x6f9   :  { %v4735_v34 = vpop.f32.mrf.mxu1 }
 0x6fa   :  { %4900 = vst [vmem:[#allocation10 + $0x1b0] sm:$0xff] %v4744_v12  ;;  %v4736_v59 = vadd.f32 %v4735_v34, %v7992_v23 }
 0x6fb   :  { %v5754_v47 = vpop.f32.mrf.mxu1 }
 0x6fc   :  { %4898 = vst [vmem:[#allocation10 + $0x1a0] sm:$0xff] %v4736_v59  ;;  %v4747_v14 = vadd.f32 %v5754_v47, %v7993_v1 }
 0x6fd   :  { %v4738_v18 = vpop.f32.mrf.mxu1 }
 0x6fe   :  { %4901 = vst [vmem:[#allocation10 + $0x1b8] sm:$0xff] %v4747_v14  ;;  %v4739_v60 = vadd.f32 %v4738_v18, %v7994_v26 }
 0x6ff   :  { %v5757_v16 = vpop.f32.mrf.mxu1 }
 0x700   :  { %4899 = vst [vmem:[#allocation10 + $0x1a8] sm:$0xff] %v4739_v60  ;;  %v4760_v0 = vadd.f32 %v5757_v16, %v7995_v5 }
 0x701   :  { %v4751_v45 = vpop.f32.mrf.mxu1 }
 0x702   :  { %4904 = vst [vmem:[#allocation10 + $0x1d0] sm:$0xff] %v4760_v0  ;;  %v4752_v9 = vadd.f32 %v4751_v45, %v7996_v25 }
 0x703   :  { %v5758_v51 = vpop.f32.mrf.mxu1 }
 0x704   :  { %4902 = vst [vmem:[#allocation10 + $0x1c0] sm:$0xff] %v4752_v9  ;;  %v4763_v44 = vadd.f32 %v5758_v51, %v7997_v2 }
 0x705   :  { %v4754_v31 = vpop.f32.mrf.mxu1 }
 0x706   :  { %4905 = vst [vmem:[#allocation10 + $0x1d8] sm:$0xff] %v4763_v44  ;;  %v4755_v35 = vadd.f32 %v4754_v31, %v7998_v57 }
 0x707   :  { %v5761_v53 = vpop.f32.mrf.mxu1 }
 0x708   :  { %4903 = vst [vmem:[#allocation10 + $0x1c8] sm:$0xff] %v4755_v35  ;;  %v4776_v62 = vadd.f32 %v5761_v53, %v7700_v17 }
 0x709   :  { %v4767_v13 = vpop.f32.mrf.mxu1 }
 0x70a   :  { %4908 = vst [vmem:[#allocation10 + $0x1f0] sm:$0xff] %v4776_v62  ;;  %v4768_v11 = vadd.f32 %v4767_v13, %v7999_v3 }
 0x70b   :  { %v5762_v61 = vpop.f32.mrf.mxu1 }
 0x70c   :  { %4906 = vst [vmem:[#allocation10 + $0x1e0] sm:$0xff] %v4768_v11  ;;  %v4779_v29 = vadd.f32 %v5762_v61, %v7706_v4 }
 0x70d   :  { %v4770_v22 = vpop.f32.mrf.mxu1 }
 0x70e   :  { %4909 = vst [vmem:[#allocation10 + $0x1f8] sm:$0xff] %v4779_v29  ;;  %v4771_v10 = vadd.f32 %v4770_v22, %v8000_v40 }
 0x70f   :  { %v5765_v20 = vpop.f32.mrf.mxu1 }
 0x710   :  { %4907 = vst [vmem:[#allocation10 + $0x1e8] sm:$0xff] %v4771_v10  ;;  %v4792_v43 = vadd.f32 %v5765_v20, %v7722_v21 }
 0x711   :  { %v4783_v42 = vpop.f32.mrf.mxu1 }
 0x712   :  { %4912 = vst [vmem:[#allocation10 + $0x210] sm:$0xff] %v4792_v43  ;;  %v4784_v17 = vadd.f32 %v4783_v42, %v7710_v49 }
 0x713   :  { %v5766_v37 = vpop.f32.mrf.mxu1 }
 0x714   :  { %4910 = vst [vmem:[#allocation10 + $0x200] sm:$0xff] %v4784_v17  ;;  %v4795_v52 = vadd.f32 %v5766_v37, %v7728_v28 }
 0x715   :  { %v4786_v55 = vpop.f32.mrf.mxu1 }
 0x716   :  { %4913 = vst [vmem:[#allocation10 + $0x218] sm:$0xff] %v4795_v52  ;;  %v4787_v4 = vadd.f32 %v4786_v55, %v7716_v46 }
 0x717   :  { %v5769_v58 = vpop.f32.mrf.mxu1 }
 0x718   :  { %4911 = vst [vmem:[#allocation10 + $0x208] sm:$0xff] %v4787_v4  ;;  %v4808_v38 = vadd.f32 %v5769_v58, %v7751_v32 }
 0x719   :  { %v4799_v54 = vpop.f32.mrf.mxu1 }
 0x71a   :  { %4916 = vst [vmem:[#allocation10 + $0x230] sm:$0xff] %v4808_v38  ;;  %v4800_v21 = vadd.f32 %v4799_v54, %v7734_v6 }
 0x71b   :  { %v5770_v33 = vpop.f32.mrf.mxu1 }
 0x71c   :  { %4914 = vst [vmem:[#allocation10 + $0x220] sm:$0xff] %v4800_v21  ;;  %v4811_v49 = vadd.f32 %v5770_v33, %v7757_v36 }
 0x71d   :  { %v4802_v15 = vpop.f32.mrf.mxu1 }
 0x71e   :  { %4917 = vst [vmem:[#allocation10 + $0x238] sm:$0xff] %v4811_v49  ;;  %v4803_v28 = vadd.f32 %v4802_v15, %v7745_v30 }
 0x71f   :  { %v5773_v41 = vpop.f32.mrf.mxu1 }
 0x720   :  { %4915 = vst [vmem:[#allocation10 + $0x228] sm:$0xff] %v4803_v28  ;;  %v4824_v46 = vadd.f32 %v5773_v41, %v7775_v19 }
 0x721   :  { %v4815_v27 = vpop.f32.mrf.mxu1 }
 0x722   :  { %4920 = vst [vmem:[#allocation10 + $0x250] sm:$0xff] %v4824_v46  ;;  %v4816_v32 = vadd.f32 %v4815_v27, %v7763_v56 }
 0x723   :  { %v5774_v7 = vpop.f32.mrf.mxu1 }
 0x724   :  { %4918 = vst [vmem:[#allocation10 + $0x240] sm:$0xff] %v4816_v32  ;;  %v4827_v6 = vadd.f32 %v5774_v7, %v7781_v48 }
 0x725   :  { %v4818_v12 = vpop.f32.mrf.mxu1 }
 0x726   :  { %4921 = vst [vmem:[#allocation10 + $0x258] sm:$0xff] %v4827_v6  ;;  %v4819_v36 = vadd.f32 %v4818_v12, %v7769_v63 }
 0x727   :  { %v5777_v34 = vpop.f32.mrf.mxu1 }
 0x728   :  { %4919 = vst [vmem:[#allocation10 + $0x248] sm:$0xff] %v4819_v36  ;;  %v4840_v30 = vadd.f32 %v5777_v34, %v7799_v50 }
 0x729   :  { %v4831_v23 = vpop.f32.mrf.mxu1 }
 0x72a   :  { %4924 = vst [vmem:[#allocation10 + $0x270] sm:$0xff] %v4840_v30  ;;  %v4832_v19 = vadd.f32 %v4831_v23, %v7787_v39 }
 0x72b   :  { %v5778_v59 = vpop.f32.mrf.mxu1 }
 0x72c   :  { %4922 = vst [vmem:[#allocation10 + $0x260] sm:$0xff] %v4832_v19  ;;  %v4843_v56 = vadd.f32 %v5778_v59, %v7805_v8 }
 0x72d   :  { %v4834_v47 = vpop.f32.mrf.mxu1 }
 0x72e   :  { %4925 = vst [vmem:[#allocation10 + $0x278] sm:$0xff] %v4843_v56  ;;  %v4835_v48 = vadd.f32 %v4834_v47, %v7793_v24 }
 0x730   :  { %4923 = vst [vmem:[#allocation10 + $0x268] sm:$0xff] %v4835_v48 }
 0x731   :  { %6436 = shalt.err (!%p6433_p10)
}
 0x732   :  { %s6463_s26 = smov 128   ;;  %s6464_s27 = smov 8  }
 0x733   :  { %4937 = dma.vmem_to_hbm [thread:$0]  %s4932_s24, 10240, %s7866_s6, [#allocation4], %s6463_s26, %s6463_s26, %s6464_s27  }
 0x734   :  { %6451 = dma.done.wait [#allocation4], 10240  }
 0x735   :  { %6452 = vsyncadd [#allocation4], 4294957056 }
 0x736   :  { %4941 = vsyncpa [#allocation3], 1 }
 0x737   :  { %4942 = vsyncpa [#allocation6], 1 }
 0x738   :  { %4943 = vsyncpa [#allocation9], 1 }
 0x739   :  { %4944 = vsyncpa [#allocation4], 1 }

</bundles_post_ra>
